<compile_context>
chip_gen: v7x
topology: tpu7x:2x2x1
jax: 0.10.0
libtpu: 0.0.40
codegen_flags: <defaults>
</compile_context>

<pallas_src>
import functools
import math

import jax
import jax.numpy as jnp
from jax.experimental import pallas as pl
from jax.experimental.pallas import tpu as pltpu

# --------------------------- model configuration (small test sizes) ---------------------------
B = 2            # batch
L_SIG = 64       # signal length
AFR = 30         # afr_reduced_cnn_size (planes of the SEBasicBlock)
SE_RED = 5       # SELayer reduction
BN_EPS = 1e-5    # torch BatchNorm1d default eps
RELU_AT_LAST_LAYER = True   # OS_block(..., relu_or_not_at_last_layer=True) default

# Scaled-down layer_parameter_list with the structure the OS-CNN generator produces
# (ascending kernel sizes; last layer uses kernels (start, start+1)).
# The last layer MUST emit 88 channels because OS_block hard-codes self.inplanes = 88.
LAYER_PARAMETER_LIST = [
    [(1, 8, 3), (1, 8, 5), (1, 8, 7)],        # -> 24 channels
    [(24, 8, 3), (24, 8, 5), (24, 8, 7)],     # -> 24 channels
    [(24, 44, 3), (24, 44, 4)],               # -> 88 channels == OS_block.inplanes
]
INPLANES = LAYER_PARAMETER_LIST[-1][0][1] * len(LAYER_PARAMETER_LIST[-1])   # 88
assert INPLANES == 88


def calculate_mask_index(k_now, k_max):
    right = math.ceil((k_max - 1) / 2) - math.ceil((k_now - 1) / 2)
    left = k_max - k_now - right
    return left, left + k_now


# ------------------------------------ fused Pallas kernel -------------------------------------

def _os_block_kernel(*refs, os_cfg, batch, length):
    """Fully fused OS_block forward (eval mode).

    refs layout:
      inputs : x (B*L, 1) channels-last, batch folded onto sublanes;
               per OS layer: [w (K*Cin, Cout), scale (1, Cout), shift (1, Cout)];
               AFR: w1, s1, t1, w2, s2, t2, wd, sd, td, se_w1 (C, C//r), se_w2 (C//r, C)
      output : (B, L, AFR) channels-last
      scratch: im2col staging buffer (B*L, max K*Cin) in VMEM
    """
    col_ref = refs[-1]        # VMEM scratch
    out_ref = refs[-2]
    it = iter(refs[:-2])
    x_ref = next(it)
    L = length

    h = x_ref[...].astype(jnp.float32)                      # (B*L, 1)

    # ---- OS layers: masked big-kernel Conv1d + folded BatchNorm (+ ReLU) ----------------------
    # Each layer is ONE (B*L, K*Cin) @ (K*Cin, Cout) matmul.  The im2col operand is assembled in
    # a zero-initialised VMEM scratch; the zero rows implement the ConstantPad1d padding.
    for (K, pad_l, pad_r, relu) in os_cfg:
        w = next(it)[...].astype(jnp.float32)               # (K*Cin, Cout)
        scale = next(it)[...]                               # (1, Cout) = gamma / sqrt(var + eps)
        shift = next(it)[...]                               # (1, Cout) = (bias - mean)*scale + beta
        cin = h.shape[1]
        col_ref[...] = jnp.zeros_like(col_ref)              # padded taps contribute 0
        for b in range(batch):                              # static unroll, stays on-chip
            hb = h[b * L:(b + 1) * L, :]                    # (L, Cin)
            for k in range(K):
                lo = max(0, pad_l - k)                      # valid output rows for tap k
                hi = min(L, L + pad_l - k)
                if hi > lo:
                    col_ref[b * L + lo:b * L + hi, k * cin:(k + 1) * cin] = \
                        hb[lo + k - pad_l:hi + k - pad_l, :]
        cols = col_ref[0:batch * L, 0:K * cin]              # (B*L, K*Cin)
        h = jnp.dot(cols, w, preferred_element_type=jnp.float32) * scale + shift
        if relu:
            h = jnp.maximum(h, 0.0)

    # ---- AFR: SEBasicBlock(88 -> AFR), 1x1 convs with folded BN -------------------------------
    w1 = next(it)[...]; s1 = next(it)[...]; t1 = next(it)[...]
    w2 = next(it)[...]; s2 = next(it)[...]; t2 = next(it)[...]
    wd = next(it)[...]; sd = next(it)[...]; td = next(it)[...]
    se_w1 = next(it)[...]
    se_w2 = next(it)[...]

    out = jnp.maximum(jnp.dot(h, w1, preferred_element_type=jnp.float32) * s1 + t1, 0.0)  # conv1+bn1+relu
    out = jnp.dot(out, w2, preferred_element_type=jnp.float32) * s2 + t2                  # conv2+bn2
    res = jnp.dot(h, wd, preferred_element_type=jnp.float32) * sd + td                    # downsample+bn

    for b in range(batch):                                   # SE gate is per-sample -> static unroll
        ob = out[b * L:(b + 1) * L, :]                       # (L, AFR)
        rb = res[b * L:(b + 1) * L, :]
        pooled = jnp.mean(ob, axis=0, keepdims=True)         # AdaptiveAvgPool1d(1): (1, AFR)
        z = jnp.maximum(jnp.dot(pooled, se_w1, preferred_element_type=jnp.float32), 0.0)
        gate = jax.nn.sigmoid(jnp.dot(z, se_w2, preferred_element_type=jnp.float32))      # (1, AFR)
        out_ref[b] = jnp.maximum(ob * gate + rb, 0.0).astype(out_ref.dtype)  # SE * out + residual, ReLU


# ---------------------------------- parameters (PyTorch layout) --------------------------------

def init_params(key):
    """Deterministic eval-mode parameters in the PyTorch layout (conv weight (Cout, Cin, K), ...)."""
    keys = iter(jax.random.split(key, 64))

    def nrm(shape, s=0.1):
        return jax.random.normal(next(keys), shape, dtype=jnp.float32) * s

    def make_bn(c):   # (gamma, beta, running_mean, running_var)
        return (1.0 + nrm((c,)), nrm((c,)), nrm((c,)), 1.0 + jnp.abs(nrm((c,))))

    os_layers = []
    for layer in LAYER_PARAMETER_LIST:
        k_max = layer[-1][-1]
        ws, bs = [], []
        for (cin, cout, k) in layer:
            li, ri = calculate_mask_index(k, k_max)
            w_small = nrm((cout, cin, k))
            # big kernel with zeros outside the mask == weight * weight_mask in the reference
            ws.append(jnp.zeros((cout, cin, k_max), jnp.float32).at[:, :, li:ri].set(w_small))
            bs.append(nrm((cout,)))
        W = jnp.concatenate(ws, axis=0)
        os_layers.append(dict(w=W, b=jnp.concatenate(bs, axis=0), bn=make_bn(W.shape[0]),
                              pad_l=int((k_max - 1) / 2), pad_r=int(k_max / 2)))
    assert os_layers[-1]['w'].shape[0] == INPLANES

    afr = dict(
        w1=nrm((AFR, INPLANES, 1)), b1=nrm((AFR,)), bn1=make_bn(AFR),      # conv1 (k=1) + bn1
        w2=nrm((AFR, AFR, 1)), b2=nrm((AFR,)), bn2=make_bn(AFR),           # conv2 (k=1) + bn2
        wd=nrm((AFR, INPLANES, 1)), bnd=make_bn(AFR),                      # downsample (no bias) + bn
        se_w1=nrm((AFR // SE_RED, AFR)),                                   # Linear(C, C//r, bias=False)
        se_w2=nrm((AFR, AFR // SE_RED)),                                   # Linear(C//r, C, bias=False)
    )
    return dict(os_layers=os_layers, afr=afr)


def _fold_bn(bn, bias, eps=BN_EPS):
    """Eval-mode BatchNorm1d (+ preceding conv bias) folded into a per-channel affine."""
    gamma, beta, mean, var = bn
    scale = gamma / jnp.sqrt(var + eps)
    b = bias if bias is not None else jnp.zeros_like(mean)
    shift = (b - mean) * scale + beta
    return scale, shift


def _pack_operands(params):
    """Flatten PyTorch-layout params into the fused kernel's operand list + static layer config."""
    ops, cfg, kc_max = [], [], 0
    n_layers = len(params['os_layers'])
    for i, layer in enumerate(params['os_layers']):
        W = layer['w']                                         # (Cout, Cin, K)
        cout, cin, K = W.shape
        scale, shift = _fold_bn(layer['bn'], layer['b'])
        ops += [jnp.transpose(W, (2, 1, 0)).reshape(K * cin, cout),   # im2col weight (K*Cin, Cout)
                scale.reshape(1, cout), shift.reshape(1, cout)]
        use_relu = True if i != n_layers - 1 else RELU_AT_LAST_LAYER
        cfg.append((K, layer['pad_l'], layer['pad_r'], use_relu))
        kc_max = max(kc_max, K * cin)
    a = params['afr']
    s1, t1 = _fold_bn(a['bn1'], a['b1'])
    s2, t2 = _fold_bn(a['bn2'], a['b2'])
    sd, td = _fold_bn(a['bnd'], None)
    ops += [a['w1'][:, :, 0].T, s1.reshape(1, -1), t1.reshape(1, -1),
            a['w2'][:, :, 0].T, s2.reshape(1, -1), t2.reshape(1, -1),
            a['wd'][:, :, 0].T, sd.reshape(1, -1), td.reshape(1, -1),
            a['se_w1'].T, a['se_w2'].T]
    return ops, cfg, kc_max


def build_forward(params, batch=B, length=L_SIG):
    ops, cfg, kc_max = _pack_operands(params)
    kern = functools.partial(_os_block_kernel, os_cfg=tuple(cfg), batch=batch, length=length)
    call = pl.pallas_call(
        kern,
        out_shape=jax.ShapeDtypeStruct((batch, length, AFR), jnp.float32),    # channels-last
        scratch_shapes=[pltpu.VMEM((batch * length, kc_max), jnp.float32)],   # im2col staging
    )

    @jax.jit
    def forward(x_ncl, operands):
        # C_in == 1: NCL [B,1,L] -> channels-last (B*L, 1) with the batch folded onto sublanes.
        x_flat = x_ncl.reshape(batch * length, 1)
        y = call(x_flat, *operands)                  # (B, L, AFR): the single fused kernel
        return jnp.transpose(y, (0, 2, 1))           # restore PyTorch NCL (B, AFR, L) for the output

    return functools.partial(forward, operands=tuple(ops))


# ------------------------------ pure-JAX reference (correctness) -------------------------------

def _ref_conv1d(x, w, b, pad_l, pad_r):
    """PyTorch Conv1d (cross-correlation), NCL layout, explicit ConstantPad1d."""
    xp = jnp.pad(x, ((0, 0), (0, 0), (pad_l, pad_r)))
    K = w.shape[-1]
    Lout = xp.shape[-1] - K + 1
    taps = jnp.stack([xp[:, :, k:k + Lout] for k in range(K)], axis=-1)   # (B, Cin, Lout, K)
    y = jnp.einsum('bclk,ock->bol', taps, w, precision=jax.lax.Precision.HIGHEST)
    return y if b is None else y + b[None, :, None]


def _ref_bn(y, bn, eps=BN_EPS):
    gamma, beta, mean, var = bn
    inv = gamma / jnp.sqrt(var + eps)
    return (y - mean[None, :, None]) * inv[None, :, None] + beta[None, :, None]


def reference_forward(params, x):
    """Eval-mode OS_block forward, mirroring the PyTorch module op-by-op (XLA ops only)."""
    h = x
    n = len(params['os_layers'])
    for i, layer in enumerate(params['os_layers']):
        y = _ref_bn(_ref_conv1d(h, layer['w'], layer['b'], layer['pad_l'], layer['pad_r']),
                    layer['bn'])
        use_relu = True if i != n - 1 else RELU_AT_LAST_LAYER
        h = jax.nn.relu(y) if use_relu else y
    a = params['afr']
    out = jax.nn.relu(_ref_bn(_ref_conv1d(h, a['w1'], a['b1'], 0, 0), a['bn1']))
    out = _ref_bn(_ref_conv1d(out, a['w2'], a['b2'], 0, 0), a['bn2'])
    pooled = jnp.mean(out, axis=-1)                                 # SELayer avg-pool: (B, C)
    z = jax.nn.relu(pooled @ a['se_w1'].T)
    gate = jax.nn.sigmoid(z @ a['se_w2'].T)
    out = out * gate[:, :, None]
    res = _ref_bn(_ref_conv1d(h, a['wd'], None, 0, 0), a['bnd'])    # downsample branch
    return jax.nn.relu(out + res)


# -------------------------------------------- main ---------------------------------------------

if __name__ == "__main__":
    pkey, xkey = jax.random.split(jax.random.PRNGKey(0))
    params = init_params(pkey)
    x = jax.random.normal(xkey, (B, 1, L_SIG), dtype=jnp.float32)   # PyTorch NCL input [B, C=1, L]

    forward = build_forward(params)
    out = jax.block_until_ready(forward(x))
    assert out.shape == (B, AFR, L_SIG) and out.dtype == jnp.float32

    ref = reference_forward(params, x)
    max_err = float(jnp.max(jnp.abs(out - ref)))
    assert max_err < 2e-2, f"Pallas vs pure-JAX reference mismatch: max|diff| = {max_err}"
    print("KERNEL_OK")
</pallas_src>

<mosaic_0001>
module attributes {stable_mosaic.version = 11 : i64} {
  func.func @_os_block_kernel(%arg0: memref<128x1xf32, #tpu.memory_space<vmem>>, %arg1: memref<7x24xf32, #tpu.memory_space<vmem>>, %arg2: memref<1x24xf32, #tpu.memory_space<vmem>>, %arg3: memref<1x24xf32, #tpu.memory_space<vmem>>, %arg4: memref<168x24xf32, #tpu.memory_space<vmem>>, %arg5: memref<1x24xf32, #tpu.memory_space<vmem>>, %arg6: memref<1x24xf32, #tpu.memory_space<vmem>>, %arg7: memref<96x88xf32, #tpu.memory_space<vmem>>, %arg8: memref<1x88xf32, #tpu.memory_space<vmem>>, %arg9: memref<1x88xf32, #tpu.memory_space<vmem>>, %arg10: memref<88x30xf32, #tpu.memory_space<vmem>>, %arg11: memref<1x30xf32, #tpu.memory_space<vmem>>, %arg12: memref<1x30xf32, #tpu.memory_space<vmem>>, %arg13: memref<30x30xf32, #tpu.memory_space<vmem>>, %arg14: memref<1x30xf32, #tpu.memory_space<vmem>>, %arg15: memref<1x30xf32, #tpu.memory_space<vmem>>, %arg16: memref<88x30xf32, #tpu.memory_space<vmem>>, %arg17: memref<1x30xf32, #tpu.memory_space<vmem>>, %arg18: memref<1x30xf32, #tpu.memory_space<vmem>>, %arg19: memref<30x6xf32, #tpu.memory_space<vmem>>, %arg20: memref<6x30xf32, #tpu.memory_space<vmem>>, %arg21: memref<2x64x30xf32, #tpu.memory_space<vmem>>, %arg22: memref<128x168xf32, #tpu.memory_space<vmem>>) attributes {dimension_semantics = [], scalar_prefetch = 0 : i64, scratch_operands = 1 : i64, tpu.core_type = #tpu.core_type<tc>} {
    %c0 = arith.constant 0 : index
    %c0_0 = arith.constant 0 : index
    %0 = vector.load %arg0[%c0, %c0_0] : memref<128x1xf32, #tpu.memory_space<vmem>>, vector<128x1xf32>
    %c0_1 = arith.constant 0 : index
    %c0_2 = arith.constant 0 : index
    %1 = vector.load %arg1[%c0_1, %c0_2] : memref<7x24xf32, #tpu.memory_space<vmem>>, vector<7x24xf32>
    %c0_3 = arith.constant 0 : index
    %c0_4 = arith.constant 0 : index
    %2 = vector.load %arg2[%c0_3, %c0_4] : memref<1x24xf32, #tpu.memory_space<vmem>>, vector<1x24xf32>
    %c0_5 = arith.constant 0 : index
    %c0_6 = arith.constant 0 : index
    %3 = vector.load %arg3[%c0_5, %c0_6] : memref<1x24xf32, #tpu.memory_space<vmem>>, vector<1x24xf32>
    %cst = arith.constant 0.000000e+00 : f32
    %4 = vector.broadcast %cst : f32 to vector<128x168xf32>
    %c0_7 = arith.constant 0 : index
    %c0_8 = arith.constant 0 : index
    %5 = vector.load %arg22[%c0_7, %c0_8] : memref<128x168xf32, #tpu.memory_space<vmem>>, vector<128x168xf32>
    tpu.vector_store %arg22[%c0_7, %c0_8], %4 {strides = array<i32>} : memref<128x168xf32, #tpu.memory_space<vmem>>, vector<128x168xf32>,
    %6 = vector.extract_strided_slice %0 {offsets = [0, 0], sizes = [64, 1], strides = [1, 1]} : vector<128x1xf32> to vector<64x1xf32>
    %7 = vector.extract_strided_slice %6 {offsets = [0, 0], sizes = [61, 1], strides = [1, 1]} : vector<64x1xf32> to vector<61x1xf32>
    %c3 = arith.constant 3 : index
    %c0_9 = arith.constant 0 : index
    %8 = vector.load %arg22[%c3, %c0_9] : memref<128x168xf32, #tpu.memory_space<vmem>>, vector<61x1xf32>
    tpu.vector_store %arg22[%c3, %c0_9], %7 {strides = array<i32>} : memref<128x168xf32, #tpu.memory_space<vmem>>, vector<61x1xf32>,
    %9 = vector.extract_strided_slice %6 {offsets = [0, 0], sizes = [62, 1], strides = [1, 1]} : vector<64x1xf32> to vector<62x1xf32>
    %c2 = arith.constant 2 : index
    %c1 = arith.constant 1 : index
    %10 = vector.load %arg22[%c2, %c1] : memref<128x168xf32, #tpu.memory_space<vmem>>, vector<62x1xf32>
    tpu.vector_store %arg22[%c2, %c1], %9 {strides = array<i32>} : memref<128x168xf32, #tpu.memory_space<vmem>>, vector<62x1xf32>,
    %11 = vector.extract_strided_slice %6 {offsets = [0, 0], sizes = [63, 1], strides = [1, 1]} : vector<64x1xf32> to vector<63x1xf32>
    %c1_10 = arith.constant 1 : index
    %c2_11 = arith.constant 2 : index
    %12 = vector.load %arg22[%c1_10, %c2_11] : memref<128x168xf32, #tpu.memory_space<vmem>>, vector<63x1xf32>
    tpu.vector_store %arg22[%c1_10, %c2_11], %11 {strides = array<i32>} : memref<128x168xf32, #tpu.memory_space<vmem>>, vector<63x1xf32>,
    %c0_12 = arith.constant 0 : index
    %c3_13 = arith.constant 3 : index
    %13 = vector.load %arg22[%c0_12, %c3_13] : memref<128x168xf32, #tpu.memory_space<vmem>>, vector<64x1xf32>
    tpu.vector_store %arg22[%c0_12, %c3_13], %6 {strides = array<i32>} : memref<128x168xf32, #tpu.memory_space<vmem>>, vector<64x1xf32>,
    %14 = vector.extract_strided_slice %6 {offsets = [1, 0], sizes = [63, 1], strides = [1, 1]} : vector<64x1xf32> to vector<63x1xf32>
    %c0_14 = arith.constant 0 : index
    %c4 = arith.constant 4 : index
    %15 = vector.load %arg22[%c0_14, %c4] : memref<128x168xf32, #tpu.memory_space<vmem>>, vector<63x1xf32>
    tpu.vector_store %arg22[%c0_14, %c4], %14 {strides = array<i32>} : memref<128x168xf32, #tpu.memory_space<vmem>>, vector<63x1xf32>,
    %16 = vector.extract_strided_slice %6 {offsets = [2, 0], sizes = [62, 1], strides = [1, 1]} : vector<64x1xf32> to vector<62x1xf32>
    %c0_15 = arith.constant 0 : index
    %c5 = arith.constant 5 : index
    %17 = vector.load %arg22[%c0_15, %c5] : memref<128x168xf32, #tpu.memory_space<vmem>>, vector<62x1xf32>
    tpu.vector_store %arg22[%c0_15, %c5], %16 {strides = array<i32>} : memref<128x168xf32, #tpu.memory_space<vmem>>, vector<62x1xf32>,
    %18 = vector.extract_strided_slice %6 {offsets = [3, 0], sizes = [61, 1], strides = [1, 1]} : vector<64x1xf32> to vector<61x1xf32>
    %c0_16 = arith.constant 0 : index
    %c6 = arith.constant 6 : index
    %19 = vector.load %arg22[%c0_16, %c6] : memref<128x168xf32, #tpu.memory_space<vmem>>, vector<61x1xf32>
    tpu.vector_store %arg22[%c0_16, %c6], %18 {strides = array<i32>} : memref<128x168xf32, #tpu.memory_space<vmem>>, vector<61x1xf32>,
    %20 = vector.extract_strided_slice %0 {offsets = [64, 0], sizes = [64, 1], strides = [1, 1]} : vector<128x1xf32> to vector<64x1xf32>
    %21 = vector.extract_strided_slice %20 {offsets = [0, 0], sizes = [61, 1], strides = [1, 1]} : vector<64x1xf32> to vector<61x1xf32>
    %c67 = arith.constant 67 : index
    %c0_17 = arith.constant 0 : index
    %22 = vector.load %arg22[%c67, %c0_17] : memref<128x168xf32, #tpu.memory_space<vmem>>, vector<61x1xf32>
    tpu.vector_store %arg22[%c67, %c0_17], %21 {strides = array<i32>} : memref<128x168xf32, #tpu.memory_space<vmem>>, vector<61x1xf32>,
    %23 = vector.extract_strided_slice %20 {offsets = [0, 0], sizes = [62, 1], strides = [1, 1]} : vector<64x1xf32> to vector<62x1xf32>
    %c66 = arith.constant 66 : index
    %c1_18 = arith.constant 1 : index
    %24 = vector.load %arg22[%c66, %c1_18] : memref<128x168xf32, #tpu.memory_space<vmem>>, vector<62x1xf32>
    tpu.vector_store %arg22[%c66, %c1_18], %23 {strides = array<i32>} : memref<128x168xf32, #tpu.memory_space<vmem>>, vector<62x1xf32>,
    %25 = vector.extract_strided_slice %20 {offsets = [0, 0], sizes = [63, 1], strides = [1, 1]} : vector<64x1xf32> to vector<63x1xf32>
    %c65 = arith.constant 65 : index
    %c2_19 = arith.constant 2 : index
    %26 = vector.load %arg22[%c65, %c2_19] : memref<128x168xf32, #tpu.memory_space<vmem>>, vector<63x1xf32>
    tpu.vector_store %arg22[%c65, %c2_19], %25 {strides = array<i32>} : memref<128x168xf32, #tpu.memory_space<vmem>>, vector<63x1xf32>,
    %c64 = arith.constant 64 : index
    %c3_20 = arith.constant 3 : index
    %27 = vector.load %arg22[%c64, %c3_20] : memref<128x168xf32, #tpu.memory_space<vmem>>, vector<64x1xf32>
    tpu.vector_store %arg22[%c64, %c3_20], %20 {strides = array<i32>} : memref<128x168xf32, #tpu.memory_space<vmem>>, vector<64x1xf32>,
    %28 = vector.extract_strided_slice %20 {offsets = [1, 0], sizes = [63, 1], strides = [1, 1]} : vector<64x1xf32> to vector<63x1xf32>
    %c64_21 = arith.constant 64 : index
    %c4_22 = arith.constant 4 : index
    %29 = vector.load %arg22[%c64_21, %c4_22] : memref<128x168xf32, #tpu.memory_space<vmem>>, vector<63x1xf32>
    tpu.vector_store %arg22[%c64_21, %c4_22], %28 {strides = array<i32>} : memref<128x168xf32, #tpu.memory_space<vmem>>, vector<63x1xf32>,
    %30 = vector.extract_strided_slice %20 {offsets = [2, 0], sizes = [62, 1], strides = [1, 1]} : vector<64x1xf32> to vector<62x1xf32>
    %c64_23 = arith.constant 64 : index
    %c5_24 = arith.constant 5 : index
    %31 = vector.load %arg22[%c64_23, %c5_24] : memref<128x168xf32, #tpu.memory_space<vmem>>, vector<62x1xf32>
    tpu.vector_store %arg22[%c64_23, %c5_24], %30 {strides = array<i32>} : memref<128x168xf32, #tpu.memory_space<vmem>>, vector<62x1xf32>,
    %32 = vector.extract_strided_slice %20 {offsets = [3, 0], sizes = [61, 1], strides = [1, 1]} : vector<64x1xf32> to vector<61x1xf32>
    %c64_25 = arith.constant 64 : index
    %c6_26 = arith.constant 6 : index
    %33 = vector.load %arg22[%c64_25, %c6_26] : memref<128x168xf32, #tpu.memory_space<vmem>>, vector<61x1xf32>
    tpu.vector_store %arg22[%c64_25, %c6_26], %32 {strides = array<i32>} : memref<128x168xf32, #tpu.memory_space<vmem>>, vector<61x1xf32>,
    %c0_27 = arith.constant 0 : index
    %c0_28 = arith.constant 0 : index
    %34 = vector.load %arg22[%c0_27, %c0_28] : memref<128x168xf32, #tpu.memory_space<vmem>>, vector<128x7xf32>
    %cst_29 = arith.constant dense<0.000000e+00> : vector<128x24xf32>
    %35 = tpu.matmul %34, %1, %cst_29 {dimension_numbers = #tpu.dot_dimension_numbers<[1], [0], [0], [1], [0, 0, 1, 1], [], []>} : vector<128x7xf32>, vector<7x24xf32>, vector<128x24xf32> -> vector<128x24xf32>
    %36 = vector.broadcast %2 : vector<1x24xf32> to vector<128x24xf32>
    %37 = arith.mulf %35, %36 : vector<128x24xf32>
    %38 = vector.broadcast %3 : vector<1x24xf32> to vector<128x24xf32>
    %39 = arith.addf %37, %38 : vector<128x24xf32>
    %cst_30 = arith.constant 0.000000e+00 : f32
    %40 = vector.broadcast %cst_30 : f32 to vector<128x24xf32>
    %41 = arith.maximumf %39, %40 : vector<128x24xf32>
    %c0_31 = arith.constant 0 : index
    %c0_32 = arith.constant 0 : index
    %42 = vector.load %arg4[%c0_31, %c0_32] : memref<168x24xf32, #tpu.memory_space<vmem>>, vector<168x24xf32>
    %c0_33 = arith.constant 0 : index
    %c0_34 = arith.constant 0 : index
    %43 = vector.load %arg5[%c0_33, %c0_34] : memref<1x24xf32, #tpu.memory_space<vmem>>, vector<1x24xf32>
    %c0_35 = arith.constant 0 : index
    %c0_36 = arith.constant 0 : index
    %44 = vector.load %arg6[%c0_35, %c0_36] : memref<1x24xf32, #tpu.memory_space<vmem>>, vector<1x24xf32>
    %cst_37 = arith.constant 0.000000e+00 : f32
    %45 = vector.broadcast %cst_37 : f32 to vector<128x168xf32>
    %c0_38 = arith.constant 0 : index
    %c0_39 = arith.constant 0 : index
    %46 = vector.load %arg22[%c0_38, %c0_39] : memref<128x168xf32, #tpu.memory_space<vmem>>, vector<128x168xf32>
    tpu.vector_store %arg22[%c0_38, %c0_39], %45 {strides = array<i32>} : memref<128x168xf32, #tpu.memory_space<vmem>>, vector<128x168xf32>,
    %47 = vector.extract_strided_slice %41 {offsets = [0, 0], sizes = [64, 24], strides = [1, 1]} : vector<128x24xf32> to vector<64x24xf32>
    %48 = vector.extract_strided_slice %47 {offsets = [0, 0], sizes = [61, 24], strides = [1, 1]} : vector<64x24xf32> to vector<61x24xf32>
    %c3_40 = arith.constant 3 : index
    %c0_41 = arith.constant 0 : index
    %49 = vector.load %arg22[%c3_40, %c0_41] : memref<128x168xf32, #tpu.memory_space<vmem>>, vector<61x24xf32>
    tpu.vector_store %arg22[%c3_40, %c0_41], %48 {strides = array<i32>} : memref<128x168xf32, #tpu.memory_space<vmem>>, vector<61x24xf32>,
    %50 = vector.extract_strided_slice %47 {offsets = [0, 0], sizes = [62, 24], strides = [1, 1]} : vector<64x24xf32> to vector<62x24xf32>
    %c2_42 = arith.constant 2 : index
    %c24 = arith.constant 24 : index
    %51 = vector.load %arg22[%c2_42, %c24] : memref<128x168xf32, #tpu.memory_space<vmem>>, vector<62x24xf32>
    tpu.vector_store %arg22[%c2_42, %c24], %50 {strides = array<i32>} : memref<128x168xf32, #tpu.memory_space<vmem>>, vector<62x24xf32>,
    %52 = vector.extract_strided_slice %47 {offsets = [0, 0], sizes = [63, 24], strides = [1, 1]} : vector<64x24xf32> to vector<63x24xf32>
    %c1_43 = arith.constant 1 : index
    %c48 = arith.constant 48 : index
    %53 = vector.load %arg22[%c1_43, %c48] : memref<128x168xf32, #tpu.memory_space<vmem>>, vector<63x24xf32>
    tpu.vector_store %arg22[%c1_43, %c48], %52 {strides = array<i32>} : memref<128x168xf32, #tpu.memory_space<vmem>>, vector<63x24xf32>,
    %c0_44 = arith.constant 0 : index
    %c72 = arith.constant 72 : index
    %54 = vector.load %arg22[%c0_44, %c72] : memref<128x168xf32, #tpu.memory_space<vmem>>, vector<64x24xf32>
    tpu.vector_store %arg22[%c0_44, %c72], %47 {strides = array<i32>} : memref<128x168xf32, #tpu.memory_space<vmem>>, vector<64x24xf32>,
    %55 = vector.extract_strided_slice %47 {offsets = [1, 0], sizes = [63, 24], strides = [1, 1]} : vector<64x24xf32> to vector<63x24xf32>
    %c0_45 = arith.constant 0 : index
    %c96 = arith.constant 96 : index
    %56 = vector.load %arg22[%c0_45, %c96] : memref<128x168xf32, #tpu.memory_space<vmem>>, vector<63x24xf32>
    tpu.vector_store %arg22[%c0_45, %c96], %55 {strides = array<i32>} : memref<128x168xf32, #tpu.memory_space<vmem>>, vector<63x24xf32>,
    %57 = vector.extract_strided_slice %47 {offsets = [2, 0], sizes = [62, 24], strides = [1, 1]} : vector<64x24xf32> to vector<62x24xf32>
    %c0_46 = arith.constant 0 : index
    %c120 = arith.constant 120 : index
    %58 = vector.load %arg22[%c0_46, %c120] : memref<128x168xf32, #tpu.memory_space<vmem>>, vector<62x24xf32>
    tpu.vector_store %arg22[%c0_46, %c120], %57 {strides = array<i32>} : memref<128x168xf32, #tpu.memory_space<vmem>>, vector<62x24xf32>,
    %59 = vector.extract_strided_slice %47 {offsets = [3, 0], sizes = [61, 24], strides = [1, 1]} : vector<64x24xf32> to vector<61x24xf32>
    %c0_47 = arith.constant 0 : index
    %c144 = arith.constant 144 : index
    %60 = vector.load %arg22[%c0_47, %c144] : memref<128x168xf32, #tpu.memory_space<vmem>>, vector<61x24xf32>
    tpu.vector_store %arg22[%c0_47, %c144], %59 {strides = array<i32>} : memref<128x168xf32, #tpu.memory_space<vmem>>, vector<61x24xf32>,
    %61 = vector.extract_strided_slice %41 {offsets = [64, 0], sizes = [64, 24], strides = [1, 1]} : vector<128x24xf32> to vector<64x24xf32>
    %62 = vector.extract_strided_slice %61 {offsets = [0, 0], sizes = [61, 24], strides = [1, 1]} : vector<64x24xf32> to vector<61x24xf32>
    %c67_48 = arith.constant 67 : index
    %c0_49 = arith.constant 0 : index
    %63 = vector.load %arg22[%c67_48, %c0_49] : memref<128x168xf32, #tpu.memory_space<vmem>>, vector<61x24xf32>
    tpu.vector_store %arg22[%c67_48, %c0_49], %62 {strides = array<i32>} : memref<128x168xf32, #tpu.memory_space<vmem>>, vector<61x24xf32>,
    %64 = vector.extract_strided_slice %61 {offsets = [0, 0], sizes = [62, 24], strides = [1, 1]} : vector<64x24xf32> to vector<62x24xf32>
    %c66_50 = arith.constant 66 : index
    %c24_51 = arith.constant 24 : index
    %65 = vector.load %arg22[%c66_50, %c24_51] : memref<128x168xf32, #tpu.memory_space<vmem>>, vector<62x24xf32>
    tpu.vector_store %arg22[%c66_50, %c24_51], %64 {strides = array<i32>} : memref<128x168xf32, #tpu.memory_space<vmem>>, vector<62x24xf32>,
    %66 = vector.extract_strided_slice %61 {offsets = [0, 0], sizes = [63, 24], strides = [1, 1]} : vector<64x24xf32> to vector<63x24xf32>
    %c65_52 = arith.constant 65 : index
    %c48_53 = arith.constant 48 : index
    %67 = vector.load %arg22[%c65_52, %c48_53] : memref<128x168xf32, #tpu.memory_space<vmem>>, vector<63x24xf32>
    tpu.vector_store %arg22[%c65_52, %c48_53], %66 {strides = array<i32>} : memref<128x168xf32, #tpu.memory_space<vmem>>, vector<63x24xf32>,
    %c64_54 = arith.constant 64 : index
    %c72_55 = arith.constant 72 : index
    %68 = vector.load %arg22[%c64_54, %c72_55] : memref<128x168xf32, #tpu.memory_space<vmem>>, vector<64x24xf32>
    tpu.vector_store %arg22[%c64_54, %c72_55], %61 {strides = array<i32>} : memref<128x168xf32, #tpu.memory_space<vmem>>, vector<64x24xf32>,
    %69 = vector.extract_strided_slice %61 {offsets = [1, 0], sizes = [63, 24], strides = [1, 1]} : vector<64x24xf32> to vector<63x24xf32>
    %c64_56 = arith.constant 64 : index
    %c96_57 = arith.constant 96 : index
    %70 = vector.load %arg22[%c64_56, %c96_57] : memref<128x168xf32, #tpu.memory_space<vmem>>, vector<63x24xf32>
    tpu.vector_store %arg22[%c64_56, %c96_57], %69 {strides = array<i32>} : memref<128x168xf32, #tpu.memory_space<vmem>>, vector<63x24xf32>,
    %71 = vector.extract_strided_slice %61 {offsets = [2, 0], sizes = [62, 24], strides = [1, 1]} : vector<64x24xf32> to vector<62x24xf32>
    %c64_58 = arith.constant 64 : index
    %c120_59 = arith.constant 120 : index
    %72 = vector.load %arg22[%c64_58, %c120_59] : memref<128x168xf32, #tpu.memory_space<vmem>>, vector<62x24xf32>
    tpu.vector_store %arg22[%c64_58, %c120_59], %71 {strides = array<i32>} : memref<128x168xf32, #tpu.memory_space<vmem>>, vector<62x24xf32>,
    %73 = vector.extract_strided_slice %61 {offsets = [3, 0], sizes = [61, 24], strides = [1, 1]} : vector<64x24xf32> to vector<61x24xf32>
    %c64_60 = arith.constant 64 : index
    %c144_61 = arith.constant 144 : index
    %74 = vector.load %arg22[%c64_60, %c144_61] : memref<128x168xf32, #tpu.memory_space<vmem>>, vector<61x24xf32>
    tpu.vector_store %arg22[%c64_60, %c144_61], %73 {strides = array<i32>} : memref<128x168xf32, #tpu.memory_space<vmem>>, vector<61x24xf32>,
    %c0_62 = arith.constant 0 : index
    %c0_63 = arith.constant 0 : index
    %75 = vector.load %arg22[%c0_62, %c0_63] : memref<128x168xf32, #tpu.memory_space<vmem>>, vector<128x168xf32>
    %cst_64 = arith.constant dense<0.000000e+00> : vector<128x24xf32>
    %76 = tpu.matmul %75, %42, %cst_64 {dimension_numbers = #tpu.dot_dimension_numbers<[1], [0], [0], [1], [0, 0, 1, 1], [], []>} : vector<128x168xf32>, vector<168x24xf32>, vector<128x24xf32> -> vector<128x24xf32>
    %77 = vector.broadcast %43 : vector<1x24xf32> to vector<128x24xf32>
    %78 = arith.mulf %76, %77 : vector<128x24xf32>
    %79 = vector.broadcast %44 : vector<1x24xf32> to vector<128x24xf32>
    %80 = arith.addf %78, %79 : vector<128x24xf32>
    %cst_65 = arith.constant 0.000000e+00 : f32
    %81 = vector.broadcast %cst_65 : f32 to vector<128x24xf32>
    %82 = arith.maximumf %80, %81 : vector<128x24xf32>
    %c0_66 = arith.constant 0 : index
    %c0_67 = arith.constant 0 : index
    %83 = vector.load %arg7[%c0_66, %c0_67] : memref<96x88xf32, #tpu.memory_space<vmem>>, vector<96x88xf32>
    %c0_68 = arith.constant 0 : index
    %c0_69 = arith.constant 0 : index
    %84 = vector.load %arg8[%c0_68, %c0_69] : memref<1x88xf32, #tpu.memory_space<vmem>>, vector<1x88xf32>
    %c0_70 = arith.constant 0 : index
    %c0_71 = arith.constant 0 : index
    %85 = vector.load %arg9[%c0_70, %c0_71] : memref<1x88xf32, #tpu.memory_space<vmem>>, vector<1x88xf32>
    %cst_72 = arith.constant 0.000000e+00 : f32
    %86 = vector.broadcast %cst_72 : f32 to vector<128x168xf32>
    %c0_73 = arith.constant 0 : index
    %c0_74 = arith.constant 0 : index
    %87 = vector.load %arg22[%c0_73, %c0_74] : memref<128x168xf32, #tpu.memory_space<vmem>>, vector<128x168xf32>
    tpu.vector_store %arg22[%c0_73, %c0_74], %86 {strides = array<i32>} : memref<128x168xf32, #tpu.memory_space<vmem>>, vector<128x168xf32>,
    %88 = vector.extract_strided_slice %82 {offsets = [0, 0], sizes = [64, 24], strides = [1, 1]} : vector<128x24xf32> to vector<64x24xf32>
    %89 = vector.extract_strided_slice %88 {offsets = [0, 0], sizes = [63, 24], strides = [1, 1]} : vector<64x24xf32> to vector<63x24xf32>
    %c1_75 = arith.constant 1 : index
    %c0_76 = arith.constant 0 : index
    %90 = vector.load %arg22[%c1_75, %c0_76] : memref<128x168xf32, #tpu.memory_space<vmem>>, vector<63x24xf32>
    tpu.vector_store %arg22[%c1_75, %c0_76], %89 {strides = array<i32>} : memref<128x168xf32, #tpu.memory_space<vmem>>, vector<63x24xf32>,
    %c0_77 = arith.constant 0 : index
    %c24_78 = arith.constant 24 : index
    %91 = vector.load %arg22[%c0_77, %c24_78] : memref<128x168xf32, #tpu.memory_space<vmem>>, vector<64x24xf32>
    tpu.vector_store %arg22[%c0_77, %c24_78], %88 {strides = array<i32>} : memref<128x168xf32, #tpu.memory_space<vmem>>, vector<64x24xf32>,
    %92 = vector.extract_strided_slice %88 {offsets = [1, 0], sizes = [63, 24], strides = [1, 1]} : vector<64x24xf32> to vector<63x24xf32>
    %c0_79 = arith.constant 0 : index
    %c48_80 = arith.constant 48 : index
    %93 = vector.load %arg22[%c0_79, %c48_80] : memref<128x168xf32, #tpu.memory_space<vmem>>, vector<63x24xf32>
    tpu.vector_store %arg22[%c0_79, %c48_80], %92 {strides = array<i32>} : memref<128x168xf32, #tpu.memory_space<vmem>>, vector<63x24xf32>,
    %94 = vector.extract_strided_slice %88 {offsets = [2, 0], sizes = [62, 24], strides = [1, 1]} : vector<64x24xf32> to vector<62x24xf32>
    %c0_81 = arith.constant 0 : index
    %c72_82 = arith.constant 72 : index
    %95 = vector.load %arg22[%c0_81, %c72_82] : memref<128x168xf32, #tpu.memory_space<vmem>>, vector<62x24xf32>
    tpu.vector_store %arg22[%c0_81, %c72_82], %94 {strides = array<i32>} : memref<128x168xf32, #tpu.memory_space<vmem>>, vector<62x24xf32>,
    %96 = vector.extract_strided_slice %82 {offsets = [64, 0], sizes = [64, 24], strides = [1, 1]} : vector<128x24xf32> to vector<64x24xf32>
    %97 = vector.extract_strided_slice %96 {offsets = [0, 0], sizes = [63, 24], strides = [1, 1]} : vector<64x24xf32> to vector<63x24xf32>
    %c65_83 = arith.constant 65 : index
    %c0_84 = arith.constant 0 : index
    %98 = vector.load %arg22[%c65_83, %c0_84] : memref<128x168xf32, #tpu.memory_space<vmem>>, vector<63x24xf32>
    tpu.vector_store %arg22[%c65_83, %c0_84], %97 {strides = array<i32>} : memref<128x168xf32, #tpu.memory_space<vmem>>, vector<63x24xf32>,
    %c64_85 = arith.constant 64 : index
    %c24_86 = arith.constant 24 : index
    %99 = vector.load %arg22[%c64_85, %c24_86] : memref<128x168xf32, #tpu.memory_space<vmem>>, vector<64x24xf32>
    tpu.vector_store %arg22[%c64_85, %c24_86], %96 {strides = array<i32>} : memref<128x168xf32, #tpu.memory_space<vmem>>, vector<64x24xf32>,
    %100 = vector.extract_strided_slice %96 {offsets = [1, 0], sizes = [63, 24], strides = [1, 1]} : vector<64x24xf32> to vector<63x24xf32>
    %c64_87 = arith.constant 64 : index
    %c48_88 = arith.constant 48 : index
    %101 = vector.load %arg22[%c64_87, %c48_88] : memref<128x168xf32, #tpu.memory_space<vmem>>, vector<63x24xf32>
    tpu.vector_store %arg22[%c64_87, %c48_88], %100 {strides = array<i32>} : memref<128x168xf32, #tpu.memory_space<vmem>>, vector<63x24xf32>,
    %102 = vector.extract_strided_slice %96 {offsets = [2, 0], sizes = [62, 24], strides = [1, 1]} : vector<64x24xf32> to vector<62x24xf32>
    %c64_89 = arith.constant 64 : index
    %c72_90 = arith.constant 72 : index
    %103 = vector.load %arg22[%c64_89, %c72_90] : memref<128x168xf32, #tpu.memory_space<vmem>>, vector<62x24xf32>
    tpu.vector_store %arg22[%c64_89, %c72_90], %102 {strides = array<i32>} : memref<128x168xf32, #tpu.memory_space<vmem>>, vector<62x24xf32>,
    %c0_91 = arith.constant 0 : index
    %c0_92 = arith.constant 0 : index
    %104 = vector.load %arg22[%c0_91, %c0_92] : memref<128x168xf32, #tpu.memory_space<vmem>>, vector<128x96xf32>
    %cst_93 = arith.constant dense<0.000000e+00> : vector<128x88xf32>
    %105 = tpu.matmul %104, %83, %cst_93 {dimension_numbers = #tpu.dot_dimension_numbers<[1], [0], [0], [1], [0, 0, 1, 1], [], []>} : vector<128x96xf32>, vector<96x88xf32>, vector<128x88xf32> -> vector<128x88xf32>
    %106 = vector.broadcast %84 : vector<1x88xf32> to vector<128x88xf32>
    %107 = arith.mulf %105, %106 : vector<128x88xf32>
    %108 = vector.broadcast %85 : vector<1x88xf32> to vector<128x88xf32>
    %109 = arith.addf %107, %108 : vector<128x88xf32>
    %cst_94 = arith.constant 0.000000e+00 : f32
    %110 = vector.broadcast %cst_94 : f32 to vector<128x88xf32>
    %111 = arith.maximumf %109, %110 : vector<128x88xf32>
    %c0_95 = arith.constant 0 : index
    %c0_96 = arith.constant 0 : index
    %112 = vector.load %arg10[%c0_95, %c0_96] : memref<88x30xf32, #tpu.memory_space<vmem>>, vector<88x30xf32>
    %c0_97 = arith.constant 0 : index
    %c0_98 = arith.constant 0 : index
    %113 = vector.load %arg11[%c0_97, %c0_98] : memref<1x30xf32, #tpu.memory_space<vmem>>, vector<1x30xf32>
    %c0_99 = arith.constant 0 : index
    %c0_100 = arith.constant 0 : index
    %114 = vector.load %arg12[%c0_99, %c0_100] : memref<1x30xf32, #tpu.memory_space<vmem>>, vector<1x30xf32>
    %c0_101 = arith.constant 0 : index
    %c0_102 = arith.constant 0 : index
    %115 = vector.load %arg13[%c0_101, %c0_102] : memref<30x30xf32, #tpu.memory_space<vmem>>, vector<30x30xf32>
    %c0_103 = arith.constant 0 : index
    %c0_104 = arith.constant 0 : index
    %116 = vector.load %arg14[%c0_103, %c0_104] : memref<1x30xf32, #tpu.memory_space<vmem>>, vector<1x30xf32>
    %c0_105 = arith.constant 0 : index
    %c0_106 = arith.constant 0 : index
    %117 = vector.load %arg15[%c0_105, %c0_106] : memref<1x30xf32, #tpu.memory_space<vmem>>, vector<1x30xf32>
    %c0_107 = arith.constant 0 : index
    %c0_108 = arith.constant 0 : index
    %118 = vector.load %arg16[%c0_107, %c0_108] : memref<88x30xf32, #tpu.memory_space<vmem>>, vector<88x30xf32>
    %c0_109 = arith.constant 0 : index
    %c0_110 = arith.constant 0 : index
    %119 = vector.load %arg17[%c0_109, %c0_110] : memref<1x30xf32, #tpu.memory_space<vmem>>, vector<1x30xf32>
    %c0_111 = arith.constant 0 : index
    %c0_112 = arith.constant 0 : index
    %120 = vector.load %arg18[%c0_111, %c0_112] : memref<1x30xf32, #tpu.memory_space<vmem>>, vector<1x30xf32>
    %c0_113 = arith.constant 0 : index
    %c0_114 = arith.constant 0 : index
    %121 = vector.load %arg19[%c0_113, %c0_114] : memref<30x6xf32, #tpu.memory_space<vmem>>, vector<30x6xf32>
    %c0_115 = arith.constant 0 : index
    %c0_116 = arith.constant 0 : index
    %122 = vector.load %arg20[%c0_115, %c0_116] : memref<6x30xf32, #tpu.memory_space<vmem>>, vector<6x30xf32>
    %cst_117 = arith.constant dense<0.000000e+00> : vector<128x30xf32>
    %123 = tpu.matmul %111, %112, %cst_117 {dimension_numbers = #tpu.dot_dimension_numbers<[1], [0], [0], [1], [0, 0, 1, 1], [], []>} : vector<128x88xf32>, vector<88x30xf32>, vector<128x30xf32> -> vector<128x30xf32>
    %124 = vector.broadcast %113 : vector<1x30xf32> to vector<128x30xf32>
    %125 = arith.mulf %123, %124 : vector<128x30xf32>
    %126 = vector.broadcast %114 : vector<1x30xf32> to vector<128x30xf32>
    %127 = arith.addf %125, %126 : vector<128x30xf32>
    %cst_118 = arith.constant 0.000000e+00 : f32
    %128 = vector.broadcast %cst_118 : f32 to vector<128x30xf32>
    %129 = arith.maximumf %127, %128 : vector<128x30xf32>
    %cst_119 = arith.constant dense<0.000000e+00> : vector<128x30xf32>
    %130 = tpu.matmul %129, %115, %cst_119 {dimension_numbers = #tpu.dot_dimension_numbers<[1], [0], [0], [1], [0, 0, 1, 1], [], []>} : vector<128x30xf32>, vector<30x30xf32>, vector<128x30xf32> -> vector<128x30xf32>
    %131 = vector.broadcast %116 : vector<1x30xf32> to vector<128x30xf32>
    %132 = arith.mulf %130, %131 : vector<128x30xf32>
    %133 = vector.broadcast %117 : vector<1x30xf32> to vector<128x30xf32>
    %134 = arith.addf %132, %133 : vector<128x30xf32>
    %cst_120 = arith.constant dense<0.000000e+00> : vector<128x30xf32>
    %135 = tpu.matmul %111, %118, %cst_120 {dimension_numbers = #tpu.dot_dimension_numbers<[1], [0], [0], [1], [0, 0, 1, 1], [], []>} : vector<128x88xf32>, vector<88x30xf32>, vector<128x30xf32> -> vector<128x30xf32>
    %136 = vector.broadcast %119 : vector<1x30xf32> to vector<128x30xf32>
    %137 = arith.mulf %135, %136 : vector<128x30xf32>
    %138 = vector.broadcast %120 : vector<1x30xf32> to vector<128x30xf32>
    %139 = arith.addf %137, %138 : vector<128x30xf32>
    %140 = vector.extract_strided_slice %134 {offsets = [0, 0], sizes = [64, 30], strides = [1, 1]} : vector<128x30xf32> to vector<64x30xf32>
    %141 = vector.extract_strided_slice %139 {offsets = [0, 0], sizes = [64, 30], strides = [1, 1]} : vector<128x30xf32> to vector<64x30xf32>
    %cst_121 = arith.constant dense<0.000000e+00> : vector<30xf32>
    %142 = vector.multi_reduction <add>, %140, %cst_121 [0] : vector<64x30xf32> to vector<30xf32>
    %143 = vector.shape_cast %142 : vector<30xf32> to vector<1x30xf32>
    %cst_122 = arith.constant 6.400000e+01 : f32
    %144 = vector.broadcast %cst_122 : f32 to vector<1x30xf32>
    %145 = arith.divf %143, %144 : vector<1x30xf32>
    %cst_123 = arith.constant dense<0.000000e+00> : vector<1x6xf32>
    %146 = tpu.matmul %145, %121, %cst_123 {dimension_numbers = #tpu.dot_dimension_numbers<[1], [0], [0], [1], [0, 0, 1, 1], [], []>} : vector<1x30xf32>, vector<30x6xf32>, vector<1x6xf32> -> vector<1x6xf32>
    %cst_124 = arith.constant 0.000000e+00 : f32
    %147 = vector.broadcast %cst_124 : f32 to vector<1x6xf32>
    %148 = arith.maximumf %146, %147 : vector<1x6xf32>
    %cst_125 = arith.constant dense<0.000000e+00> : vector<1x30xf32>
    %149 = tpu.matmul %148, %122, %cst_125 {dimension_numbers = #tpu.dot_dimension_numbers<[1], [0], [0], [1], [0, 0, 1, 1], [], []>} : vector<1x6xf32>, vector<6x30xf32>, vector<1x30xf32> -> vector<1x30xf32>
    %150 = arith.negf %149 : vector<1x30xf32>
    %151 = math.exp %150 : vector<1x30xf32>
    %cst_126 = arith.constant 1.000000e+00 : f32
    %152 = vector.broadcast %cst_126 : f32 to vector<1x30xf32>
    %153 = arith.addf %152, %151 : vector<1x30xf32>
    %154 = arith.divf %152, %153 : vector<1x30xf32>
    %155 = vector.broadcast %154 : vector<1x30xf32> to vector<64x30xf32>
    %156 = arith.mulf %140, %155 : vector<64x30xf32>
    %157 = arith.addf %156, %141 : vector<64x30xf32>
    %cst_127 = arith.constant 0.000000e+00 : f32
    %158 = vector.broadcast %cst_127 : f32 to vector<64x30xf32>
    %159 = arith.maximumf %157, %158 : vector<64x30xf32>
    %c0_128 = arith.constant 0 : index
    %c0_129 = arith.constant 0 : index
    %c0_130 = arith.constant 0 : index
    %160 = vector.load %arg21[%c0_128, %c0_129, %c0_130] : memref<2x64x30xf32, #tpu.memory_space<vmem>>, vector<1x64x30xf32>
    %161 = vector.shape_cast %160 : vector<1x64x30xf32> to vector<64x30xf32>
    %162 = vector.shape_cast %159 : vector<64x30xf32> to vector<1x64x30xf32>
    tpu.vector_store %arg21[%c0_128, %c0_129, %c0_130], %162 {strides = array<i32>} : memref<2x64x30xf32, #tpu.memory_space<vmem>>, vector<1x64x30xf32>,
    %163 = vector.extract_strided_slice %134 {offsets = [64, 0], sizes = [64, 30], strides = [1, 1]} : vector<128x30xf32> to vector<64x30xf32>
    %164 = vector.extract_strided_slice %139 {offsets = [64, 0], sizes = [64, 30], strides = [1, 1]} : vector<128x30xf32> to vector<64x30xf32>
    %cst_131 = arith.constant dense<0.000000e+00> : vector<30xf32>
    %165 = vector.multi_reduction <add>, %163, %cst_131 [0] : vector<64x30xf32> to vector<30xf32>
    %166 = vector.shape_cast %165 : vector<30xf32> to vector<1x30xf32>
    %cst_132 = arith.constant 6.400000e+01 : f32
    %167 = vector.broadcast %cst_132 : f32 to vector<1x30xf32>
    %168 = arith.divf %166, %167 : vector<1x30xf32>
    %cst_133 = arith.constant dense<0.000000e+00> : vector<1x6xf32>
    %169 = tpu.matmul %168, %121, %cst_133 {dimension_numbers = #tpu.dot_dimension_numbers<[1], [0], [0], [1], [0, 0, 1, 1], [], []>} : vector<1x30xf32>, vector<30x6xf32>, vector<1x6xf32> -> vector<1x6xf32>
    %cst_134 = arith.constant 0.000000e+00 : f32
    %170 = vector.broadcast %cst_134 : f32 to vector<1x6xf32>
    %171 = arith.maximumf %169, %170 : vector<1x6xf32>
    %cst_135 = arith.constant dense<0.000000e+00> : vector<1x30xf32>
    %172 = tpu.matmul %171, %122, %cst_135 {dimension_numbers = #tpu.dot_dimension_numbers<[1], [0], [0], [1], [0, 0, 1, 1], [], []>} : vector<1x6xf32>, vector<6x30xf32>, vector<1x30xf32> -> vector<1x30xf32>
    %173 = arith.negf %172 : vector<1x30xf32>
    %174 = math.exp %173 : vector<1x30xf32>
    %cst_136 = arith.constant 1.000000e+00 : f32
    %175 = vector.broadcast %cst_136 : f32 to vector<1x30xf32>
    %176 = arith.addf %175, %174 : vector<1x30xf32>
    %177 = arith.divf %175, %176 : vector<1x30xf32>
    %178 = vector.broadcast %177 : vector<1x30xf32> to vector<64x30xf32>
    %179 = arith.mulf %163, %178 : vector<64x30xf32>
    %180 = arith.addf %179, %164 : vector<64x30xf32>
    %cst_137 = arith.constant 0.000000e+00 : f32
    %181 = vector.broadcast %cst_137 : f32 to vector<64x30xf32>
    %182 = arith.maximumf %180, %181 : vector<64x30xf32>
    %c1_138 = arith.constant 1 : index
    %c0_139 = arith.constant 0 : index
    %c0_140 = arith.constant 0 : index
    %183 = vector.load %arg21[%c1_138, %c0_139, %c0_140] : memref<2x64x30xf32, #tpu.memory_space<vmem>>, vector<1x64x30xf32>
    %184 = vector.shape_cast %183 : vector<1x64x30xf32> to vector<64x30xf32>
    %185 = vector.shape_cast %182 : vector<64x30xf32> to vector<1x64x30xf32>
    tpu.vector_store %arg21[%c1_138, %c0_139, %c0_140], %185 {strides = array<i32>} : memref<2x64x30xf32, #tpu.memory_space<vmem>>, vector<1x64x30xf32>,
    return
  }
}

</mosaic_0001>

<bundles_post_ra>
// kernel: forward.1
= control target key start
LH: loop header
LB: loop body
LE: loop exit
PB: predicated region body
PF: predicated region fallthrough
CT: control target
= control target key end

     0   :  { %vm6666_vm0 = vcmask 1040384   ;;  %vm6662_vm1 = vcmask 1041408   ;;  %s4445_s28 = smov 2   ;;  %s4446_s29 = smov 1   ;;  %vm295_vm2 = vcmask 1046528   ;;  %vm345_vm3 = vcmask 1045504   ;;  %s6637_s0 = inlined_call_operand.vmem [shape: f32[128,1], index: 0, kind: input, shape index: {}]   ;;  %s6638_s1 = inlined_call_operand.vmem [shape: f32[7,24], index: 1, kind: input, shape index: {}]   ;;  %s6639_s4 = inlined_call_operand.vmem [shape: f32[168,24], index: 4, kind: input, shape index: {}]   ;;  %s6640_s2 = inlined_call_operand.vmem [shape: f32[1,24], index: 2, kind: input, shape index: {}]   ;;  %s6641_s3 = inlined_call_operand.vmem [shape: f32[1,24], index: 3, kind: input, shape index: {}]   ;;  %s6642_s5 = inlined_call_operand.vmem [shape: f32[1,24], index: 5, kind: input, shape index: {}]   ;;  %s6643_s6 = inlined_call_operand.vmem [shape: f32[1,24], index: 6, kind: input, shape index: {}]   ;;  %s6644_s7 = inlined_call_operand.vmem [shape: f32[96,88], index: 7, kind: input, shape index: {}]   ;;  %s6645_s10 = inlined_call_operand.vmem [shape: f32[88,30], index: 10, kind: input, shape index: {}]   ;;  %s6646_s16 = inlined_call_operand.vmem [shape: f32[88,30], index: 16, kind: input, shape index: {}]   ;;  %s6647_s8 = inlined_call_operand.vmem [shape: f32[1,88], index: 8, kind: input, shape index: {}]   ;;  %s6648_s9 = inlined_call_operand.vmem [shape: f32[1,88], index: 9, kind: input, shape index: {}]   ;;  %s6649_s13 = inlined_call_operand.vmem [shape: f32[30,30], index: 13, kind: input, shape index: {}]   ;;  %s6650_s11 = inlined_call_operand.vmem [shape: f32[1,30], index: 11, kind: input, shape index: {}]   ;;  %s6651_s12 = inlined_call_operand.vmem [shape: f32[1,30], index: 12, kind: input, shape index: {}]   ;;  %s6652_s19 = inlined_call_operand.vmem [shape: f32[30,6], index: 19, kind: input, shape index: {}]   ;;  %s6653_s14 = inlined_call_operand.vmem [shape: f32[1,30], index: 14, kind: input, shape index: {}]   ;;  %s6654_s15 = inlined_call_operand.vmem [shape: f32[1,30], index: 15, kind: input, shape index: {}]   ;;  %s6655_s20 = inlined_call_operand.vmem [shape: f32[6,30], index: 20, kind: input, shape index: {}]   ;;  %s6656_s17 = inlined_call_operand.vmem [shape: f32[1,30], index: 17, kind: input, shape index: {}]   ;;  %s6657_s18 = inlined_call_operand.vmem [shape: f32[1,30], index: 18, kind: input, shape index: {}]   ;;  %s6658_s21 = inlined_call_operand.vmem [shape: f32[2,64,30], index: 21, kind: output, shape index: {}]  }
   0x1   :  { %6667 = sst [smem:[#allocation3_spill]] %s6637_s0  ;;  %s4447_s30 = smov 3   ;;  %vm395_vm4 = vcmask 1044480   ;;  %v4451_v28 = vmov 0.0   ;;  %vm152_vm5 = vcmask 7171   ;;  %vm6661_vm6 = vcmask 1042432  }
   0x2   :  { %6668 = sst [smem:[#allocation4_spill]] %s6638_s1  ;;  %s6673_s26 = sld [smem:[#allocation3_spill]]  ;;  %87 = vst [vmem:[#allocation2] sm:$0xff] %v4451_v28  ;;  %90 = vst [vmem:[#allocation2 + $0x10] sm:$0xff] %v4451_v28  ;;  %vm154_vm7 = vcmask 7168   ;;  %vm202_vm8 = vcmask 15370  }
   0x3   :  { %6669 = sst [smem:[#allocation5_spill]] %s6639_s4  ;;  %s4449_s1 = smov 5   ;;  %92 = vst [vmem:[#allocation2 + $0x20] sm:$0xff] %v4451_v28  ;;  %94 = vst [vmem:[#allocation2 + $0x30] sm:$0xff] %v4451_v28  ;;  %vm252_vm9 = vcmask 23569   ;;  %vm204_vm10 = vcmask 15368  }
   0x4   :  { %6670 = sst [smem:[#allocation6_spill]] %s6640_s2  ;;  %s4450_s24 = smov 6   ;;  %96 = vst [vmem:[#allocation2 + $0x40] sm:$0xff] %v4451_v28  ;;  %98 = vst [vmem:[#allocation2 + $0x50] sm:$0xff] %v4451_v28  ;;  %vm254_vm11 = vcmask 23568   ;;  %vm286_vm12 = vcmask 31768  }
   0x5   :  { %6671 = sst [smem:[#allocation7_spill]] %s6641_s3  ;;  %100 = vst [vmem:[#allocation2 + $0x60] sm:$0xff] %v4451_v28  ;;  %102 = vst [vmem:[#allocation2 + $0x70] sm:$0xff] %v4451_v28  ;;  %s6674_s27 = sld [smem:[#allocation4_spill]]  ;;  %vm335_vm13 = vcmask 39968   ;;  %vm385_vm14 = vcmask 48168  }
   0x6   :  { %6672 = sst [smem:[#allocation8_spill]] %s6642_s5  ;;  %s4448_s5 = smov 4   ;;  %104 = vst [vmem:[#allocation2 + $0x80] sm:$0xff] %v4451_v28  ;;  %106 = vst [vmem:[#allocation2 + $0x90] sm:$0xff] %v4451_v28  ;;  %vm435_vm15 = vcmask 56368  }
   0x7   :  { %108 = vst [vmem:[#allocation2 + $0xa0] sm:$0xff] %v4451_v28  ;;  %110 = vst [vmem:[#allocation2 + $0xb0] sm:$0xff] %v4451_v28  ;;  %s4455_s2 = smov 120   ;;  %s4456_s0 = smov 24  }
   0x8   :  { %v4574_v0 = vld [vmem:[%s6673_s26] sm:$0xff]  ;;  %v4579_v1 = vld [vmem:[%s6673_s26 + $0x8] sm:$0xff]  ;;  %v4594_v8 = vld [vmem:[%s6673_s26 + $0x10] sm:$0xff]  ;;  %112 = vst [vmem:[#allocation2 + $0xc0] sm:$0xff] %v4451_v28  ;;  %s4457_s23 = smov 16   ;;  %s4458_s4 = smov 96  }
   0x9   :  { %v213_v2 = vrot.slane %v4574_v0, 7  ;;  %v163_v3 = vrot.slane %v4574_v0, 6  ;;  %v214_v4 = vrot.slane %v4579_v1, 7  ;;  %v164_v5 = vrot.slane %v4579_v1, 6  ;;  %v4622_v22 = vld [vmem:[%s6673_s26 + $0x18] sm:$0xff]  ;;  %114 = vst [vmem:[#allocation2 + $0xd0] sm:$0xff] %v4451_v28 }
   0xa   :  { %v297_v9 = vrot.slane %v4579_v1, 1  ;;  %v299_v10 = vrot.slane %v4594_v8, 1  ;;  %v296_v11 = vrot.slane %v4574_v0, 1  ;;  %v166_v12 = vrot.slane %v4594_v8, 6  ;;  %116 = vst [vmem:[#allocation2 + $0xe0] sm:$0xff] %v4451_v28  ;;  %118 = vst [vmem:[#allocation2 + $0xf0] sm:$0xff] %v4451_v28 }
   0xb   :  { %228 = vrot.lane.b32.xlu1 %v213_v2, %s4445_s28  ;;  %178 = vrot.lane.b32.xlu0 %v163_v3, %s4446_s29  ;;  %v215_v6 = vsel %vm6666_vm0, %v213_v2, %v214_v4  ;;  %v165_v7 = vsel %vm6662_vm1, %v163_v3, %v164_v5  ;;  %v346_v15 = vrot.slane %v4574_v0, 2  ;;  %v347_v16 = vrot.slane %v4579_v1, 2  ;;  %v84_v29 = vld [vmem:[%s6674_s27] sm:$0x7f]  ;;  %v4702_v49 = vld [vmem:[%s6673_s26 + $0x28] sm:$0xff]  ;;  %s6705_s27 = sld [smem:[#allocation8_spill]] }
   0xc   :  { %v300_v13 = vsel %vm295_vm2, %v297_v9, %v299_v10  ;;  %v298_v14 = vsel %vm295_vm2, %v296_v11, %v297_v9  ;;  %v167_v17 = vsel %vm6662_vm1, %v164_v5, %v166_v12  ;;  %v396_v19 = vrot.slane %v4574_v0, 3  ;;  %4073 = vmatprep.subr.msk.mxu0 %vm295_vm2, %v84_v29  ;;  %v4677_v38 = vld [vmem:[%s6673_s26 + $0x20] sm:$0xff] }
   0xd   :  { %v348_v18 = vsel %vm345_vm3, %v346_v15, %v347_v16  ;;  %v397_v20 = vrot.slane %v4579_v1, 3  ;;  %v349_v21 = vrot.slane %v4594_v8, 2  ;;  %v216_v25 = vrot.slane %v4594_v8, 7  ;;  %4074 = vmatpush3.msk.msra.mxu0 %vm295_vm2, %v84_v29 }
   0xe   :  { %v168_v26 = vrot.slane %v4622_v22, 6  ;;  %v218_v27 = vrot.slane %v4622_v22, 7  ;;  %v399_v32 = vrot.slane %v4594_v8, 3  ;;  %v129_v33 = vrot.slane %v4574_v0, 5 }
   0xf   :  { %230 = vrot.lane.b32.xlu1 %v215_v6, %s4445_s28  ;;  %180 = vrot.lane.b32.xlu0 %v165_v7, %s4446_s29  ;;  %v398_v23 = vsel %vm395_vm4, %v396_v19, %v397_v20  ;;  %v350_v24 = vsel %vm345_vm3, %v347_v16, %v349_v21  ;;  %v217_v30 = vsel %vm6666_vm0, %v214_v4, %v216_v25  ;;  %v130_v34 = vrot.slane %v4579_v1, 5  ;;  %v74_v4 = vld [vmem:[%s6673_s26 + $0x30] sm:$0xff]  ;;  %v75_v7 = vld [vmem:[%s6673_s26 + $0x38] sm:$0xff] }
  0x10   :  { %v169_v31 = vsel %vm6662_vm1, %v166_v12, %v168_v26  ;;  %153 = vst.msk [vmem:[#allocation2] sm:$0xf8] %vm152_vm5, %v129_v33  ;;  %v219_v36 = vsel %vm6666_vm0, %v216_v25, %v218_v27  ;;  %v400_v37 = vsel %vm395_vm4, %v397_v20, %v399_v32  ;;  %v132_v39 = vrot.slane %v4594_v8, 5 }
  0x11   :  { %v131_v35 = vsel %vm6661_vm6, %v129_v33, %v130_v34  ;;  %v301_v41 = vrot.slane %v4622_v22, 1  ;;  %v303_v42 = vrot.slane %v4677_v38, 1  ;;  %v134_v43 = vrot.slane %v4622_v22, 5  ;;  %v4783_v33 = vld [vmem:[%s6673_s26 + $0x48] sm:$0xff] }
  0x12   :  { %155 = vst.msk [vmem:[#allocation2 + $0x10] sm:$0xff] %vm154_vm7, %v131_v35  ;;  %v133_v40 = vsel %vm6661_vm6, %v130_v34, %v132_v39  ;;  %v351_v47 = vrot.slane %v4622_v22, 2  ;;  %v353_v48 = vrot.slane %v4677_v38, 2  ;;  %v136_v50 = vrot.slane %v4677_v38, 5 }
  0x13   :  { %264 = vrot.lane.b32.xlu1 %v4579_v1, %s4447_s30  ;;  %262 = vrot.lane.b32.xlu0 %v4574_v0, %s4447_s30  ;;  %156 = vst.msk [vmem:[#allocation2 + $0x20] sm:$0xff] %vm154_vm7, %v133_v40  ;;  %v135_v44 = vsel %vm6661_vm6, %v132_v39, %v134_v43  ;;  %v304_v45 = vsel %vm295_vm2, %v301_v41, %v303_v42  ;;  %v138_v51 = vrot.slane %v4702_v49, 5  ;;  %v401_v52 = vrot.slane %v4622_v22, 3 }
  0x14   :  { %157 = vst.msk [vmem:[#allocation2 + $0x30] sm:$0xff] %vm154_vm7, %v135_v44  ;;  %v302_v46 = vsel %vm295_vm2, %v299_v10, %v301_v41  ;;  %v137_v53 = vsel %vm6661_vm6, %v134_v43, %v136_v50  ;;  %v354_v54 = vsel %vm345_vm3, %v351_v47, %v353_v48  ;;  %v352_v55 = vsel %vm345_vm3, %v349_v21, %v351_v47  ;;  %v4806_v47 = vld [vmem:[%s6673_s26 + $0x50] sm:$0xff] }
  0x15   :  { %v403_v56 = vrot.slane %v4677_v38, 3  ;;  %v139_v57 = vsel %vm6661_vm6, %v136_v50, %v138_v51  ;;  %158 = vst.msk [vmem:[#allocation2 + $0x40] sm:$0xff] %vm154_vm7, %v137_v53  ;;  %v402_v59 = vsel %vm395_vm4, %v399_v32, %v401_v52  ;;  %v170_v60 = vrot.slane %v4677_v38, 6  ;;  %v76_v32 = vld [vmem:[%s6673_s26 + $0x40] sm:$0xff] }
  0x16   :  { %159 = vst.msk [vmem:[#allocation2 + $0x50] sm:$0xff] %vm154_vm7, %v139_v57  ;;  %v172_v61 = vrot.slane %v4702_v49, 6  ;;  %v220_v0 = vrot.slane %v4677_v38, 7  ;;  %v222_v1 = vrot.slane %v4702_v49, 7  ;;  %v305_v5 = vrot.slane %v4702_v49, 1 }
  0x17   :  { %313 = vrot.lane.b32.xlu1 %v300_v13, %s4448_s5  ;;  %311 = vrot.lane.b32.xlu0 %v298_v14, %s4448_s5  ;;  %v404_v58 = vsel %vm395_vm4, %v401_v52, %v403_v56  ;;  %v171_v63 = vsel %vm6662_vm1, %v168_v26, %v170_v60  ;;  %v307_v6 = vrot.slane %v74_v4, 1  ;;  %v142_v9 = vrot.slane %v75_v7, 5 }
  0x18   :  { %v173_v62 = vsel %vm6662_vm1, %v170_v60, %v172_v61  ;;  %v223_v2 = vsel %vm6666_vm0, %v220_v0, %v222_v1  ;;  %v221_v3 = vsel %vm6666_vm0, %v218_v27, %v220_v0  ;;  %v306_v11 = vsel %vm295_vm2, %v303_v42, %v305_v5 }
  0x19   :  { %v308_v10 = vsel %vm295_vm2, %v305_v5, %v307_v6  ;;  %v355_v12 = vrot.slane %v4702_v49, 2  ;;  %v357_v13 = vrot.slane %v74_v4, 2  ;;  %v407_v19 = vrot.slane %v74_v4, 3 }
  0x1a   :  { %v224_v26 = vrot.slane %v74_v4, 7  ;;  %v226_v27 = vrot.slane %v75_v7, 7  ;;  %v453_v34 = vrot.slane %v76_v32, 5  ;;  %v454_v35 = vrot.slane %v4783_v33, 5 }
  0x1b   :  { %182 = vrot.lane.b32.xlu1 %v167_v17, %s4446_s29  ;;  %361 = vrot.lane.b32.xlu0 %v348_v18, %s4449_s1  ;;  %v358_v16 = vsel %vm345_vm3, %v355_v12, %v357_v13  ;;  %v356_v17 = vsel %vm345_vm3, %v353_v48, %v355_v12  ;;  %v405_v18 = vrot.slane %v4702_v49, 3  ;;  %v409_v40 = vrot.slane %v75_v7, 3 }
  0x1c   :  { %v227_v29 = vsel %vm6666_vm0, %v224_v26, %v226_v27  ;;  %476 = vst.msk [vmem:[#allocation2 + $0x80] sm:$0xf8] %vm152_vm5, %v453_v34  ;;  %v484_v42 = vrot.slane %v76_v32, 6  ;;  %v485_v43 = vrot.slane %v4783_v33, 6  ;;  %v456_v48 = vrot.slane %v4806_v47, 5 }
  0x1d   :  { %v408_v20 = vsel %vm395_vm4, %v405_v18, %v407_v19  ;;  %v406_v21 = vsel %vm395_vm4, %v403_v56, %v405_v18  ;;  %v410_v41 = vsel %vm395_vm4, %v407_v19, %v409_v40  ;;  %v613_v52 = vrot.slane %v4806_v47, 1  ;;  %v4872_v19 = vld [vmem:[%s6673_s26 + $0x60] sm:$0xff] }
  0x1e   :  { %v486_v44 = vsel %vm6662_vm1, %v484_v42, %v485_v43  ;;  %v457_v50 = vsel %vm6661_vm6, %v454_v35, %v456_v48  ;;  %v610_v53 = vrot.slane %v76_v32, 1  ;;  %v658_v60 = vrot.slane %v4783_v33, 2 }
  0x1f   :  { %411 = vrot.lane.b32.xlu1 %v398_v23, %s4450_s24  ;;  %363 = vrot.lane.b32.xlu0 %v350_v24, %s4449_s1  ;;  %v176_v23 = vrot.slane %v75_v7, 6  ;;  %478 = vst.msk [vmem:[#allocation2 + $0xa0] sm:$0xff] %vm154_vm7, %v457_v50  ;;  %v704_v0 = vrot.slane %v76_v32, 3  ;;  %v707_v12 = vrot.slane %v4806_v47, 3  ;;  %vm767_vm5 = vcmask 56320  }
  0x20   :  { %v538_v50 = vrot.slane %v4872_v19, 7 }
  0x23   :  { %232 = vrot.lane.b32.xlu1 %v217_v30, %s4445_s28  ;;  %184 = vrot.lane.b32.xlu0 %v169_v31, %s4446_s29  ;;  %v225_v30 = vsel %vm6666_vm0, %v222_v1, %v224_v26  ;;  %v309_v31 = vrot.slane %v75_v7, 1  ;;  %v705_v1 = vrot.slane %v4783_v33, 3 }
  0x27   :  { %234 = vrot.lane.b32.xlu1 %v219_v36, %s4445_s28  ;;  %413 = vrot.lane.b32.xlu0 %v400_v37, %s4450_s24  ;;  %v310_v36 = vsel %vm295_vm2, %v307_v6, %v309_v31  ;;  %v359_v37 = vrot.slane %v75_v7, 2 }
  0x29   :  { %v360_v39 = vsel %vm345_vm3, %v357_v13, %v359_v37 }
  0x2b   :  { %268 = vrot.lane.b32.xlu1 %v4622_v22, %s4447_s30  ;;  %266 = vrot.lane.b32.xlu0 %v4594_v8, %s4447_s30  ;;  %v140_v8 = vrot.slane %v74_v4, 5  ;;  %v174_v22 = vrot.slane %v74_v4, 6 }
  0x2d   :  { %v143_v14 = vsel %vm6661_vm6, %v140_v8, %v142_v9  ;;  %v141_v15 = vsel %vm6661_vm6, %v138_v51, %v140_v8  ;;  %v177_v24 = vsel %vm6662_vm1, %v174_v22, %v176_v23  ;;  %v175_v25 = vsel %vm6662_vm1, %v172_v61, %v174_v22 }
  0x2e   :  { %161 = vst.msk [vmem:[#allocation2 + $0x70] sm:$0xff] %vm154_vm7, %v143_v14  ;;  %160 = vst.msk [vmem:[#allocation2 + $0x60] sm:$0xff] %vm154_vm7, %v141_v15  ;;  %v611_v51 = vrot.slane %v4783_v33, 1 }
  0x2f   :  { %317 = vrot.lane.b32.xlu1 %v304_v45, %s4448_s5  ;;  %315 = vrot.lane.b32.xlu0 %v302_v46, %s4448_s5  ;;  %v531_v45 = vrot.slane %v76_v32, 7  ;;  %v532_v46 = vrot.slane %v4783_v33, 7 }
  0x30   :  { %v614_v57 = vsel %vm295_vm2, %v611_v51, %v613_v52 }
  0x33   :  { %367 = vrot.lane.b32.xlu1 %v354_v54, %s4449_s1  ;;  %365 = vrot.lane.b32.xlu0 %v352_v55, %s4449_s1  ;;  %v4821_v54 = vld [vmem:[%s6673_s26 + $0x58] sm:$0xff]  ;;  %v487_v55 = vrot.slane %v4806_v47, 6 }
  0x34   :  { %v458_v56 = vrot.slane %v4821_v54, 5  ;;  %v489_v6 = vrot.slane %v4821_v54, 6  ;;  %v662_v27 = vrot.slane %v4821_v54, 2 }
  0x36   :  { %v459_v61 = vsel %vm6661_vm6, %v456_v48, %v458_v56 }
  0x37   :  { %417 = vrot.lane.b32.xlu1 %v404_v58, %s4450_s24  ;;  %415 = vrot.lane.b32.xlu0 %v402_v59, %s4450_s24  ;;  %v612_v58 = vsel %vm295_vm2, %v610_v53, %v611_v51  ;;  %v657_v59 = vrot.slane %v76_v32, 2  ;;  %479 = vst.msk [vmem:[#allocation2 + $0xb0] sm:$0xff] %vm154_vm7, %v459_v61 }
  0x3b   :  { %188 = vrot.lane.b32.xlu1 %v173_v62, %s4446_s29  ;;  %186 = vrot.lane.b32.xlu0 %v171_v63, %s4446_s29  ;;  %v488_v62 = vsel %vm6662_vm1, %v485_v43, %v487_v55  ;;  %v659_v63 = vsel %vm345_vm3, %v657_v59, %v658_v60 }
  0x3f   :  { %238 = vrot.lane.b32.xlu1 %v223_v2, %s4445_s28  ;;  %236 = vrot.lane.b32.xlu0 %v221_v3, %s4445_s28  ;;  %v660_v2 = vrot.slane %v4806_v47, 2  ;;  %v534_v3 = vrot.slane %v4806_v47, 7 }
  0x41   :  { %v661_v5 = vsel %vm345_vm3, %v658_v60, %v660_v2  ;;  %v535_v9 = vsel %vm6666_vm0, %v532_v46, %v534_v3  ;;  %v4958_v60 = vld [vmem:[%s6673_s26 + $0x70] sm:$0xff] }
  0x43   :  { %272 = vrot.lane.b32.xlu1 %v4702_v49, %s4447_s30  ;;  %270 = vrot.lane.b32.xlu0 %v4677_v38, %s4447_s30  ;;  %v455_v38 = vsel %vm6661_vm6, %v453_v34, %v454_v35  ;;  %v533_v49 = vsel %vm6666_vm0, %v531_v45, %v532_v46 }
  0x44   :  { %477 = vst.msk [vmem:[#allocation2 + $0x90] sm:$0xff] %vm154_vm7, %v455_v38  ;;  %v709_v38 = vrot.slane %v4821_v54, 3 }
  0x46   :  { %v710_v43 = vsel %vm395_vm4, %v707_v12, %v709_v38 }
  0x47   :  { %321 = vrot.lane.b32.xlu1 %v308_v10, %s4448_s5  ;;  %319 = vrot.lane.b32.xlu0 %v306_v11, %s4448_s5  ;;  %v490_v10 = vsel %vm6662_vm1, %v487_v55, %v489_v6  ;;  %v536_v11 = vrot.slane %v4821_v54, 7 }
  0x49   :  { %v537_v15 = vsel %vm6666_vm0, %v534_v3, %v536_v11 }
  0x4b   :  { %371 = vrot.lane.b32.xlu1 %v358_v16, %s4449_s1  ;;  %369 = vrot.lane.b32.xlu0 %v356_v17, %s4449_s1  ;;  %v708_v16 = vsel %vm395_vm4, %v705_v1, %v707_v12 }
  0x4f   :  { %421 = vrot.lane.b32.xlu1 %v408_v20, %s4450_s24  ;;  %419 = vrot.lane.b32.xlu0 %v406_v21, %s4450_s24  ;;  %v615_v20 = vrot.slane %v4821_v54, 1  ;;  %v617_v21 = vrot.slane %v4872_v19, 1 }
  0x53   :  { %192 = vrot.lane.b32.xlu1 %v177_v24, %s4446_s29  ;;  %190 = vrot.lane.b32.xlu0 %v175_v25, %s4446_s29  ;;  %v4883_v24 = vld [vmem:[%s6673_s26 + $0x68] sm:$0xff]  ;;  %v460_v25 = vrot.slane %v4872_v19, 5 }
  0x54   :  { %v462_v26 = vrot.slane %v4883_v24, 5  ;;  %v540_v51 = vrot.slane %v4883_v24, 7  ;;  %v619_v61 = vrot.slane %v4883_v24, 1 }
  0x55   :  { %v461_v35 = vsel %vm6661_vm6, %v458_v56, %v460_v25 }
  0x56   :  { %480 = vst.msk [vmem:[#allocation2 + $0xc0] sm:$0xff] %vm154_vm7, %v461_v35  ;;  %v541_v56 = vsel %vm6666_vm0, %v538_v50, %v540_v51 }
  0x57   :  { %242 = vrot.lane.b32.xlu1 %v227_v29, %s4445_s28  ;;  %240 = vrot.lane.b32.xlu0 %v225_v30, %s4445_s28  ;;  %v618_v29 = vsel %vm295_vm2, %v615_v20, %v617_v21  ;;  %v616_v30 = vsel %vm295_vm2, %v613_v52, %v615_v20 }
  0x5b   :  { %276 = vrot.lane.b32.xlu1 %v75_v7, %s4447_s30  ;;  %274 = vrot.lane.b32.xlu0 %v74_v4, %s4447_s30  ;;  %v706_v4 = vsel %vm395_vm4, %v704_v0, %v705_v1  ;;  %v4969_v1 = vld [vmem:[%s6673_s26 + $0x78] sm:$0xff]  ;;  %s4453_s26 = smov 72  }
  0x5c   :  { %v466_v3 = vrot.slane %v4969_v1, 5 }
  0x5f   :  { %325 = vrot.lane.b32.xlu1 %v309_v31, %s4448_s5  ;;  %323 = vrot.lane.b32.xlu0 %v310_v36, %s4448_s5  ;;  %v664_v31 = vrot.slane %v4872_v19, 2 }
  0x61   :  { %v665_v36 = vsel %vm345_vm3, %v662_v27, %v664_v31 }
  0x63   :  { %375 = vrot.lane.b32.xlu1 %v359_v37, %s4449_s1  ;;  %373 = vrot.lane.b32.xlu0 %v360_v39, %s4449_s1  ;;  %v663_v37 = vsel %vm345_vm3, %v660_v2, %v662_v27  ;;  %v711_v39 = vrot.slane %v4872_v19, 3  ;;  %v464_v2 = vrot.slane %v4958_v60, 5  ;;  %v542_v27 = vrot.slane %v4958_v60, 7 }
  0x65   :  { %v543_v35 = vsel %vm6666_vm0, %v540_v51, %v542_v27 }
  0x67   :  { %425 = vrot.lane.b32.xlu1 %v409_v40, %s4450_s24  ;;  %423 = vrot.lane.b32.xlu0 %v410_v41, %s4450_s24 }
  0x6b   :  { %501 = vrot.lane.b32.xlu1 %v486_v44, %s4446_s29  ;;  %499 = vrot.lane.b32.xlu0 %v484_v42, %s4446_s29  ;;  %v712_v42 = vsel %vm395_vm4, %v709_v38, %v711_v39  ;;  %v491_v44 = vrot.slane %v4872_v19, 6  ;;  %v623_v38 = vrot.slane %v4969_v1, 1 }
  0x6f   :  { %548 = vrot.lane.b32.xlu1 %v533_v49, %s4445_s28  ;;  %546 = vrot.lane.b32.xlu0 %v531_v45, %s4445_s28  ;;  %v493_v45 = vrot.slane %v4883_v24, 6  ;;  %v492_v49 = vsel %vm6662_vm1, %v489_v6, %v491_v44  ;;  %v620_v6 = vsel %vm295_vm2, %v617_v21, %v619_v61  ;;  %v495_v21 = vrot.slane %v4958_v60, 6 }
  0x71   :  { %v494_v48 = vsel %vm6662_vm1, %v491_v44, %v493_v45 }
  0x73   :  { %580 = vrot.lane.b32.xlu1 %v4783_v33, %s4447_s30  ;;  %578 = vrot.lane.b32.xlu0 %v76_v32, %s4447_s30  ;;  %v463_v32 = vsel %vm6661_vm6, %v460_v25, %v462_v26 }
  0x74   :  { %481 = vst.msk [vmem:[#allocation2 + $0xd0] sm:$0xff] %vm154_vm7, %v463_v32 }
  0x77   :  { %627 = vrot.lane.b32.xlu1 %v614_v57, %s4448_s5  ;;  %625 = vrot.lane.b32.xlu0 %v612_v58, %s4448_s5  ;;  %v539_v57 = vsel %vm6666_vm0, %v536_v11, %v538_v50  ;;  %v465_v11 = vsel %vm6661_vm6, %v462_v26, %v464_v2 }
  0x78   :  { %482 = vst.msk [vmem:[#allocation2 + $0xe0] sm:$0xff] %vm154_vm7, %v465_v11 }
  0x7b   :  { %503 = vrot.lane.b32.xlu1 %v488_v62, %s4446_s29  ;;  %672 = vrot.lane.b32.xlu0 %v659_v63, %s4449_s1 }
  0x7d   :  { %v229_v7 = vpop.permute.xlu1 %228  ;;  %v179_v8 = vpop.permute.xlu0 %178 }
  0x7e   :  { %203 = vst.msk [vmem:[#allocation2] sm:$0xfc] %vm202_vm8, %v179_v8  ;;  %v467_v8 = vsel %vm6661_vm6, %v464_v2, %v466_v3  ;;  %vm393_vm6 = vcmask 46120  }
  0x7f   :  { %719 = vrot.lane.b32.xlu1 %v706_v4, %s4450_s24  ;;  %674 = vrot.lane.b32.xlu0 %v661_v5, %s4449_s1  ;;  %253 = vst.msk [vmem:[#allocation2] sm:$0xfe] %vm252_vm9, %v229_v7  ;;  %v666_v4 = vrot.slane %v4883_v24, 2  ;;  %v668_v7 = vrot.slane %v4958_v60, 2 }
  0x80   :  { %483 = vst.msk [vmem:[#allocation2 + $0xf0] sm:$0xff] %vm154_vm7, %v467_v8  ;;  %vm343_vm7 = vcmask 38944  }
  0x81   :  { %v231_v13 = vpop.permute.xlu1 %230  ;;  %v181_v14 = vpop.permute.xlu0 %180  ;;  %v669_v12 = vsel %vm345_vm3, %v666_v4, %v668_v7 }
  0x82   :  { %205 = vst.msk [vmem:[#allocation2 + $0x10] sm:$0xff] %vm204_vm10, %v181_v14  ;;  %v713_v14 = vrot.slane %v4883_v24, 3 }
  0x83   :  { %550 = vrot.lane.b32.xlu1 %v535_v9, %s4445_s28  ;;  %505 = vrot.lane.b32.xlu0 %v490_v10, %s4446_s29  ;;  %255 = vst.msk [vmem:[#allocation2 + $0x10] sm:$0xff] %vm254_vm11, %v231_v13  ;;  %v667_v13 = vsel %vm345_vm3, %v664_v31, %v666_v4 }
  0x84   :  { %v714_v20 = vsel %vm395_vm4, %v711_v39, %v713_v14 }
  0x85   :  { %v265_v17 = vpop.permute.xlu1 %264  ;;  %v263_v18 = vpop.permute.xlu0 %262 }
  0x86   :  { %288 = vst.msk [vmem:[#allocation2 + $0x10] sm:$0xff] %vm286_vm12, %v265_v17  ;;  %287 = vst.msk [vmem:[#allocation2] sm:$0xff] %vm286_vm12, %v263_v18 }
  0x87   :  { %552 = vrot.lane.b32.xlu1 %v537_v15, %s4445_s28  ;;  %721 = vrot.lane.b32.xlu0 %v708_v16, %s4450_s24  ;;  %v715_v15 = vrot.slane %v4958_v60, 3 }
  0x89   :  { %v314_v22 = vpop.permute.xlu1 %313  ;;  %v312_v23 = vpop.permute.xlu0 %311  ;;  %v716_v18 = vsel %vm395_vm4, %v713_v14, %v715_v15 }
  0x8a   :  { %337 = vst.msk [vmem:[#allocation2 + $0x10] sm:$0xff] %vm335_vm13, %v314_v22  ;;  %336 = vst.msk [vmem:[#allocation2] sm:$0xff] %vm335_vm13, %v312_v23  ;;  %v497_v22 = vrot.slane %v4969_v1, 6 }
  0x8b   :  { %584 = vrot.lane.b32.xlu1 %v4821_v54, %s4447_s30  ;;  %582 = vrot.lane.b32.xlu0 %v4806_v47, %s4447_s30  ;;  %v621_v54 = vrot.slane %v4958_v60, 1 }
  0x8c   :  { %v498_v26 = vsel %vm6662_vm1, %v495_v21, %v497_v22 }
  0x8d   :  { %v183_v33 = vpop.permute.xlu1 %182  ;;  %v362_v34 = vpop.permute.xlu0 %361  ;;  %v622_v5 = vsel %vm295_vm2, %v619_v61, %v621_v54 }
  0x8e   :  { %206 = vst.msk [vmem:[#allocation2 + $0x20] sm:$0xff] %vm204_vm10, %v183_v33 }
  0x8f   :  { %386 = vst.msk [vmem:[#allocation2] sm:$0xff] %vm385_vm14, %v362_v34  ;;  %631 = vrot.lane.b32.xlu1 %v618_v29, %s4448_s5  ;;  %629 = vrot.lane.b32.xlu0 %v616_v30, %s4448_s5  ;;  %v544_v29 = vrot.slane %v4969_v1, 7 }
  0x91   :  { %v412_v40 = vpop.permute.xlu1 %411  ;;  %v364_v41 = vpop.permute.xlu0 %363  ;;  %v545_v34 = vsel %vm6666_vm0, %v542_v27, %v544_v29 }
  0x92   :  { %436 = vst.msk [vmem:[#allocation2] sm:$0xff] %vm435_vm15, %v412_v40 }
  0x93   :  { %387 = vst.msk [vmem:[#allocation2 + $0x10] sm:$0xff] %vm385_vm14, %v364_v41  ;;  %678 = vrot.lane.b32.xlu1 %v665_v36, %s4449_s1  ;;  %676 = vrot.lane.b32.xlu0 %v663_v37, %s4449_s1  ;;  %v670_v41 = vrot.slane %v4969_v1, 2 }
  0x95   :  { %v233_v46 = vpop.permute.xlu1 %232  ;;  %v185_v47 = vpop.permute.xlu0 %184  ;;  %v671_v44 = vsel %vm345_vm3, %v668_v7, %v670_v41 }
  0x96   :  { %256 = vst.msk [vmem:[#allocation2 + $0x20] sm:$0xff] %vm254_vm11, %v233_v46 }
  0x97   :  { %207 = vst.msk [vmem:[#allocation2 + $0x30] sm:$0xff] %vm204_vm10, %v185_v47  ;;  %725 = vrot.lane.b32.xlu1 %v712_v42, %s4450_s24  ;;  %723 = vrot.lane.b32.xlu0 %v710_v43, %s4450_s24 }
  0x99   :  { %v235_v52 = vpop.permute.xlu1 %234  ;;  %v414_v53 = vpop.permute.xlu0 %413  ;;  %v751_v55 = vld [vmem:[#allocation2] sm:$0xff] }
  0x9a   :  { %257 = vst.msk [vmem:[#allocation2 + $0x30] sm:$0xff] %vm254_vm11, %v235_v52  ;;  %4075 = vmatprep.mubr.msk.f32.mxu0 %vm767_vm5, %v751_v55  ;;  %1047 = vst [vmem:[#allocation2] sm:$0xff] %v4451_v28 }
  0x9b   :  { %437 = vst.msk [vmem:[#allocation2 + $0x10] sm:$0xff] %vm435_vm15, %v414_v53  ;;  %509 = vrot.lane.b32.xlu1 %v494_v48, %s4446_s29  ;;  %507 = vrot.lane.b32.xlu0 %v492_v49, %s4446_s29 }
  0x9d   :  { %v269_v58 = vpop.permute.xlu1 %268  ;;  %v267_v59 = vpop.permute.xlu0 %266 }
  0x9e   :  { %290 = vst.msk [vmem:[#allocation2 + $0x30] sm:$0xff] %vm286_vm12, %v269_v58  ;;  %289 = vst.msk [vmem:[#allocation2 + $0x20] sm:$0xff] %vm286_vm12, %v267_v59 }
  0x9f   :  { %556 = vrot.lane.b32.xlu1 %v541_v56, %s4445_s28  ;;  %554 = vrot.lane.b32.xlu0 %v539_v57, %s4445_s28 }
  0xa1   :  { %v318_v62 = vpop.permute.xlu1 %317  ;;  %v316_v63 = vpop.permute.xlu0 %315 }
  0xa2   :  { %v752_v0 = vld [vmem:[#allocation2 + $0x10] sm:$0xff]  ;;  %339 = vst.msk [vmem:[#allocation2 + $0x30] sm:$0xff] %vm335_vm13, %v318_v62  ;;  %338 = vst.msk [vmem:[#allocation2 + $0x20] sm:$0xff] %vm335_vm13, %v316_v63 }
  0xa3   :  { %4076 = vmatmul.mubr.msk.f32.vlgmr.msra.gmra.mrb[0].mxu0 %vm767_vm5, %v752_v0  ;;  %1049 = vst [vmem:[#allocation2 + $0x10] sm:$0xff] %v4451_v28  ;;  %588 = vrot.lane.b32.xlu1 %v4883_v24, %s4447_s30  ;;  %v624_v24 = vsel %vm295_vm2, %v621_v54, %v623_v38 }
  0xa4   :  { %586 = vrot.lane.b32.xlu0 %v4872_v19, %s4447_s30  ;;  %v496_v19 = vsel %vm6662_vm1, %v493_v45, %v495_v21  ;;  %v717_v45 = vrot.slane %v4969_v1, 3  ;;  %vm443_vm1 = vcmask 53296  }
  0xa5   :  { %v368_v9 = vpop.permute.xlu1 %367  ;;  %v366_v10 = vpop.permute.xlu0 %365 }
  0xa6   :  { %389 = vst.msk [vmem:[#allocation2 + $0x30] sm:$0xff] %vm385_vm14, %v368_v9  ;;  %388 = vst.msk [vmem:[#allocation2 + $0x20] sm:$0xff] %vm385_vm14, %v366_v10  ;;  %v718_v48 = vsel %vm395_vm4, %v715_v15, %v717_v45 }
  0xa7   :  { %635 = vrot.lane.b32.xlu1 %v622_v5, %s4448_s5 }
  0xa8   :  { %633 = vrot.lane.b32.xlu0 %v620_v6, %s4448_s5 }
  0xa9   :  { %v418_v16 = vpop.permute.xlu1 %417  ;;  %v416_v17 = vpop.permute.xlu0 %415 }
  0xaa   :  { %439 = vst.msk [vmem:[#allocation2 + $0x30] sm:$0xff] %vm435_vm15, %v418_v16  ;;  %438 = vst.msk [vmem:[#allocation2 + $0x20] sm:$0xff] %vm435_vm15, %v416_v17 }
  0xab   :  { %682 = vrot.lane.b32.xlu1 %v669_v12, %s4449_s1 }
  0xac   :  { %680 = vrot.lane.b32.xlu0 %v667_v13, %s4449_s1 }
  0xad   :  { %v189_v23 = vpop.permute.xlu1 %188  ;;  %v187_v25 = vpop.permute.xlu0 %186 }
  0xae   :  { %209 = vst.msk [vmem:[#allocation2 + $0x50] sm:$0xff] %vm204_vm10, %v189_v23  ;;  %208 = vst.msk [vmem:[#allocation2 + $0x40] sm:$0xff] %vm204_vm10, %v187_v25 }
  0xaf   :  { %729 = vrot.lane.b32.xlu1 %v716_v18, %s4450_s24 }
  0xb0   :  { %727 = vrot.lane.b32.xlu0 %v714_v20, %s4450_s24 }
  0xb1   :  { %v239_v30 = vpop.permute.xlu1 %238  ;;  %v237_v31 = vpop.permute.xlu0 %236  ;;  %v753_v32 = vld [vmem:[#allocation2 + $0x20] sm:$0xff]  ;;  %v754_v33 = vld [vmem:[#allocation2 + $0x30] sm:$0xff] }
  0xb2   :  { %259 = vst.msk [vmem:[#allocation2 + $0x50] sm:$0xff] %vm254_vm11, %v239_v30  ;;  %258 = vst.msk [vmem:[#allocation2 + $0x40] sm:$0xff] %vm254_vm11, %v237_v31  ;;  %4078 = vmatprep.mubr.msk.f32.mxu0 %vm767_vm5, %v753_v32 }
  0xb3   :  { %1051 = vst [vmem:[#allocation2 + $0x20] sm:$0xff] %v4451_v28  ;;  %1053 = vst [vmem:[#allocation2 + $0x30] sm:$0xff] %v4451_v28  ;;  %513 = vrot.lane.b32.xlu1 %v498_v26, %s4446_s29  ;;  %4079 = vmatmul.mubr.msk.f32.gmra.mrb[2].mxu0 %vm767_vm5, %v754_v33 }
  0xb4   :  { %511 = vrot.lane.b32.xlu0 %v496_v19, %s4446_s29  ;;  %s6675_s29 = sld [smem:[#allocation5_spill]] }
  0xb5   :  { %v273_v36 = vpop.permute.xlu1 %272  ;;  %v271_v37 = vpop.permute.xlu0 %270 }
  0xb6   :  { %292 = vst.msk [vmem:[#allocation2 + $0x50] sm:$0xff] %vm286_vm12, %v273_v36  ;;  %291 = vst.msk [vmem:[#allocation2 + $0x40] sm:$0xff] %vm286_vm12, %v271_v37 }
  0xb7   :  { %560 = vrot.lane.b32.xlu1 %v545_v34, %s4445_s28 }
  0xb8   :  { %558 = vrot.lane.b32.xlu0 %v543_v35, %s4445_s28  ;;  %s4454_s28 = smov 48  }
  0xb9   :  { %v322_v39 = vpop.permute.xlu1 %321  ;;  %v320_v40 = vpop.permute.xlu0 %319 }
  0xba   :  { %341 = vst.msk [vmem:[#allocation2 + $0x50] sm:$0xff] %vm335_vm13, %v322_v39  ;;  %340 = vst.msk [vmem:[#allocation2 + $0x40] sm:$0xff] %vm335_vm13, %v320_v40 }
  0xbb   :  { %592 = vrot.lane.b32.xlu1 %v4969_v1, %s4447_s30 }
  0xbc   :  { %590 = vrot.lane.b32.xlu0 %v4958_v60, %s4447_s30  ;;  %s6676_s30 = sld [smem:[#allocation6_spill]] }
  0xbd   :  { %v372_v42 = vpop.permute.xlu1 %371  ;;  %v370_v43 = vpop.permute.xlu0 %369 }
  0xbe   :  { %391 = vst.msk [vmem:[#allocation2 + $0x50] sm:$0xff] %vm385_vm14, %v372_v42  ;;  %390 = vst.msk [vmem:[#allocation2 + $0x40] sm:$0xff] %vm385_vm14, %v370_v43 }
  0xbf   :  { %639 = vrot.lane.b32.xlu1 %v623_v38, %s4448_s5 }
  0xc0   :  { %637 = vrot.lane.b32.xlu0 %v624_v24, %s4448_s5 }
  0xc1   :  { %v422_v46 = vpop.permute.xlu1 %421  ;;  %v420_v47 = vpop.permute.xlu0 %419 }
  0xc2   :  { %441 = vst.msk [vmem:[#allocation2 + $0x50] sm:$0xff] %vm435_vm15, %v422_v46  ;;  %440 = vst.msk [vmem:[#allocation2 + $0x40] sm:$0xff] %vm435_vm15, %v420_v47 }
  0xc3   :  { %686 = vrot.lane.b32.xlu1 %v670_v41, %s4449_s1 }
  0xc4   :  { %684 = vrot.lane.b32.xlu0 %v671_v44, %s4449_s1 }
  0xc5   :  { %v193_v49 = vpop.permute.xlu1 %192  ;;  %v191_v50 = vpop.permute.xlu0 %190 }
  0xc6   :  { %211 = vst.msk [vmem:[#allocation2 + $0x70] sm:$0xff] %vm204_vm10, %v193_v49  ;;  %210 = vst.msk [vmem:[#allocation2 + $0x60] sm:$0xff] %vm204_vm10, %v191_v50 }
  0xc7   :  { %733 = vrot.lane.b32.xlu1 %v717_v45, %s4450_s24 }
  0xc8   :  { %731 = vrot.lane.b32.xlu0 %v718_v48, %s4450_s24  ;;  %s6677_s24 = sld [smem:[#allocation7_spill]] }
  0xc9   :  { %v243_v51 = vpop.permute.xlu1 %242  ;;  %v241_v52 = vpop.permute.xlu0 %240  ;;  %v755_v53 = vld [vmem:[#allocation2 + $0x40] sm:$0xff]  ;;  %v756_v55 = vld [vmem:[#allocation2 + $0x50] sm:$0xff] }
  0xca   :  { %261 = vst.msk [vmem:[#allocation2 + $0x70] sm:$0xff] %vm254_vm11, %v243_v51  ;;  %260 = vst.msk [vmem:[#allocation2 + $0x60] sm:$0xff] %vm254_vm11, %v241_v52  ;;  %4081 = vmatprep.mubr.msk.f32.mxu0 %vm767_vm5, %v755_v53 }
  0xcb   :  { %1055 = vst [vmem:[#allocation2 + $0x40] sm:$0xff] %v4451_v28  ;;  %1057 = vst [vmem:[#allocation2 + $0x50] sm:$0xff] %v4451_v28  ;;  %4082 = vmatmul.mubr.msk.f32.gmra.mrb[4].mxu0 %vm767_vm5, %v756_v55 }
  0xcd   :  { %v277_v56 = vpop.permute.xlu1 %276  ;;  %v275_v57 = vpop.permute.xlu0 %274 }
  0xce   :  { %294 = vst.msk [vmem:[#allocation2 + $0x70] sm:$0xff] %vm286_vm12, %v277_v56  ;;  %293 = vst.msk [vmem:[#allocation2 + $0x60] sm:$0xff] %vm286_vm12, %v275_v57 }
  0xd1   :  { %v326_v58 = vpop.permute.xlu1 %325  ;;  %v324_v59 = vpop.permute.xlu0 %323 }
  0xd2   :  { %344 = vst.msk [vmem:[#allocation2 + $0x70] sm:$0x7f] %vm343_vm7, %v326_v58 }
  0xd3   :  { %342 = vst.msk [vmem:[#allocation2 + $0x60] sm:$0xff] %vm335_vm13, %v324_v59  ;;  %v1024_v59 = vld [vmem:[%s6675_s29] sm:$0xff] }
  0xd5   :  { %v376_v60 = vpop.permute.xlu1 %375  ;;  %v374_v61 = vpop.permute.xlu0 %373 }
  0xd6   :  { %394 = vst.msk [vmem:[#allocation2 + $0x70] sm:$0x3f] %vm393_vm6, %v376_v60  ;;  %v1025_v60 = vld [vmem:[%s6675_s29 + $0x8] sm:$0xff] }
  0xd7   :  { %392 = vst.msk [vmem:[#allocation2 + $0x60] sm:$0xff] %vm385_vm14, %v374_v61  ;;  %v4452_v61 = vmov 0.0|0.0  }
  0xd8   :  { %4303 = vmatprep.subr.bf16.mxu1 %v4452_v61 }
  0xd9   :  { %v426_v54 = vpop.permute.xlu1 %425  ;;  %v424_v62 = vpop.permute.xlu0 %423 }
  0xda   :  { %444 = vst.msk [vmem:[#allocation2 + $0x70] sm:$0x1f] %vm443_vm1, %v426_v54  ;;  %v4304_v54 = vpack.c.bf16 %v1025_v60, %v1024_v59 }
  0xdb   :  { %442 = vst.msk [vmem:[#allocation2 + $0x60] sm:$0xff] %vm435_vm15, %v424_v62  ;;  %v1026_v62 = vld [vmem:[%s6675_s29 + $0x10] sm:$0xff] }
  0xdc   :  { %4305 = vmatpush1.bf16.msra.mxu1 %v4304_v54 }
  0xdd   :  { %v502_v63 = vpop.permute.xlu1 %501  ;;  %v500_v0 = vpop.permute.xlu0 %499  ;;  %4306 = vmatprep.subr.bf16.mxu1 %v4452_v61 }
  0xde   :  { %524 = vst.msk [vmem:[#allocation2 + $0x90] sm:$0xff] %vm204_vm10, %v502_v63  ;;  %v1027_v63 = vld [vmem:[%s6675_s29 + $0x18] sm:$0xff] }
  0xdf   :  { %523 = vst.msk [vmem:[#allocation2 + $0x80] sm:$0xfc] %vm202_vm8, %v500_v0  ;;  %v4307_v0 = vpack.c.bf16 %v1027_v63, %v1026_v62  ;;  %vm6665_vm8 = vcmask 195584  }
  0xe1   :  { %v549_v1 = vpop.permute.xlu1 %548  ;;  %v547_v2 = vpop.permute.xlu0 %546  ;;  %v758_v4 = vld [vmem:[#allocation2 + $0x70] sm:$0xff]  ;;  %4308 = vmatpush1.bf16.msra.mxu1 %v4307_v0 }
  0xe2   :  { %v757_v3 = vld [vmem:[#allocation2 + $0x60] sm:$0xff]  ;;  %571 = vst.msk [vmem:[#allocation2 + $0x90] sm:$0xff] %vm254_vm11, %v549_v1  ;;  %1061 = vst [vmem:[#allocation2 + $0x70] sm:$0xff] %v4451_v28  ;;  %4309 = vmatprep.subr.bf16.mxu1 %v4452_v61 }
  0xe3   :  { %570 = vst.msk [vmem:[#allocation2 + $0x80] sm:$0xfe] %vm252_vm9, %v547_v2  ;;  %4084 = vmatprep.mubr.msk.f32.mxu0 %vm767_vm5, %v757_v3  ;;  %1059 = vst [vmem:[#allocation2 + $0x60] sm:$0xff] %v4451_v28  ;;  %v1028_v1 = vld [vmem:[%s6675_s29 + $0x20] sm:$0xff]  ;;  %v1029_v2 = vld [vmem:[%s6675_s29 + $0x28] sm:$0xff]  ;;  %vm6678_vm9 = vcmask 1041408  }
  0xe4   :  { %4085 = vmatmul.mubr.msk.f32.gmra.mrb[6].mxu0 %vm767_vm5, %v758_v4  ;;  %v4310_v3 = vpack.c.bf16 %v1029_v2, %v1028_v1  ;;  %v1030_v4 = vld [vmem:[%s6675_s29 + $0x30] sm:$0xff] }
  0xe5   :  { %v581_v5 = vpop.permute.xlu1 %580  ;;  %v579_v6 = vpop.permute.xlu0 %578 }
  0xe6   :  { %603 = vst.msk [vmem:[#allocation2 + $0x90] sm:$0xff] %vm286_vm12, %v581_v5  ;;  %602 = vst.msk [vmem:[#allocation2 + $0x80] sm:$0xff] %vm286_vm12, %v579_v6  ;;  %4311 = vmatpush1.bf16.msra.mxu1 %v4310_v3  ;;  %v1031_v5 = vld [vmem:[%s6675_s29 + $0x38] sm:$0xff] }
  0xe7   :  { %4312 = vmatprep.subr.bf16.mxu1 %v4452_v61  ;;  %v4313_v6 = vpack.c.bf16 %v1031_v5, %v1030_v4 }
  0xe9   :  { %v628_v7 = vpop.permute.xlu1 %627  ;;  %v626_v8 = vpop.permute.xlu0 %625 }
  0xea   :  { %650 = vst.msk [vmem:[#allocation2 + $0x90] sm:$0xff] %vm335_vm13, %v628_v7  ;;  %649 = vst.msk [vmem:[#allocation2 + $0x80] sm:$0xff] %vm335_vm13, %v626_v8  ;;  %4314 = vmatpush1.bf16.msra.mxu1 %v4313_v6  ;;  %v1032_v7 = vld [vmem:[%s6675_s29 + $0x40] sm:$0xff]  ;;  %v1033_v8 = vld [vmem:[%s6675_s29 + $0x48] sm:$0xff] }
  0xeb   :  { %4315 = vmatprep.subr.bf16.mxu1 %v4452_v61 }
  0xed   :  { %v504_v9 = vpop.permute.xlu1 %503  ;;  %v673_v10 = vpop.permute.xlu0 %672 }
  0xee   :  { %525 = vst.msk [vmem:[#allocation2 + $0xa0] sm:$0xff] %vm204_vm10, %v504_v9  ;;  %v4316_v9 = vpack.c.bf16 %v1033_v8, %v1032_v7 }
  0xef   :  { %696 = vst.msk [vmem:[#allocation2 + $0x80] sm:$0xff] %vm385_vm14, %v673_v10  ;;  %v1034_v10 = vld [vmem:[%s6675_s29 + $0x50] sm:$0xff] }
  0xf0   :  { %4317 = vmatpush1.bf16.msra.mxu1 %v4316_v9 }
  0xf1   :  { %v720_v11 = vpop.permute.xlu1 %719  ;;  %v675_v12 = vpop.permute.xlu0 %674  ;;  %4318 = vmatprep.subr.bf16.mxu1 %v4452_v61 }
  0xf2   :  { %743 = vst.msk [vmem:[#allocation2 + $0x80] sm:$0xff] %vm435_vm15, %v720_v11  ;;  %v1035_v11 = vld [vmem:[%s6675_s29 + $0x58] sm:$0xff] }
  0xf3   :  { %697 = vst.msk [vmem:[#allocation2 + $0x90] sm:$0xff] %vm385_vm14, %v675_v12  ;;  %v4319_v12 = vpack.c.bf16 %v1035_v11, %v1034_v10 }
  0xf5   :  { %v551_v13 = vpop.permute.xlu1 %550  ;;  %v506_v14 = vpop.permute.xlu0 %505  ;;  %4320 = vmatpush1.bf16.msra.mxu1 %v4319_v12 }
  0xf6   :  { %572 = vst.msk [vmem:[#allocation2 + $0xa0] sm:$0xff] %vm254_vm11, %v551_v13  ;;  %v1036_v13 = vld [vmem:[%s6675_s29 + $0x60] sm:$0xff]  ;;  %4321 = vmatprep.subr.bf16.mxu1 %v4452_v61 }
  0xf7   :  { %526 = vst.msk [vmem:[#allocation2 + $0xb0] sm:$0xff] %vm204_vm10, %v506_v14  ;;  %v1037_v14 = vld [vmem:[%s6675_s29 + $0x68] sm:$0xff] }
  0xf9   :  { %v553_v15 = vpop.permute.xlu1 %552  ;;  %v722_v16 = vpop.permute.xlu0 %721  ;;  %v759_v17 = vld [vmem:[#allocation2 + $0x80] sm:$0xff] }
  0xfa   :  { %573 = vst.msk [vmem:[#allocation2 + $0xb0] sm:$0xff] %vm254_vm11, %v553_v15  ;;  %4087 = vmatprep.mubr.msk.f32.mxu0 %vm767_vm5, %v759_v17  ;;  %1063 = vst [vmem:[#allocation2 + $0x80] sm:$0xff] %v4451_v28  ;;  %v5208_v15 = vld [vmem:[%s6676_s30] ss:$0 sm:$0xff] }
  0xfb   :  { %744 = vst.msk [vmem:[#allocation2 + $0x90] sm:$0xff] %vm435_vm15, %v722_v16  ;;  %v4322_v16 = vpack.c.bf16 %v1037_v14, %v1036_v13  ;;  %v5214_v17 = vld [vmem:[%s6677_s24] ss:$0 sm:$0xff] }
  0xfd   :  { %v585_v18 = vpop.permute.xlu1 %584  ;;  %v583_v20 = vpop.permute.xlu0 %582  ;;  %4323 = vmatpush1.bf16.msra.mxu1 %v4322_v16 }
  0xfe   :  { %605 = vst.msk [vmem:[#allocation2 + $0xb0] sm:$0xff] %vm286_vm12, %v585_v18  ;;  %604 = vst.msk [vmem:[#allocation2 + $0xa0] sm:$0xff] %vm286_vm12, %v583_v20  ;;  %4324 = vmatprep.subr.bf16.mxu1 %v4452_v61 }
 0x101   :  { %v632_v21 = vpop.permute.xlu1 %631  ;;  %v630_v22 = vpop.permute.xlu0 %629 }
 0x102   :  { %v760_v23 = vld [vmem:[#allocation2 + $0x90] sm:$0xff]  ;;  %652 = vst.msk [vmem:[#allocation2 + $0xb0] sm:$0xff] %vm335_vm13, %v632_v21  ;;  %651 = vst.msk [vmem:[#allocation2 + $0xa0] sm:$0xff] %vm335_vm13, %v630_v22 }
 0x103   :  { %4088 = vmatmul.mubr.msk.f32.gmra.mrb[8].mxu0 %vm767_vm5, %v760_v23  ;;  %1065 = vst [vmem:[#allocation2 + $0x90] sm:$0xff] %v4451_v28  ;;  %v1038_v23 = vld [vmem:[%s6675_s29 + $0x70] sm:$0xff] }
 0x105   :  { %v679_v25 = vpop.permute.xlu1 %678  ;;  %v677_v26 = vpop.permute.xlu0 %676 }
 0x106   :  { %699 = vst.msk [vmem:[#allocation2 + $0xb0] sm:$0xff] %vm385_vm14, %v679_v25  ;;  %698 = vst.msk [vmem:[#allocation2 + $0xa0] sm:$0xff] %vm385_vm14, %v677_v26  ;;  %v1039_v25 = vld [vmem:[%s6675_s29 + $0x78] sm:$0xff] }
 0x109   :  { %v726_v19 = vpop.permute.xlu1 %725  ;;  %v724_v27 = vpop.permute.xlu0 %723 }
 0x10a   :  { %746 = vst.msk [vmem:[#allocation2 + $0xb0] sm:$0xff] %vm435_vm15, %v726_v19  ;;  %745 = vst.msk [vmem:[#allocation2 + $0xa0] sm:$0xff] %vm435_vm15, %v724_v27  ;;  %v4325_v19 = vpack.c.bf16 %v1039_v25, %v1038_v23 }
 0x10c   :  { %4326 = vmatpush1.bf16.msra.mxu1 %v4325_v19 }
 0x10d   :  { %v510_v29 = vpop.permute.xlu1 %509  ;;  %v508_v30 = vpop.permute.xlu0 %507  ;;  %4327 = vmatprep.subr.bf16.mxu1 %v4452_v61 }
 0x10e   :  { %528 = vst.msk [vmem:[#allocation2 + $0xd0] sm:$0xff] %vm204_vm10, %v510_v29  ;;  %527 = vst.msk [vmem:[#allocation2 + $0xc0] sm:$0xff] %vm204_vm10, %v508_v30 }
 0x111   :  { %v557_v31 = vpop.permute.xlu1 %556  ;;  %v555_v32 = vpop.permute.xlu0 %554  ;;  %v761_v33 = vld [vmem:[#allocation2 + $0xa0] sm:$0xff]  ;;  %v762_v34 = vld [vmem:[#allocation2 + $0xb0] sm:$0xff] }
 0x112   :  { %575 = vst.msk [vmem:[#allocation2 + $0xd0] sm:$0xff] %vm254_vm11, %v557_v31  ;;  %574 = vst.msk [vmem:[#allocation2 + $0xc0] sm:$0xff] %vm254_vm11, %v555_v32  ;;  %4090 = vmatprep.mubr.msk.f32.mxu0 %vm767_vm5, %v761_v33  ;;  %v1040_v31 = vld [vmem:[%s6675_s29 + $0x80] sm:$0xff]  ;;  %v1041_v32 = vld [vmem:[%s6675_s29 + $0x88] sm:$0xff] }
 0x113   :  { %1067 = vst [vmem:[#allocation2 + $0xa0] sm:$0xff] %v4451_v28  ;;  %1069 = vst [vmem:[#allocation2 + $0xb0] sm:$0xff] %v4451_v28  ;;  %4091 = vmatmul.mubr.msk.f32.gmra.mrb[10].mxu0 %vm767_vm5, %v762_v34 }
 0x115   :  { %v589_v35 = vpop.permute.xlu1 %588 }
 0x116   :  { %v587_v36 = vpop.permute.xlu0 %586  ;;  %607 = vst.msk [vmem:[#allocation2 + $0xd0] sm:$0xff] %vm286_vm12, %v589_v35 }
 0x117   :  { %606 = vst.msk [vmem:[#allocation2 + $0xc0] sm:$0xff] %vm286_vm12, %v587_v36 }
 0x119   :  { %v636_v37 = vpop.permute.xlu1 %635 }
 0x11a   :  { %v634_v38 = vpop.permute.xlu0 %633  ;;  %654 = vst.msk [vmem:[#allocation2 + $0xd0] sm:$0xff] %vm335_vm13, %v636_v37 }
 0x11b   :  { %653 = vst.msk [vmem:[#allocation2 + $0xc0] sm:$0xff] %vm335_vm13, %v634_v38 }
 0x11d   :  { %v683_v39 = vpop.permute.xlu1 %682 }
 0x11e   :  { %v681_v40 = vpop.permute.xlu0 %680  ;;  %701 = vst.msk [vmem:[#allocation2 + $0xd0] sm:$0xff] %vm385_vm14, %v683_v39 }
 0x11f   :  { %700 = vst.msk [vmem:[#allocation2 + $0xc0] sm:$0xff] %vm385_vm14, %v681_v40 }
 0x121   :  { %v730_v24 = vpop.permute.xlu1 %729 }
 0x122   :  { %v728_v41 = vpop.permute.xlu0 %727  ;;  %748 = vst.msk [vmem:[#allocation2 + $0xd0] sm:$0xff] %vm435_vm15, %v730_v24 }
 0x123   :  { %747 = vst.msk [vmem:[#allocation2 + $0xc0] sm:$0xff] %vm435_vm15, %v728_v41 }
 0x125   :  { %v514_v42 = vpop.permute.xlu1 %513 }
 0x126   :  { %v512_v43 = vpop.permute.xlu0 %511  ;;  %530 = vst.msk [vmem:[#allocation2 + $0xf0] sm:$0xff] %vm204_vm10, %v514_v42 }
 0x127   :  { %529 = vst.msk [vmem:[#allocation2 + $0xe0] sm:$0xff] %vm204_vm10, %v512_v43  ;;  %v4328_v43 = vpack.c.bf16 %v1041_v32, %v1040_v31  ;;  %vm6679_vm10 = vcmask 1042432  }
 0x129   :  { %v561_v44 = vpop.permute.xlu1 %560  ;;  %v764_v47 = vld [vmem:[#allocation2 + $0xd0] sm:$0xff]  ;;  %4329 = vmatpush1.bf16.msra.mxu1 %v4328_v43 }
 0x12a   :  { %v559_v45 = vpop.permute.xlu0 %558  ;;  %v763_v46 = vld [vmem:[#allocation2 + $0xc0] sm:$0xff]  ;;  %577 = vst.msk [vmem:[#allocation2 + $0xf0] sm:$0xff] %vm254_vm11, %v561_v44  ;;  %1073 = vst [vmem:[#allocation2 + $0xd0] sm:$0xff] %v4451_v28  ;;  %4330 = vmatprep.subr.bf16.mxu1 %v4452_v61 }
 0x12b   :  { %576 = vst.msk [vmem:[#allocation2 + $0xe0] sm:$0xff] %vm254_vm11, %v559_v45  ;;  %4093 = vmatprep.mubr.msk.f32.mxu0 %vm767_vm5, %v763_v46  ;;  %1071 = vst [vmem:[#allocation2 + $0xc0] sm:$0xff] %v4451_v28 }
 0x12c   :  { %4094 = vmatmul.mubr.msk.f32.gmra.mrb[12].mxu0 %vm767_vm5, %v764_v47  ;;  %vm6680_vm11 = vmmov %vm6678_vm9 }
 0x12d   :  { %v593_v48 = vpop.permute.xlu1 %592 }
 0x12e   :  { %v591_v49 = vpop.permute.xlu0 %590  ;;  %609 = vst.msk [vmem:[#allocation2 + $0xf0] sm:$0xff] %vm286_vm12, %v593_v48  ;;  %v1042_v48 = vld [vmem:[%s6675_s29 + $0x90] sm:$0xff] }
 0x12f   :  { %608 = vst.msk [vmem:[#allocation2 + $0xe0] sm:$0xff] %vm286_vm12, %v591_v49  ;;  %v1043_v49 = vld [vmem:[%s6675_s29 + $0x98] sm:$0xff]  ;;  %vm6681_vm12 = vmmov %vm6678_vm9 }
 0x131   :  { %v640_v50 = vpop.permute.xlu1 %639 }
 0x132   :  { %v638_v51 = vpop.permute.xlu0 %637  ;;  %656 = vst.msk [vmem:[#allocation2 + $0xf0] sm:$0x7f] %vm343_vm7, %v640_v50  ;;  %vm6686_vm7 = vmmov %vm6679_vm10 }
 0x133   :  { %655 = vst.msk [vmem:[#allocation2 + $0xe0] sm:$0xff] %vm335_vm13, %v638_v51  ;;  %vm6682_vm13 = vmmov %vm6679_vm10 }
 0x135   :  { %v687_v52 = vpop.permute.xlu1 %686 }
 0x136   :  { %v685_v53 = vpop.permute.xlu0 %684  ;;  %703 = vst.msk [vmem:[#allocation2 + $0xf0] sm:$0x3f] %vm393_vm6, %v687_v52  ;;  %vm1110_vm6 = vcmask 195587  }
 0x137   :  { %702 = vst.msk [vmem:[#allocation2 + $0xe0] sm:$0xff] %vm385_vm14, %v685_v53  ;;  %v4331_v53 = vpack.c.bf16 %v1043_v49, %v1042_v48  ;;  %vm6683_vm14 = vmmov %vm6679_vm10 }
 0x139   :  { %v734_v55 = vpop.permute.xlu1 %733  ;;  %4332 = vmatpush1.bf16.msra.mxu1 %v4331_v53 }
 0x13a   :  { %v732_v56 = vpop.permute.xlu0 %731  ;;  %750 = vst.msk [vmem:[#allocation2 + $0xf0] sm:$0x1f] %vm443_vm1, %v734_v55  ;;  %vm88_vm1 = vcmask 326656   ;;  %1842 = vmatprep.subr.mxu1 %v4451_v28  ;;  %v1044_v55 = vld [vmem:[%s6675_s29 + $0xa0] sm:$0xff] }
 0x13b   :  { %749 = vst.msk [vmem:[#allocation2 + $0xe0] sm:$0xff] %vm435_vm15, %v732_v56  ;;  %vm6684_vm15 = vmmov %vm6678_vm9 }
 0x13c   :  { %89 = vst.msk [vmem:[#allocation2 + $0x8] sm:$0xff] %vm88_vm1, %v4451_v28  ;;  %91 = vst.msk [vmem:[#allocation2 + $0x18] sm:$0xff] %vm88_vm1, %v4451_v28 }
 0x13d   :  { %93 = vst.msk [vmem:[#allocation2 + $0x28] sm:$0xff] %vm88_vm1, %v4451_v28  ;;  %95 = vst.msk [vmem:[#allocation2 + $0x38] sm:$0xff] %vm88_vm1, %v4451_v28  ;;  %1843 = vmatpush1.msra.mxu1 %v1044_v55 }
 0x13e   :  { %97 = vst.msk [vmem:[#allocation2 + $0x48] sm:$0xff] %vm88_vm1, %v4451_v28  ;;  %99 = vst.msk [vmem:[#allocation2 + $0x58] sm:$0xff] %vm88_vm1, %v4451_v28 }
 0x13f   :  { %101 = vst.msk [vmem:[#allocation2 + $0x68] sm:$0xff] %vm88_vm1, %v4451_v28  ;;  %103 = vst.msk [vmem:[#allocation2 + $0x78] sm:$0xff] %vm88_vm1, %v4451_v28 }
 0x140   :  { %105 = vst.msk [vmem:[#allocation2 + $0x88] sm:$0xff] %vm88_vm1, %v4451_v28  ;;  %107 = vst.msk [vmem:[#allocation2 + $0x98] sm:$0xff] %vm88_vm1, %v4451_v28 }
 0x141   :  { %v766_v58 = vld [vmem:[#allocation2 + $0xf0] sm:$0xff]  ;;  %109 = vst.msk [vmem:[#allocation2 + $0xa8] sm:$0xff] %vm88_vm1, %v4451_v28  ;;  %111 = vst.msk [vmem:[#allocation2 + $0xb8] sm:$0xff] %vm88_vm1, %v4451_v28 }
 0x142   :  { %v765_v57 = vld [vmem:[#allocation2 + $0xe0] sm:$0xff]  ;;  %1077 = vst [vmem:[#allocation2 + $0xf0] sm:$0xff] %v4451_v28  ;;  %113 = vst.msk [vmem:[#allocation2 + $0xc8] sm:$0xff] %vm88_vm1, %v4451_v28 }
 0x143   :  { %4096 = vmatprep.mubr.msk.f32.mxu0 %vm767_vm5, %v765_v57  ;;  %1075 = vst [vmem:[#allocation2 + $0xe0] sm:$0xff] %v4451_v28  ;;  %115 = vst.msk [vmem:[#allocation2 + $0xd8] sm:$0xff] %vm88_vm1, %v4451_v28 }
 0x144   :  { %4097 = vmatmul.mubr.msk.f32.gmra.mrb[14].mxu0 %vm767_vm5, %v766_v58  ;;  %117 = vst.msk [vmem:[#allocation2 + $0xe8] sm:$0xff] %vm88_vm1, %v4451_v28  ;;  %119 = vst.msk [vmem:[#allocation2 + $0xf8] sm:$0xff] %vm88_vm1, %v4451_v28 }
 0x145   :  { %1048 = vst.msk [vmem:[#allocation2 + $0x8] sm:$0xff] %vm88_vm1, %v4451_v28  ;;  %1050 = vst.msk [vmem:[#allocation2 + $0x18] sm:$0xff] %vm88_vm1, %v4451_v28 }
 0x146   :  { %1052 = vst.msk [vmem:[#allocation2 + $0x28] sm:$0xff] %vm88_vm1, %v4451_v28  ;;  %1054 = vst.msk [vmem:[#allocation2 + $0x38] sm:$0xff] %vm88_vm1, %v4451_v28 }
 0x147   :  { %1056 = vst.msk [vmem:[#allocation2 + $0x48] sm:$0xff] %vm88_vm1, %v4451_v28  ;;  %1058 = vst.msk [vmem:[#allocation2 + $0x58] sm:$0xff] %vm88_vm1, %v4451_v28 }
 0x148   :  { %1060 = vst.msk [vmem:[#allocation2 + $0x68] sm:$0xff] %vm88_vm1, %v4451_v28  ;;  %1062 = vst.msk [vmem:[#allocation2 + $0x78] sm:$0xff] %vm88_vm1, %v4451_v28 }
 0x149   :  { %1064 = vst.msk [vmem:[#allocation2 + $0x88] sm:$0xff] %vm88_vm1, %v4451_v28  ;;  %1066 = vst.msk [vmem:[#allocation2 + $0x98] sm:$0xff] %vm88_vm1, %v4451_v28 }
 0x14a   :  { %1068 = vst.msk [vmem:[#allocation2 + $0xa8] sm:$0xff] %vm88_vm1, %v4451_v28  ;;  %1070 = vst.msk [vmem:[#allocation2 + $0xb8] sm:$0xff] %vm88_vm1, %v4451_v28 }
 0x14b   :  { %1072 = vst.msk [vmem:[#allocation2 + $0xc8] sm:$0xff] %vm88_vm1, %v4451_v28  ;;  %1074 = vst.msk [vmem:[#allocation2 + $0xd8] sm:$0xff] %vm88_vm1, %v4451_v28 }
 0x14c   :  { %1076 = vst.msk [vmem:[#allocation2 + $0xe8] sm:$0xff] %vm88_vm1, %v4451_v28  ;;  %1078 = vst.msk [vmem:[#allocation2 + $0xf8] sm:$0xff] %vm88_vm1, %v4451_v28 }
 0x14d   :  { %vm6685_vm5 = vmmov %vm6678_vm9 }
 0x176   :  { %v4077_v18 = vpop.f32.mrb[0].mxu0 }
 0x177   :  { %v971_v20 = vmul.f32 %v4077_v18, %v5208_v15  ;;  %v885_v21 = vpop.f32.mrb[1].mxu0 }
 0x178   :  { %v970_v22 = vmul.f32 %v5208_v15, %v885_v21 }
 0x179   :  { %v993_v26 = vadd.f32 %v5214_v17, %v971_v20 }
 0x17a   :  { %v992_v27 = vadd.f32 %v5214_v17, %v970_v22 }
 0x17b   :  { %v5291_v29 = vmax.f32 %v993_v26, 0.0 }
 0x17c   :  { %v1008_v30 = vmax.f32 %v992_v27, 0.0 }
 0x17d   :  { %1220 = vrot.lane.b32.xlu0 %v5291_v29, %s4453_s26  ;;  %v1301_v33 = vrot.slane %v5291_v29, 2  ;;  %v1360_v34 = vrot.slane %v5291_v29, 3  ;;  %v1252_v35 = vrot.slane %v5291_v29, 1  ;;  %v1170_v36 = vrot.slane %v5291_v29, 7 }
 0x17e   :  { %v1169_v37 = vrot.slane %v1008_v30, 7  ;;  %v1300_v38 = vrot.slane %v1008_v30, 2  ;;  %v1120_v39 = vrot.slane %v1008_v30, 6  ;;  %v1359_v40 = vrot.slane %v1008_v30, 3 }
 0x17f   :  { %v1251_v24 = vrot.slane %v1008_v30, 1  ;;  %v1121_v41 = vrot.slane %v5291_v29, 6  ;;  %v1087_v42 = vrot.slane %v1008_v30, 5  ;;  %v1088_v47 = vrot.slane %v5291_v29, 5 }
 0x180   :  { %1184 = vrot.lane.b32.xlu1 %v1169_v37, %s4454_s28  ;;  %v1302_v44 = vsel %vm345_vm3, %v1300_v38, %v1301_v33  ;;  %v1361_v45 = vsel %vm395_vm4, %v1359_v40, %v1360_v34  ;;  %v1171_v46 = vsel %vm6666_vm0, %v1169_v37, %v1170_v36 }
 0x181   :  { %1218 = vrot.lane.b32.xlu0 %v1008_v30, %s4453_s26  ;;  %v1253_v50 = vsel %vm295_vm2, %v1251_v24, %v1252_v35  ;;  %v1122_v51 = vsel %vm6678_vm9, %v1120_v39, %v1121_v41  ;;  %1111 = vst.msk [vmem:[#allocation2] sm:$0xf8] %vm1110_vm6, %v1087_v42  ;;  %v1089_v52 = vsel %vm6679_vm10, %v1087_v42, %v1088_v47  ;;  %vm6687_vm9 = vmmov %vm6686_vm7 }
 0x182   :  { %1113 = vst.msk [vmem:[#allocation2 + $0x10] sm:$0xff] %vm6665_vm8, %v1089_v52  ;;  %vm6688_vm10 = vmmov %vm6685_vm5 }
 0x184   :  { %1315 = vrot.lane.b32.xlu1 %v1302_v44, %s4455_s2 }
 0x185   :  { %1135 = vrot.lane.b32.xlu0 %v1120_v39, %s4456_s0 }
 0x186   :  { %v4080_v56 = vpop.f32.mrb[2].mxu0 }
 0x187   :  { %v973_v57 = vmul.f32 %v4080_v56, %v5208_v15  ;;  %v895_v58 = vpop.f32.mrb[3].mxu0 }
 0x188   :  { %1374 = vrot.lane.b32.xlu1 %v1361_v45, %s4457_s23  ;;  %v972_v59 = vmul.f32 %v5208_v15, %v895_v58 }
 0x189   :  { %1266 = vrot.lane.b32.xlu0 %v1253_v50, %s4458_s4  ;;  %v995_v60 = vadd.f32 %v5214_v17, %v973_v57 }
 0x18a   :  { %v994_v54 = vadd.f32 %v5214_v17, %v972_v59 }
 0x18b   :  { %v5346_v62 = vmax.f32 %v995_v60, 0.0 }
 0x18c   :  { %1186 = vrot.lane.b32.xlu1 %v1171_v46, %s4454_s28  ;;  %v1010_v63 = vmax.f32 %v994_v54, 0.0 }
 0x18d   :  { %1137 = vrot.lane.b32.xlu0 %v1122_v51, %s4456_s0  ;;  %v1305_v0 = vrot.slane %v5346_v62, 2  ;;  %v1256_v1 = vrot.slane %v5346_v62, 1  ;;  %v1364_v2 = vrot.slane %v5346_v62, 3  ;;  %v1125_v3 = vrot.slane %v5346_v62, 6 }
 0x18e   :  { %v1303_v4 = vrot.slane %v1010_v63, 2  ;;  %v1362_v5 = vrot.slane %v1010_v63, 3  ;;  %v1254_v6 = vrot.slane %v1010_v63, 1  ;;  %v1172_v7 = vrot.slane %v1010_v63, 7 }
 0x18f   :  { %v1123_v8 = vrot.slane %v1010_v63, 6  ;;  %v1174_v9 = vrot.slane %v5346_v62, 7  ;;  %v1090_v10 = vrot.slane %v1010_v63, 5  ;;  %v1092_v11 = vrot.slane %v5346_v62, 5 }
 0x190   :  { %v1304_v12 = vsel %vm345_vm3, %v1301_v33, %v1303_v4  ;;  %v1363_v13 = vsel %vm395_vm4, %v1360_v34, %v1362_v5  ;;  %v1255_v14 = vsel %vm295_vm2, %v1252_v35, %v1254_v6  ;;  %v1173_v16 = vsel %vm6666_vm0, %v1170_v36, %v1172_v7 }
 0x191   :  { %1224 = vrot.lane.b32.xlu0 %v5346_v62, %s4453_s26  ;;  %1317 = vrot.lane.b32.xlu1 %v1304_v12, %s4455_s2  ;;  %v1124_v18 = vsel %vm6680_vm11, %v1121_v41, %v1123_v8  ;;  %v1306_v20 = vsel %vm345_vm3, %v1303_v4, %v1305_v0  ;;  %v1257_v21 = vsel %vm295_vm2, %v1254_v6, %v1256_v1  ;;  %vm6689_vm11 = vmmov %vm6685_vm5 }
 0x192   :  { %v1365_v22 = vsel %vm395_vm4, %v1362_v5, %v1364_v2  ;;  %v1126_v23 = vsel %vm6681_vm12, %v1123_v8, %v1125_v3  ;;  %v1175_v25 = vsel %vm6666_vm0, %v1172_v7, %v1174_v9  ;;  %v1091_v26 = vsel %vm6682_vm13, %v1088_v47, %v1090_v10  ;;  %vm6690_vm12 = vmmov %vm6686_vm7 }
 0x193   :  { %v1093_v19 = vsel %vm6683_vm14, %v1090_v10, %v1092_v11  ;;  %1114 = vst.msk [vmem:[#allocation2 + $0x20] sm:$0xff] %vm6665_vm8, %v1091_v26  ;;  %vm6691_vm13 = vmmov %vm6686_vm7 }
 0x194   :  { %1115 = vst.msk [vmem:[#allocation2 + $0x30] sm:$0xff] %vm6665_vm8, %v1093_v19  ;;  %vm6692_vm14 = vmmov %vm6685_vm5 }
 0x195   :  { %1222 = vrot.lane.b32.xlu0 %v1010_v63, %s4453_s26  ;;  %1376 = vrot.lane.b32.xlu1 %v1363_v13, %s4457_s23 }
 0x199   :  { %1268 = vrot.lane.b32.xlu0 %v1255_v14, %s4458_s4  ;;  %1188 = vrot.lane.b32.xlu1 %v1173_v16, %s4454_s28 }
 0x19d   :  { %1139 = vrot.lane.b32.xlu0 %v1124_v18, %s4456_s0  ;;  %1319 = vrot.lane.b32.xlu1 %v1306_v20, %s4455_s2 }
 0x19e   :  { %v4083_v27 = vpop.f32.mrb[4].mxu0 }
 0x19f   :  { %v975_v29 = vmul.f32 %v4083_v27, %v5208_v15  ;;  %v905_v30 = vpop.f32.mrb[5].mxu0 }
 0x1a0   :  { %v974_v31 = vmul.f32 %v5208_v15, %v905_v30 }
 0x1a1   :  { %1270 = vrot.lane.b32.xlu0 %v1257_v21, %s4458_s4  ;;  %v997_v32 = vadd.f32 %v5214_v17, %v975_v29  ;;  %1378 = vrot.lane.b32.xlu1 %v1365_v22, %s4457_s23 }
 0x1a2   :  { %v996_v33 = vadd.f32 %v5214_v17, %v974_v31 }
 0x1a3   :  { %v5392_v34 = vmax.f32 %v997_v32, 0.0 }
 0x1a4   :  { %v1012_v35 = vmax.f32 %v996_v33, 0.0 }
 0x1a5   :  { %1141 = vrot.lane.b32.xlu0 %v1126_v23, %s4456_s0  ;;  %v1309_v36 = vrot.slane %v5392_v34, 2  ;;  %v1260_v37 = vrot.slane %v5392_v34, 1  ;;  %v1368_v38 = vrot.slane %v5392_v34, 3  ;;  %v1129_v39 = vrot.slane %v5392_v34, 6  ;;  %1190 = vrot.lane.b32.xlu1 %v1175_v25, %s4454_s28 }
 0x1a6   :  { %v1307_v40 = vrot.slane %v1012_v35, 2  ;;  %v1366_v24 = vrot.slane %v1012_v35, 3  ;;  %v1258_v41 = vrot.slane %v1012_v35, 1  ;;  %v1176_v42 = vrot.slane %v1012_v35, 7 }
 0x1a7   :  { %v1127_v43 = vrot.slane %v1012_v35, 6  ;;  %v1178_v44 = vrot.slane %v5392_v34, 7  ;;  %v1094_v45 = vrot.slane %v1012_v35, 5  ;;  %v1096_v46 = vrot.slane %v5392_v34, 5 }
 0x1a8   :  { %v1308_v47 = vsel %vm345_vm3, %v1305_v0, %v1307_v40  ;;  %v1367_v48 = vsel %vm395_vm4, %v1364_v2, %v1366_v24  ;;  %v1259_v49 = vsel %vm295_vm2, %v1256_v1, %v1258_v41  ;;  %v1177_v50 = vsel %vm6666_vm0, %v1174_v9, %v1176_v42 }
 0x1a9   :  { %1228 = vrot.lane.b32.xlu0 %v5392_v34, %s4453_s26  ;;  %v1128_v51 = vsel %vm6684_vm15, %v1125_v3, %v1127_v43  ;;  %v1310_v52 = vsel %vm345_vm3, %v1307_v40, %v1309_v36  ;;  %v1261_v53 = vsel %vm295_vm2, %v1258_v41, %v1260_v37  ;;  %v1369_v55 = vsel %vm395_vm4, %v1366_v24, %v1368_v38  ;;  %vm6693_vm15 = vmmov %vm6686_vm7 }
 0x1aa   :  { %1321 = vrot.lane.b32.xlu1 %v1308_v47, %s4455_s2  ;;  %v1130_v56 = vsel %vm6685_vm5, %v1127_v43, %v1129_v39  ;;  %v1179_v57 = vsel %vm6666_vm0, %v1176_v42, %v1178_v44  ;;  %v1095_v58 = vsel %vm6686_vm7, %v1092_v11, %v1094_v45  ;;  %v1097_v59 = vsel %vm6687_vm9, %v1094_v45, %v1096_v46  ;;  %vm6695_vm9 = vmmov %vm6686_vm7 }
 0x1ab   :  { %1116 = vst.msk [vmem:[#allocation2 + $0x40] sm:$0xff] %vm6665_vm8, %v1095_v58  ;;  %1117 = vst.msk [vmem:[#allocation2 + $0x50] sm:$0xff] %vm6665_vm8, %v1097_v59 }
 0x1ad   :  { %1226 = vrot.lane.b32.xlu0 %v1012_v35, %s4453_s26 }
 0x1ae   :  { %1380 = vrot.lane.b32.xlu1 %v1367_v48, %s4457_s23 }
 0x1b1   :  { %1272 = vrot.lane.b32.xlu0 %v1259_v49, %s4458_s4 }
 0x1b2   :  { %1192 = vrot.lane.b32.xlu1 %v1177_v50, %s4454_s28 }
 0x1b5   :  { %1143 = vrot.lane.b32.xlu0 %v1128_v51, %s4456_s0 }
 0x1b6   :  { %1323 = vrot.lane.b32.xlu1 %v1310_v52, %s4455_s2 }
 0x1b7   :  { %v4086_v60 = vpop.f32.mrb[6].mxu0 }
 0x1b8   :  { %v977_v54 = vmul.f32 %v4086_v60, %v5208_v15  ;;  %v915_v62 = vpop.f32.mrb[7].mxu0 }
 0x1b9   :  { %v976_v63 = vmul.f32 %v5208_v15, %v915_v62  ;;  %1274 = vrot.lane.b32.xlu0 %v1261_v53, %s4458_s4 }
 0x1ba   :  { %v999_v0 = vadd.f32 %v5214_v17, %v977_v54  ;;  %1382 = vrot.lane.b32.xlu1 %v1369_v55, %s4457_s23 }
 0x1bb   :  { %v998_v1 = vadd.f32 %v5214_v17, %v976_v63 }
 0x1bc   :  { %v1015_v2 = vmax.f32 %v999_v0, 0.0 }
 0x1bd   :  { %v1014_v3 = vmax.f32 %v998_v1, 0.0  ;;  %1145 = vrot.lane.b32.xlu0 %v1130_v56, %s4456_s0 }
 0x1be   :  { %v1313_v4 = vrot.slane %v1015_v2, 2  ;;  %v1372_v5 = vrot.slane %v1015_v2, 3  ;;  %v1264_v6 = vrot.slane %v1015_v2, 1  ;;  %v1133_v7 = vrot.slane %v1015_v2, 6  ;;  %1194 = vrot.lane.b32.xlu1 %v1179_v57, %s4454_s28 }
 0x1bf   :  { %v1311_v8 = vrot.slane %v1014_v3, 2  ;;  %v1262_v9 = vrot.slane %v1014_v3, 1  ;;  %v1370_v10 = vrot.slane %v1014_v3, 3  ;;  %v1131_v11 = vrot.slane %v1014_v3, 6 }
 0x1c0   :  { %v1180_v12 = vrot.slane %v1014_v3, 7  ;;  %v1182_v13 = vrot.slane %v1015_v2, 7  ;;  %v1098_v14 = vrot.slane %v1014_v3, 5  ;;  %v1100_v16 = vrot.slane %v1015_v2, 5 }
 0x1c1   :  { %1232 = vrot.lane.b32.xlu0 %v1015_v2, %s4453_s26  ;;  %v1312_v18 = vsel %vm345_vm3, %v1309_v36, %v1311_v8  ;;  %v1263_v20 = vsel %vm295_vm2, %v1260_v37, %v1262_v9  ;;  %v1371_v21 = vsel %vm395_vm4, %v1368_v38, %v1370_v10  ;;  %v1132_v22 = vsel %vm6688_vm10, %v1129_v39, %v1131_v11 }
 0x1c2   :  { %v1181_v23 = vsel %vm6666_vm0, %v1178_v44, %v1180_v12  ;;  %v1265_v25 = vsel %vm295_vm2, %v1262_v9, %v1264_v6  ;;  %v1314_v26 = vsel %vm345_vm3, %v1311_v8, %v1313_v4  ;;  %v1134_v19 = vsel %vm6689_vm11, %v1131_v11, %v1133_v7  ;;  %1329 = vrot.lane.b32.xlu1 %v1313_v4, %s4455_s2 }
 0x1c3   :  { %v1373_v27 = vsel %vm395_vm4, %v1370_v10, %v1372_v5  ;;  %v1183_v29 = vsel %vm6666_vm0, %v1180_v12, %v1182_v13  ;;  %v1099_v30 = vsel %vm6690_vm12, %v1096_v46, %v1098_v14  ;;  %v1101_v31 = vsel %vm6691_vm13, %v1098_v14, %v1100_v16 }
 0x1c4   :  { %1118 = vst.msk [vmem:[#allocation2 + $0x60] sm:$0xff] %vm6665_vm8, %v1099_v30  ;;  %1119 = vst.msk [vmem:[#allocation2 + $0x70] sm:$0xff] %vm6665_vm8, %v1101_v31  ;;  %vm1341_vm10 = vcmask 130048   ;;  %vm6664_vm11 = vcmask 392386   ;;  %vm6663_vm12 = vcmask 589185   ;;  %vm1242_vm13 = vcmask 785984  }
 0x1c5   :  { %1230 = vrot.lane.b32.xlu0 %v1014_v3, %s4453_s26 }
 0x1c6   :  { %1388 = vrot.lane.b32.xlu1 %v1372_v5, %s4457_s23 }
 0x1c9   :  { %1280 = vrot.lane.b32.xlu0 %v1264_v6, %s4458_s4 }
 0x1ca   :  { %1325 = vrot.lane.b32.xlu1 %v1312_v18, %s4455_s2 }
 0x1cd   :  { %1276 = vrot.lane.b32.xlu0 %v1263_v20, %s4458_s4 }
 0x1ce   :  { %1384 = vrot.lane.b32.xlu1 %v1371_v21, %s4457_s23 }
 0x1d1   :  { %1147 = vrot.lane.b32.xlu0 %v1132_v22, %s4456_s0 }
 0x1d2   :  { %1196 = vrot.lane.b32.xlu1 %v1181_v23, %s4454_s28 }
 0x1d5   :  { %1278 = vrot.lane.b32.xlu0 %v1265_v25, %s4458_s4 }
 0x1d6   :  { %v4089_v32 = vpop.f32.mrb[8].mxu0  ;;  %1327 = vrot.lane.b32.xlu1 %v1314_v26, %s4455_s2 }
 0x1d7   :  { %v979_v33 = vmul.f32 %v4089_v32, %v5208_v15  ;;  %v925_v34 = vpop.f32.mrb[9].mxu0 }
 0x1d8   :  { %v978_v35 = vmul.f32 %v5208_v15, %v925_v34 }
 0x1d9   :  { %v1001_v36 = vadd.f32 %v5214_v17, %v979_v33  ;;  %1149 = vrot.lane.b32.xlu0 %v1134_v19, %s4456_s0 }
 0x1da   :  { %v1000_v37 = vadd.f32 %v5214_v17, %v978_v35  ;;  %1386 = vrot.lane.b32.xlu1 %v1373_v27, %s4457_s23 }
 0x1db   :  { %v5464_v38 = vmax.f32 %v1001_v36, 0.0 }
 0x1dc   :  { %v1016_v39 = vmax.f32 %v1000_v37, 0.0 }
 0x1dd   :  { %1543 = vrot.lane.b32.xlu0 %v5464_v38, %s4453_s26  ;;  %v1621_v40 = vrot.slane %v5464_v38, 2  ;;  %v1574_v24 = vrot.slane %v5464_v38, 1  ;;  %v1676_v41 = vrot.slane %v5464_v38, 3  ;;  %v1448_v42 = vrot.slane %v5464_v38, 6 }
 0x1de   :  { %v1494_v43 = vrot.slane %v1016_v39, 7  ;;  %v1447_v44 = vrot.slane %v1016_v39, 6  ;;  %v1620_v45 = vrot.slane %v1016_v39, 2  ;;  %v1573_v46 = vrot.slane %v1016_v39, 1  ;;  %1198 = vrot.lane.b32.xlu1 %v1183_v29, %s4454_s28 }
 0x1df   :  { %v1675_v47 = vrot.slane %v1016_v39, 3  ;;  %v1495_v48 = vrot.slane %v5464_v38, 7  ;;  %v1416_v49 = vrot.slane %v1016_v39, 5  ;;  %v1417_v50 = vrot.slane %v5464_v38, 5 }
 0x1e0   :  { %v1622_v51 = vsel %vm345_vm3, %v1620_v45, %v1621_v40  ;;  %v1575_v52 = vsel %vm295_vm2, %v1573_v46, %v1574_v24  ;;  %v1449_v53 = vsel %vm6692_vm14, %v1447_v44, %v1448_v42  ;;  %vm1398_vm14 = vcmask 326784  }
 0x1e1   :  { %1541 = vrot.lane.b32.xlu0 %v1016_v39, %s4453_s26  ;;  %v1677_v55 = vsel %vm395_vm4, %v1675_v47, %v1676_v41  ;;  %v1496_v56 = vsel %vm6666_vm0, %v1494_v43, %v1495_v48  ;;  %1439 = vst.msk [vmem:[#allocation2 + $0x80] sm:$0xf8] %vm1110_vm6, %v1416_v49  ;;  %v1418_v57 = vsel %vm6693_vm15, %v1416_v49, %v1417_v50  ;;  %vm6694_vm6 = vmmov %vm6685_vm5  ;;  %vm1290_vm15 = vcmask 982784  }
 0x1e2   :  { %1440 = vst.msk [vmem:[#allocation2 + $0x90] sm:$0xff] %vm6665_vm8, %v1418_v57  ;;  %1509 = vrot.lane.b32.xlu1 %v1494_v43, %s4454_s28 }
 0x1e5   :  { %1462 = vrot.lane.b32.xlu0 %v1447_v44, %s4456_s0 }
 0x1e6   :  { %1635 = vrot.lane.b32.xlu1 %v1622_v51, %s4455_s2  ;;  %v4092_v58 = vpop.f32.mrb[10].mxu0 }
 0x1e7   :  { %v981_v59 = vmul.f32 %v4092_v58, %v5208_v15  ;;  %v935_v60 = vpop.f32.mrb[11].mxu0 }
 0x1e8   :  { %v980_v54 = vmul.f32 %v5208_v15, %v935_v60 }
 0x1e9   :  { %1588 = vrot.lane.b32.xlu0 %v1575_v52, %s4458_s4  ;;  %v1003_v62 = vadd.f32 %v5214_v17, %v981_v59 }
 0x1ea   :  { %v1002_v63 = vadd.f32 %v5214_v17, %v980_v54  ;;  %1690 = vrot.lane.b32.xlu1 %v1677_v55, %s4457_s23 }
 0x1eb   :  { %v5494_v0 = vmax.f32 %v1003_v62, 0.0 }
 0x1ec   :  { %v1018_v1 = vmax.f32 %v1002_v63, 0.0 }
 0x1ed   :  { %1464 = vrot.lane.b32.xlu0 %v1449_v53, %s4456_s0  ;;  %v1625_v2 = vrot.slane %v5494_v0, 2  ;;  %v1578_v3 = vrot.slane %v5494_v0, 1  ;;  %v1680_v4 = vrot.slane %v5494_v0, 3  ;;  %v1452_v5 = vrot.slane %v5494_v0, 6 }
 0x1ee   :  { %1511 = vrot.lane.b32.xlu1 %v1496_v56, %s4454_s28  ;;  %v1623_v7 = vrot.slane %v1018_v1, 2  ;;  %v1678_v8 = vrot.slane %v1018_v1, 3  ;;  %v1576_v9 = vrot.slane %v1018_v1, 1  ;;  %v1497_v10 = vrot.slane %v1018_v1, 7 }
 0x1ef   :  { %v1221_v6 = vpop.permute.xlu0 %1220  ;;  %v1450_v11 = vrot.slane %v1018_v1, 6  ;;  %v1499_v12 = vrot.slane %v5494_v0, 7  ;;  %v1419_v13 = vrot.slane %v1018_v1, 5  ;;  %v1421_v14 = vrot.slane %v5494_v0, 5 }
 0x1f0   :  { %v1624_v16 = vsel %vm345_vm3, %v1621_v40, %v1623_v7  ;;  %v1679_v18 = vsel %vm395_vm4, %v1676_v41, %v1678_v8  ;;  %v1577_v20 = vsel %vm295_vm2, %v1574_v24, %v1576_v9  ;;  %v1498_v21 = vsel %vm6666_vm0, %v1495_v48, %v1497_v10 }
 0x1f1   :  { %1547 = vrot.lane.b32.xlu0 %v5494_v0, %s4453_s26  ;;  %v1451_v23 = vsel %vm6694_vm6, %v1448_v42, %v1450_v11  ;;  %v1626_v25 = vsel %vm345_vm3, %v1623_v7, %v1625_v2  ;;  %v1579_v26 = vsel %vm295_vm2, %v1576_v9, %v1578_v3  ;;  %v1681_v19 = vsel %vm395_vm4, %v1678_v8, %v1680_v4 }
 0x1f2   :  { %v1185_v22 = vpop.permute.xlu1 %1184  ;;  %1637 = vrot.lane.b32.xlu1 %v1624_v16, %s4455_s2  ;;  %v1453_v29 = vsel %vm6685_vm5, %v1450_v11, %v1452_v5  ;;  %v1500_v30 = vsel %vm6666_vm0, %v1497_v10, %v1499_v12  ;;  %v1420_v31 = vsel %vm6686_vm7, %v1417_v50, %v1419_v13  ;;  %v1422_v32 = vsel %vm6695_vm9, %v1419_v13, %v1421_v14 }
 0x1f3   :  { %v1219_v27 = vpop.permute.xlu0 %1218  ;;  %1441 = vst.msk [vmem:[#allocation2 + $0xa0] sm:$0xff] %vm6665_vm8, %v1420_v31  ;;  %1442 = vst.msk [vmem:[#allocation2 + $0xb0] sm:$0xff] %vm6665_vm8, %v1422_v32  ;;  %vm1339_vm6 = vcmask 1048512   ;;  %vm1161_vm5 = vcmask 392384   ;;  %vm1210_vm7 = vcmask 589184   ;;  %vm6696_vm9 = vcmask 1041408  }
 0x1f5   :  { %1545 = vrot.lane.b32.xlu0 %v1018_v1, %s4453_s26 }
 0x1f6   :  { %v1316_v33 = vpop.permute.xlu1 %1315  ;;  %1692 = vrot.lane.b32.xlu1 %v1679_v18, %s4457_s23 }
 0x1f7   :  { %1342 = vst.msk [vmem:[#allocation2 + $0x8] sm:$0xff] %vm1341_vm10, %v1316_v33  ;;  %v1136_v34 = vpop.permute.xlu0 %1135 }
 0x1f8   :  { %1160 = vst.msk [vmem:[#allocation2] sm:$0xfc] %vm6664_vm11, %v1136_v34 }
 0x1f9   :  { %1209 = vst.msk [vmem:[#allocation2] sm:$0xfe] %vm6663_vm12, %v1185_v22  ;;  %1590 = vrot.lane.b32.xlu0 %v1577_v20, %s4458_s4  ;;  %vm6697_vm12 = vmmov %vm6696_vm9 }
 0x1fa   :  { %v1375_v35 = vpop.permute.xlu1 %1374  ;;  %1243 = vst.msk [vmem:[#allocation2] sm:$0xff] %vm1242_vm13, %v1219_v27  ;;  %1513 = vrot.lane.b32.xlu1 %v1498_v21, %s4454_s28 }
 0x1fb   :  { %1399 = vst.msk [vmem:[#allocation2 + $0x8] sm:$0xff] %vm1398_vm14, %v1375_v35  ;;  %v1267_v36 = vpop.permute.xlu0 %1266 }
 0x1fc   :  { %1291 = vst.msk [vmem:[#allocation2] sm:$0xff] %vm1290_vm15, %v1267_v36 }
 0x1fd   :  { %1340 = vst.msk [vmem:[#allocation2] sm:$0xff] %vm1339_vm6, %v1316_v33  ;;  %1466 = vrot.lane.b32.xlu0 %v1451_v23, %s4456_s0 }
 0x1fe   :  { %1639 = vrot.lane.b32.xlu1 %v1626_v25, %s4455_s2  ;;  %v1187_v39 = vpop.permute.xlu1 %1186 }
 0x1ff   :  { %v1138_v37 = vpop.permute.xlu0 %1137  ;;  %v4095_v38 = vpop.f32.mrb[12].mxu0 }
 0x200   :  { %1162 = vst.msk [vmem:[#allocation2 + $0x10] sm:$0xff] %vm1161_vm5, %v1138_v37  ;;  %v983_v40 = vmul.f32 %v4095_v38, %v5208_v15  ;;  %v945_v24 = vpop.f32.mrb[13].mxu0 }
 0x201   :  { %1211 = vst.msk [vmem:[#allocation2 + $0x10] sm:$0xff] %vm1210_vm7, %v1187_v39  ;;  %v982_v41 = vmul.f32 %v5208_v15, %v945_v24  ;;  %1592 = vrot.lane.b32.xlu0 %v1579_v26, %s4458_s4 }
 0x202   :  { %1244 = vst.msk [vmem:[#allocation2 + $0x10] sm:$0xff] %vm1242_vm13, %v1221_v6  ;;  %v1005_v42 = vadd.f32 %v5214_v17, %v983_v40  ;;  %v1723_v43 = vld [vmem:[#allocation2 + $0x8] sm:$0xff]  ;;  %1694 = vrot.lane.b32.xlu1 %v1681_v19, %s4457_s23 }
 0x203   :  { %v1004_v44 = vadd.f32 %v5214_v17, %v982_v41  ;;  %3831 = vmatprep.mubr.msk.f32.mxu1 %vm88_vm1, %v1723_v43  ;;  %2022 = vst.msk [vmem:[#allocation2 + $0x8] sm:$0xff] %vm88_vm1, %v4451_v28  ;;  %v5558_v45 = vpop.permute.xlu0 %1224  ;;  %v1318_v49 = vpop.permute.xlu1 %1317 }
 0x204   :  { %v5560_v46 = vmax.f32 %v1005_v42, 0.0  ;;  %v1722_v47 = vld [vmem:[#allocation2] sm:$0xff]  ;;  %1344 = vst.msk [vmem:[#allocation2 + $0x18] sm:$0xff] %vm1341_vm10, %v1318_v49 }
 0x205   :  { %v1020_v48 = vmax.f32 %v1004_v44, 0.0  ;;  %1867 = vmatmul.mubr.f32.vlgmr.msra.gmra.mrb[0].mxu1 %v1722_v47  ;;  %2021 = vst [vmem:[#allocation2] sm:$0xff] %v4451_v28  ;;  %1468 = vrot.lane.b32.xlu0 %v1453_v29, %s4456_s0 }
 0x206   :  { %v1629_v50 = vrot.slane %v5560_v46, 2  ;;  %v1582_v51 = vrot.slane %v5560_v46, 1  ;;  %v1684_v52 = vrot.slane %v5560_v46, 3  ;;  %v1456_v53 = vrot.slane %v5560_v46, 6  ;;  %1515 = vrot.lane.b32.xlu1 %v1500_v30, %s4454_s28 }
 0x207   :  { %v1223_v55 = vpop.permute.xlu0 %1222  ;;  %v1627_v56 = vrot.slane %v1020_v48, 2  ;;  %v1682_v57 = vrot.slane %v1020_v48, 3  ;;  %v1580_v58 = vrot.slane %v1020_v48, 1  ;;  %v1501_v59 = vrot.slane %v1020_v48, 7  ;;  %v1377_v1 = vpop.permute.xlu1 %1376 }
 0x208   :  { %v1454_v60 = vrot.slane %v1020_v48, 6  ;;  %v1503_v54 = vrot.slane %v5560_v46, 7  ;;  %v1423_v62 = vrot.slane %v1020_v48, 5  ;;  %v1425_v63 = vrot.slane %v5560_v46, 5  ;;  %1400 = vst.msk [vmem:[#allocation2 + $0x18] sm:$0xff] %vm1398_vm14, %v1377_v1 }
 0x209   :  { %1551 = vrot.lane.b32.xlu0 %v5560_v46, %s4453_s26  ;;  %v1628_v6 = vsel %vm345_vm3, %v1625_v2, %v1627_v56  ;;  %v1683_v7 = vsel %vm395_vm4, %v1680_v4, %v1682_v57  ;;  %v1581_v8 = vsel %vm295_vm2, %v1578_v3, %v1580_v58  ;;  %v1502_v9 = vsel %vm6666_vm0, %v1499_v12, %v1501_v59 }
 0x20a   :  { %v1455_v10 = vsel %vm6696_vm9, %v1452_v5, %v1454_v60  ;;  %v1630_v2 = vsel %vm345_vm3, %v1627_v56, %v1629_v50  ;;  %v1583_v4 = vsel %vm295_vm2, %v1580_v58, %v1582_v51  ;;  %v1685_v3 = vsel %vm395_vm4, %v1682_v57, %v1684_v52  ;;  %1641 = vrot.lane.b32.xlu1 %v1628_v6, %s4455_s2 }
 0x20b   :  { %v1269_v11 = vpop.permute.xlu0 %1268  ;;  %v1457_v12 = vsel %vm6697_vm12, %v1454_v60, %v1456_v53  ;;  %v1504_v5 = vsel %vm6666_vm0, %v1501_v59, %v1503_v54  ;;  %vm6698_vm9 = vcmask 1042432   ;;  %v1189_v18 = vpop.permute.xlu1 %1188 }
 0x20c   :  { %v1424_v13 = vsel %vm6698_vm9, %v1421_v14, %v1423_v62  ;;  %vm6699_vm11 = vmmov %vm6698_vm9  ;;  %1292 = vst.msk [vmem:[#allocation2 + $0x10] sm:$0xff] %vm1290_vm15, %v1269_v11 }
 0x20d   :  { %v1426_v16 = vsel %vm6699_vm11, %v1423_v62, %v1425_v63  ;;  %1443 = vst.msk [vmem:[#allocation2 + $0xc0] sm:$0xff] %vm6665_vm8, %v1424_v13  ;;  %1549 = vrot.lane.b32.xlu0 %v1020_v48, %s4453_s26  ;;  %vm6700_vm11 = vmmov %vm6697_vm12 }
 0x20e   :  { %1444 = vst.msk [vmem:[#allocation2 + $0xd0] sm:$0xff] %vm6665_vm8, %v1426_v16  ;;  %1696 = vrot.lane.b32.xlu1 %v1683_v7, %s4457_s23  ;;  %vm6701_vm12 = vmmov %vm6700_vm11 }
 0x20f   :  { %1343 = vst.msk [vmem:[#allocation2 + $0x10] sm:$0xff] %vm1339_vm6, %v1318_v49  ;;  %v1140_v0 = vpop.permute.xlu0 %1139  ;;  %v1320_v14 = vpop.permute.xlu1 %1319  ;;  %v1725_v20 = vld [vmem:[#allocation2 + $0x18] sm:$0xff] }
 0x210   :  { %1163 = vst.msk [vmem:[#allocation2 + $0x20] sm:$0xff] %vm1161_vm5, %v1140_v0  ;;  %3832 = vmatprep.mubr.msk.f32.mxu1 %vm88_vm1, %v1725_v20 }
 0x211   :  { %1212 = vst.msk [vmem:[#allocation2 + $0x20] sm:$0xff] %vm1210_vm7, %v1189_v18  ;;  %1594 = vrot.lane.b32.xlu0 %v1581_v8, %s4458_s4 }
 0x212   :  { %1245 = vst.msk [vmem:[#allocation2 + $0x20] sm:$0xff] %vm1242_vm13, %v1223_v55  ;;  %1517 = vrot.lane.b32.xlu1 %v1502_v9, %s4454_s28 }
 0x213   :  { %1346 = vst.msk [vmem:[#allocation2 + $0x28] sm:$0xff] %vm1341_vm10, %v1320_v14  ;;  %v1271_v21 = vpop.permute.xlu0 %1270  ;;  %v1379_v23 = vpop.permute.xlu1 %1378 }
 0x214   :  { %2024 = vst.msk [vmem:[#allocation2 + $0x18] sm:$0xff] %vm88_vm1, %v4451_v28 }
 0x215   :  { %1293 = vst.msk [vmem:[#allocation2 + $0x20] sm:$0xff] %vm1290_vm15, %v1271_v21  ;;  %1470 = vrot.lane.b32.xlu0 %v1455_v10, %s4456_s0 }
 0x216   :  { %v1724_v22 = vld [vmem:[#allocation2 + $0x10] sm:$0xff]  ;;  %1345 = vst.msk [vmem:[#allocation2 + $0x20] sm:$0xff] %vm1339_vm6, %v1320_v14  ;;  %1643 = vrot.lane.b32.xlu1 %v1630_v2, %s4455_s2 }
 0x217   :  { %1872 = vmatmul.mubr.f32.gmra.mrb[2].mxu1 %v1724_v22  ;;  %2023 = vst [vmem:[#allocation2 + $0x10] sm:$0xff] %v4451_v28  ;;  %1401 = vst.msk [vmem:[#allocation2 + $0x28] sm:$0xff] %vm1398_vm14, %v1379_v23  ;;  %v1142_v25 = vpop.permute.xlu0 %1141  ;;  %v4098_v26 = vpop.f32.mrb[14].mxu0 }
 0x218   :  { %1164 = vst.msk [vmem:[#allocation2 + $0x30] sm:$0xff] %vm1161_vm5, %v1142_v25  ;;  %v985_v19 = vmul.f32 %v4098_v26, %v5208_v15  ;;  %v955_v27 = vpop.f32.mrb[15].mxu0  ;;  %v1191_v29 = vpop.permute.xlu1 %1190 }
 0x219   :  { %v984_v30 = vmul.f32 %v5208_v15, %v955_v27  ;;  %1596 = vrot.lane.b32.xlu0 %v1583_v4, %s4458_s4  ;;  %1213 = vst.msk [vmem:[#allocation2 + $0x30] sm:$0xff] %vm1210_vm7, %v1191_v29 }
 0x21a   :  { %v1007_v31 = vadd.f32 %v5214_v17, %v985_v19  ;;  %1246 = vst.msk [vmem:[#allocation2 + $0x30] sm:$0xff] %vm1242_vm13, %v5558_v45  ;;  %1698 = vrot.lane.b32.xlu1 %v1685_v3, %s4457_s23 }
 0x21b   :  { %v1006_v32 = vadd.f32 %v5214_v17, %v984_v30  ;;  %v5643_v33 = vpop.permute.xlu0 %1228 }
 0x21c   :  { %v5645_v34 = vmax.f32 %v1007_v31, 0.0  ;;  %v1322_v15 = vpop.permute.xlu1 %1321 }
 0x21d   :  { %v1726_v35 = vld [vmem:[#allocation2 + $0x20] sm:$0xff]  ;;  %v1022_v36 = vmax.f32 %v1006_v32, 0.0  ;;  %1472 = vrot.lane.b32.xlu0 %v1457_v12, %s4456_s0  ;;  %1348 = vst.msk [vmem:[#allocation2 + $0x38] sm:$0xff] %vm1341_vm10, %v1322_v15 }
 0x21e   :  { %v1727_v37 = vld [vmem:[#allocation2 + $0x28] sm:$0xff]  ;;  %2025 = vst [vmem:[#allocation2 + $0x20] sm:$0xff] %v4451_v28  ;;  %v1633_v17 = vrot.slane %v5645_v34, 2  ;;  %v1586_v38 = vrot.slane %v5645_v34, 1  ;;  %v1460_v39 = vrot.slane %v5645_v34, 6  ;;  %v1688_v40 = vrot.slane %v5645_v34, 3  ;;  %1519 = vrot.lane.b32.xlu1 %v1504_v5, %s4454_s28 }
 0x21f   :  { %3833 = vmatprep.mubr.msk.f32.mxu1 %vm88_vm1, %v1727_v37  ;;  %2026 = vst.msk [vmem:[#allocation2 + $0x28] sm:$0xff] %vm88_vm1, %v4451_v28  ;;  %v1227_v24 = vpop.permute.xlu0 %1226  ;;  %v1631_v41 = vrot.slane %v1022_v36, 2  ;;  %v1584_v42 = vrot.slane %v1022_v36, 1  ;;  %v1686_v43 = vrot.slane %v1022_v36, 3  ;;  %v1458_v44 = vrot.slane %v1022_v36, 6 }
 0x220   :  { %1877 = vmatmul.mubr.f32.gmra.mrb[4].mxu1 %v1726_v35  ;;  %v1505_v45 = vrot.slane %v1022_v36, 7  ;;  %v1507_v47 = vrot.slane %v5645_v34, 7  ;;  %v1427_v48 = vrot.slane %v1022_v36, 5  ;;  %v1429_v49 = vrot.slane %v5645_v34, 5  ;;  %v1381_v55 = vpop.permute.xlu1 %1380 }
 0x221   :  { %1555 = vrot.lane.b32.xlu0 %v5645_v34, %s4453_s26  ;;  %v1632_v56 = vsel %vm345_vm3, %v1629_v50, %v1631_v41  ;;  %v1585_v57 = vsel %vm295_vm2, %v1582_v51, %v1584_v42  ;;  %v1687_v58 = vsel %vm395_vm4, %v1684_v52, %v1686_v43  ;;  %v1459_v59 = vsel %vm6700_vm11, %v1456_v53, %v1458_v44  ;;  %vm6702_vm11 = vmmov %vm6698_vm9 }
 0x222   :  { %1402 = vst.msk [vmem:[#allocation2 + $0x38] sm:$0xff] %vm1398_vm14, %v1381_v55  ;;  %v1506_v60 = vsel %vm6666_vm0, %v1503_v54, %v1505_v45  ;;  %v1587_v50 = vsel %vm295_vm2, %v1584_v42, %v1586_v38  ;;  %v1634_v51 = vsel %vm345_vm3, %v1631_v41, %v1633_v17  ;;  %v1461_v62 = vsel %vm6701_vm12, %v1458_v44, %v1460_v39 }
 0x223   :  { %1649 = vrot.lane.b32.xlu1 %v1633_v17, %s4455_s2  ;;  %v1273_v52 = vpop.permute.xlu0 %1272  ;;  %v1689_v53 = vsel %vm395_vm4, %v1686_v43, %v1688_v40  ;;  %v1508_v1 = vsel %vm6666_vm0, %v1505_v45, %v1507_v47  ;;  %v1428_v54 = vsel %vm6698_vm9, %v1425_v63, %v1427_v48  ;;  %v1430_v6 = vsel %vm6702_vm11, %v1427_v48, %v1429_v49 }
 0x224   :  { %1294 = vst.msk [vmem:[#allocation2 + $0x30] sm:$0xff] %vm1290_vm15, %v1273_v52  ;;  %v1193_v7 = vpop.permute.xlu1 %1192  ;;  %vm1357_vm4 = vcmask 128000   ;;  %vm1406_vm12 = vcmask 323712   ;;  %vm1298_vm9 = vcmask 981760   ;;  %vm1355_vm11 = vcmask 1046464  }
 0x225   :  { %1445 = vst.msk [vmem:[#allocation2 + $0xe0] sm:$0xff] %vm6665_vm8, %v1428_v54  ;;  %1446 = vst.msk [vmem:[#allocation2 + $0xf0] sm:$0xff] %vm6665_vm8, %v1430_v6  ;;  %1553 = vrot.lane.b32.xlu0 %v1022_v36, %s4453_s26  ;;  %vm6703_vm8 = vcmask 392386   ;;  %vm6704_vm0 = vcmask 589185  }
 0x226   :  { %1347 = vst.msk [vmem:[#allocation2 + $0x30] sm:$0xff] %vm1339_vm6, %v1322_v15 }
 0x227   :  { %1645 = vrot.lane.b32.xlu1 %v1632_v56, %s4455_s2  ;;  %v1144_v8 = vpop.permute.xlu0 %1143 }
 0x228   :  { %1165 = vst.msk [vmem:[#allocation2 + $0x40] sm:$0xff] %vm1161_vm5, %v1144_v8  ;;  %v1324_v46 = vpop.permute.xlu1 %1323 }
 0x229   :  { %1214 = vst.msk [vmem:[#allocation2 + $0x40] sm:$0xff] %vm1210_vm7, %v1193_v7  ;;  %v1729_v63 = vld [vmem:[#allocation2 + $0x38] sm:$0xff]  ;;  %1598 = vrot.lane.b32.xlu0 %v1585_v57, %s4458_s4 }
 0x22a   :  { %1247 = vst.msk [vmem:[#allocation2 + $0x40] sm:$0xff] %vm1242_vm13, %v1227_v24  ;;  %3834 = vmatprep.mubr.msk.f32.mxu1 %vm88_vm1, %v1729_v63 }
 0x22b   :  { %1350 = vst.msk [vmem:[#allocation2 + $0x48] sm:$0xff] %vm1341_vm10, %v1324_v46  ;;  %1700 = vrot.lane.b32.xlu1 %v1687_v58, %s4457_s23  ;;  %v1275_v9 = vpop.permute.xlu0 %1274 }
 0x22c   :  { %2028 = vst.msk [vmem:[#allocation2 + $0x38] sm:$0xff] %vm88_vm1, %v4451_v28  ;;  %v1383_v2 = vpop.permute.xlu1 %1382 }
 0x22d   :  { %1295 = vst.msk [vmem:[#allocation2 + $0x40] sm:$0xff] %vm1290_vm15, %v1275_v9  ;;  %v1728_v10 = vld [vmem:[#allocation2 + $0x30] sm:$0xff]  ;;  %1474 = vrot.lane.b32.xlu0 %v1459_v59, %s4456_s0 }
 0x22e   :  { %1349 = vst.msk [vmem:[#allocation2 + $0x40] sm:$0xff] %vm1339_vm6, %v1324_v46  ;;  %1882 = vmatmul.mubr.f32.gmra.mrb[6].mxu1 %v1728_v10  ;;  %2027 = vst [vmem:[#allocation2 + $0x30] sm:$0xff] %v4451_v28 }
 0x22f   :  { %1403 = vst.msk [vmem:[#allocation2 + $0x48] sm:$0xff] %vm1398_vm14, %v1383_v2  ;;  %1521 = vrot.lane.b32.xlu1 %v1506_v60, %s4454_s28  ;;  %v1146_v4 = vpop.permute.xlu0 %1145 }
 0x230   :  { %1166 = vst.msk [vmem:[#allocation2 + $0x50] sm:$0xff] %vm1161_vm5, %v1146_v4  ;;  %v1195_v3 = vpop.permute.xlu1 %1194 }
 0x231   :  { %1600 = vrot.lane.b32.xlu0 %v1587_v50, %s4458_s4  ;;  %1215 = vst.msk [vmem:[#allocation2 + $0x50] sm:$0xff] %vm1210_vm7, %v1195_v3 }
 0x232   :  { %1248 = vst.msk [vmem:[#allocation2 + $0x50] sm:$0xff] %vm1242_vm13, %v5643_v33 }
 0x233   :  { %1647 = vrot.lane.b32.xlu1 %v1634_v51, %s4455_s2  ;;  %v1233_v11 = vpop.permute.xlu0 %1232 }
 0x234   :  { %v1330_v5 = vpop.permute.xlu1 %1329 }
 0x235   :  { %v1730_v12 = vld [vmem:[#allocation2 + $0x40] sm:$0xff]  ;;  %1476 = vrot.lane.b32.xlu0 %v1461_v62, %s4456_s0  ;;  %1358 = vst.msk [vmem:[#allocation2 + $0x78] sm:$0x3f] %vm1357_vm4, %v1330_v5 }
 0x236   :  { %v1731_v13 = vld [vmem:[#allocation2 + $0x48] sm:$0xff]  ;;  %2029 = vst [vmem:[#allocation2 + $0x40] sm:$0xff] %v4451_v28 }
 0x237   :  { %3835 = vmatprep.mubr.msk.f32.mxu1 %vm88_vm1, %v1731_v13  ;;  %2030 = vst.msk [vmem:[#allocation2 + $0x48] sm:$0xff] %vm88_vm1, %v4451_v28  ;;  %1702 = vrot.lane.b32.xlu1 %v1689_v53, %s4457_s23  ;;  %v1231_v16 = vpop.permute.xlu0 %1230 }
 0x238   :  { %1887 = vmatmul.mubr.f32.gmra.mrb[8].mxu1 %v1730_v12  ;;  %v1389_v18 = vpop.permute.xlu1 %1388 }
 0x239   :  { %1602 = vrot.lane.b32.xlu0 %v1586_v38, %s4458_s4  ;;  %1407 = vst.msk [vmem:[#allocation2 + $0x78] sm:$0x1f] %vm1406_vm12, %v1389_v18 }
 0x23b   :  { %1523 = vrot.lane.b32.xlu1 %v1508_v1, %s4454_s28  ;;  %v1281_v0 = vpop.permute.xlu0 %1280 }
 0x23c   :  { %v1326_v14 = vpop.permute.xlu1 %1325 }
 0x23d   :  { %1352 = vst.msk [vmem:[#allocation2 + $0x58] sm:$0xff] %vm1341_vm10, %v1326_v14 }
 0x23f   :  { %1704 = vrot.lane.b32.xlu1 %v1688_v40, %s4457_s23  ;;  %v1277_v20 = vpop.permute.xlu0 %1276 }
 0x240   :  { %1296 = vst.msk [vmem:[#allocation2 + $0x50] sm:$0xff] %vm1290_vm15, %v1277_v20  ;;  %v1385_v21 = vpop.permute.xlu1 %1384  ;;  %v1737_v22 = vld [vmem:[#allocation2 + $0x78] sm:$0xff] }
 0x241   :  { %1351 = vst.msk [vmem:[#allocation2 + $0x50] sm:$0xff] %vm1339_vm6, %v1326_v14 }
 0x242   :  { %1404 = vst.msk [vmem:[#allocation2 + $0x58] sm:$0xff] %vm1398_vm14, %v1385_v21 }
 0x243   :  { %2036 = vst.msk [vmem:[#allocation2 + $0x78] sm:$0xff] %vm88_vm1, %v4451_v28  ;;  %v1148_v23 = vpop.permute.xlu0 %1147 }
 0x244   :  { %1167 = vst.msk [vmem:[#allocation2 + $0x60] sm:$0xff] %vm1161_vm5, %v1148_v23  ;;  %v1197_v25 = vpop.permute.xlu1 %1196 }
 0x245   :  { %1216 = vst.msk [vmem:[#allocation2 + $0x60] sm:$0xff] %vm1210_vm7, %v1197_v25 }
 0x246   :  { %1249 = vst.msk [vmem:[#allocation2 + $0x60] sm:$0xff] %vm1242_vm13, %v1231_v16 }
 0x247   :  { %v1279_v26 = vpop.permute.xlu0 %1278 }
 0x248   :  { %1297 = vst.msk [vmem:[#allocation2 + $0x60] sm:$0xff] %vm1290_vm15, %v1279_v26  ;;  %v1732_v19 = vld [vmem:[#allocation2 + $0x50] sm:$0xff]  ;;  %v1328_v27 = vpop.permute.xlu1 %1327 }
 0x249   :  { %v1733_v29 = vld [vmem:[#allocation2 + $0x58] sm:$0xff]  ;;  %2031 = vst [vmem:[#allocation2 + $0x50] sm:$0xff] %v4451_v28  ;;  %1353 = vst.msk [vmem:[#allocation2 + $0x60] sm:$0xff] %vm1339_vm6, %v1328_v27 }
 0x24a   :  { %1354 = vst.msk [vmem:[#allocation2 + $0x68] sm:$0xff] %vm1341_vm10, %v1328_v27  ;;  %3836 = vmatprep.mubr.msk.f32.mxu1 %vm88_vm1, %v1733_v29 }
 0x24b   :  { %2032 = vst.msk [vmem:[#allocation2 + $0x58] sm:$0xff] %vm88_vm1, %v4451_v28  ;;  %1892 = vmatmul.mubr.f32.gmra.mrb[10].mxu1 %v1732_v19  ;;  %v1150_v30 = vpop.permute.xlu0 %1149 }
 0x24c   :  { %1168 = vst.msk [vmem:[#allocation2 + $0x70] sm:$0xff] %vm1161_vm5, %v1150_v30  ;;  %v1387_v31 = vpop.permute.xlu1 %1386 }
 0x24d   :  { %1405 = vst.msk [vmem:[#allocation2 + $0x68] sm:$0xff] %vm1398_vm14, %v1387_v31 }
 0x24f   :  { %v1544_v32 = vpop.permute.xlu0 %1543 }
 0x250   :  { %v1199_v33 = vpop.permute.xlu1 %1198  ;;  %v1734_v34 = vld [vmem:[#allocation2 + $0x60] sm:$0xff] }
 0x251   :  { %1217 = vst.msk [vmem:[#allocation2 + $0x70] sm:$0xff] %vm1210_vm7, %v1199_v33  ;;  %2033 = vst [vmem:[#allocation2 + $0x60] sm:$0xff] %v4451_v28 }
 0x252   :  { %1250 = vst.msk [vmem:[#allocation2 + $0x70] sm:$0xff] %vm1242_vm13, %v1233_v11 }
 0x253   :  { %v1542_v35 = vpop.permute.xlu0 %1541  ;;  %1299 = vst.msk [vmem:[#allocation2 + $0x70] sm:$0x7f] %vm1298_vm9, %v1281_v0 }
 0x254   :  { %1356 = vst.msk [vmem:[#allocation2 + $0x70] sm:$0x3f] %vm1355_vm11, %v1330_v5  ;;  %v1510_v36 = vpop.permute.xlu1 %1509  ;;  %v1735_v15 = vld [vmem:[#allocation2 + $0x68] sm:$0xff] }
 0x255   :  { %3837 = vmatprep.mubr.msk.f32.mxu1 %vm88_vm1, %v1735_v15  ;;  %2034 = vst.msk [vmem:[#allocation2 + $0x68] sm:$0xff] %vm88_vm1, %v4451_v28 }
 0x256   :  { %1897 = vmatmul.mubr.f32.gmra.mrb[12].mxu1 %v1734_v34 }
 0x257   :  { %v1463_v37 = vpop.permute.xlu0 %1462  ;;  %3838 = vmatprep.mubr.msk.f32.mxu1 %vm88_vm1, %v1737_v22 }
 0x258   :  { %1486 = vst.msk [vmem:[#allocation2 + $0x80] sm:$0xfc] %vm6703_vm8, %v1463_v37  ;;  %v1636_v17 = vpop.permute.xlu1 %1635  ;;  %v5853_v37 = vld [vmem:[%s6705_s27] ss:$0 sm:$0xff]  ;;  %vm6707_vm8 = vcmask 195584  }
 0x259   :  { %1533 = vst.msk [vmem:[#allocation2 + $0x80] sm:$0xfe] %vm6704_vm0, %v1510_v36  ;;  %vm2084_vm0 = vcmask 195585  }
 0x25a   :  { %1565 = vst.msk [vmem:[#allocation2 + $0x80] sm:$0xff] %vm1242_vm13, %v1542_v35 }
 0x25b   :  { %1660 = vst.msk [vmem:[#allocation2 + $0x88] sm:$0xff] %vm1341_vm10, %v1636_v17  ;;  %v1589_v38 = vpop.permute.xlu0 %1588  ;;  %v1736_v39 = vld [vmem:[#allocation2 + $0x70] sm:$0xff] }
 0x25c   :  { %1612 = vst.msk [vmem:[#allocation2 + $0x80] sm:$0xff] %vm1290_vm15, %v1589_v38  ;;  %1902 = vmatmul.mubr.f32.gmra.mrb[14].mxu1 %v1736_v39  ;;  %2035 = vst [vmem:[#allocation2 + $0x70] sm:$0xff] %v4451_v28  ;;  %v1691_v40 = vpop.permute.xlu1 %1690 }
 0x25d   :  { %1659 = vst.msk [vmem:[#allocation2 + $0x80] sm:$0xff] %vm1339_vm6, %v1636_v17  ;;  %v5858_v17 = vld [vmem:[%s6643_s6] ss:$0 sm:$0xff] }
 0x25e   :  { %1714 = vst.msk [vmem:[#allocation2 + $0x88] sm:$0xff] %vm1398_vm14, %v1691_v40 }
 0x25f   :  { %v1465_v24 = vpop.permute.xlu0 %1464 }
 0x260   :  { %1487 = vst.msk [vmem:[#allocation2 + $0x90] sm:$0xff] %vm1161_vm5, %v1465_v24  ;;  %v1512_v41 = vpop.permute.xlu1 %1511 }
 0x261   :  { %1534 = vst.msk [vmem:[#allocation2 + $0x90] sm:$0xff] %vm1210_vm7, %v1512_v41 }
 0x262   :  { %1566 = vst.msk [vmem:[#allocation2 + $0x90] sm:$0xff] %vm1242_vm13, %v1544_v32 }
 0x263   :  { %v1548_v42 = vpop.permute.xlu0 %1547 }
 0x264   :  { %v1738_v43 = vld [vmem:[#allocation2 + $0x80] sm:$0xff]  ;;  %v1638_v44 = vpop.permute.xlu1 %1637 }
 0x265   :  { %v1739_v45 = vld [vmem:[#allocation2 + $0x88] sm:$0xff]  ;;  %2037 = vst [vmem:[#allocation2 + $0x80] sm:$0xff] %v4451_v28  ;;  %1662 = vst.msk [vmem:[#allocation2 + $0x98] sm:$0xff] %vm1341_vm10, %v1638_v44 }
 0x266   :  { %3839 = vmatprep.mubr.msk.f32.mxu1 %vm88_vm1, %v1739_v45  ;;  %2038 = vst.msk [vmem:[#allocation2 + $0x88] sm:$0xff] %vm88_vm1, %v4451_v28 }
 0x267   :  { %1907 = vmatmul.mubr.f32.gmra.mrb[16].mxu1 %v1738_v43  ;;  %v1546_v47 = vpop.permute.xlu0 %1545  ;;  %v2007_v43 = vld [vmem:[%s6644_s7] sm:$0xff] }
 0x268   :  { %v1693_v48 = vpop.permute.xlu1 %1692 }
 0x269   :  { %1715 = vst.msk [vmem:[#allocation2 + $0x98] sm:$0xff] %vm1398_vm14, %v1693_v48  ;;  %v2010_v48 = vld [vmem:[%s6644_s7 + $0x18] sm:$0xff] }
 0x26b   :  { %v1591_v49 = vpop.permute.xlu0 %1590 }
 0x26c   :  { %1613 = vst.msk [vmem:[#allocation2 + $0x90] sm:$0xff] %vm1290_vm15, %v1591_v49  ;;  %v1514_v55 = vpop.permute.xlu1 %1513 }
 0x26d   :  { %1661 = vst.msk [vmem:[#allocation2 + $0x90] sm:$0xff] %vm1339_vm6, %v1638_v44  ;;  %v2008_v44 = vld [vmem:[%s6644_s7 + $0x8] sm:$0xff] }
 0x26e   :  { %v4333_v45 = vpack.c.bf16 %v2008_v44, %v2007_v43 }
 0x26f   :  { %v1467_v56 = vpop.permute.xlu0 %1466 }
 0x270   :  { %1488 = vst.msk [vmem:[#allocation2 + $0xa0] sm:$0xff] %vm1161_vm5, %v1467_v56  ;;  %v1640_v57 = vpop.permute.xlu1 %1639  ;;  %v1741_v58 = vld [vmem:[#allocation2 + $0x98] sm:$0xff]  ;;  %4334 = vmatprep.subr.bf16.mxu0 %v4333_v45 }
 0x271   :  { %1535 = vst.msk [vmem:[#allocation2 + $0xa0] sm:$0xff] %vm1210_vm7, %v1514_v55  ;;  %3840 = vmatprep.mubr.msk.f32.mxu1 %vm88_vm1, %v1741_v58  ;;  %4336 = vmatpush3.bf16.msra.mxu0 %v4333_v45  ;;  %v2011_v58 = vld [vmem:[%s6644_s7 + $0x20] sm:$0xff] }
 0x272   :  { %1567 = vst.msk [vmem:[#allocation2 + $0xa0] sm:$0xff] %vm1242_vm13, %v1546_v47  ;;  %v2009_v47 = vld [vmem:[%s6644_s7 + $0x10] sm:$0xff] }
 0x273   :  { %1664 = vst.msk [vmem:[#allocation2 + $0xa8] sm:$0xff] %vm1341_vm10, %v1640_v57  ;;  %v1593_v59 = vpop.permute.xlu0 %1592  ;;  %v4337_v49 = vpack.c.bf16 %v2010_v48, %v2009_v47 }
 0x274   :  { %2040 = vst.msk [vmem:[#allocation2 + $0x98] sm:$0xff] %vm88_vm1, %v4451_v28  ;;  %v1740_v60 = vld [vmem:[#allocation2 + $0x90] sm:$0xff]  ;;  %v1695_v50 = vpop.permute.xlu1 %1694 }
 0x275   :  { %1614 = vst.msk [vmem:[#allocation2 + $0xa0] sm:$0xff] %vm1290_vm15, %v1593_v59  ;;  %1912 = vmatmul.mubr.f32.gmra.mrb[18].mxu1 %v1740_v60  ;;  %2039 = vst [vmem:[#allocation2 + $0x90] sm:$0xff] %v4451_v28  ;;  %4338 = vmatprep.subr.bf16.mxu0 %v4337_v49  ;;  %v2012_v59 = vld [vmem:[%s6644_s7 + $0x28] sm:$0xff] }
 0x276   :  { %1663 = vst.msk [vmem:[#allocation2 + $0xa0] sm:$0xff] %vm1339_vm6, %v1640_v57  ;;  %4340 = vmatpush3.bf16.msra.mxu0 %v4337_v49 }
 0x277   :  { %1716 = vst.msk [vmem:[#allocation2 + $0xa8] sm:$0xff] %vm1398_vm14, %v1695_v50  ;;  %v1469_v51 = vpop.permute.xlu0 %1468  ;;  %v4341_v50 = vpack.c.bf16 %v2012_v59, %v2011_v58 }
 0x278   :  { %1489 = vst.msk [vmem:[#allocation2 + $0xb0] sm:$0xff] %vm1161_vm5, %v1469_v51  ;;  %v1516_v62 = vpop.permute.xlu1 %1515 }
 0x279   :  { %1536 = vst.msk [vmem:[#allocation2 + $0xb0] sm:$0xff] %vm1210_vm7, %v1516_v62  ;;  %4342 = vmatprep.subr.bf16.mxu0 %v4341_v50 }
 0x27a   :  { %1568 = vst.msk [vmem:[#allocation2 + $0xb0] sm:$0xff] %vm1242_vm13, %v1548_v42  ;;  %4344 = vmatpush3.bf16.msra.mxu0 %v4341_v50 }
 0x27b   :  { %v1552_v52 = vpop.permute.xlu0 %1551 }
 0x27c   :  { %v1642_v1 = vpop.permute.xlu1 %1641 }
 0x27d   :  { %v1742_v53 = vld [vmem:[#allocation2 + $0xa0] sm:$0xff]  ;;  %1666 = vst.msk [vmem:[#allocation2 + $0xb8] sm:$0xff] %vm1341_vm10, %v1642_v1 }
 0x27e   :  { %v1743_v54 = vld [vmem:[#allocation2 + $0xa8] sm:$0xff]  ;;  %2041 = vst [vmem:[#allocation2 + $0xa0] sm:$0xff] %v4451_v28 }
 0x27f   :  { %3841 = vmatprep.mubr.msk.f32.mxu1 %vm88_vm1, %v1743_v54  ;;  %2042 = vst.msk [vmem:[#allocation2 + $0xa8] sm:$0xff] %vm88_vm1, %v4451_v28  ;;  %v1550_v6 = vpop.permute.xlu0 %1549 }
 0x280   :  { %1917 = vmatmul.mubr.f32.gmra.mrb[20].mxu1 %v1742_v53  ;;  %v1697_v7 = vpop.permute.xlu1 %1696  ;;  %v2013_v53 = vld [vmem:[%s6644_s7 + $0x30] sm:$0xff] }
 0x281   :  { %1717 = vst.msk [vmem:[#allocation2 + $0xb8] sm:$0xff] %vm1398_vm14, %v1697_v7 }
 0x283   :  { %v1595_v8 = vpop.permute.xlu0 %1594 }
 0x284   :  { %1615 = vst.msk [vmem:[#allocation2 + $0xb0] sm:$0xff] %vm1290_vm15, %v1595_v8  ;;  %v1518_v46 = vpop.permute.xlu1 %1517 }
 0x285   :  { %1665 = vst.msk [vmem:[#allocation2 + $0xb0] sm:$0xff] %vm1339_vm6, %v1642_v1  ;;  %v2014_v1 = vld [vmem:[%s6644_s7 + $0x38] sm:$0xff] }
 0x286   :  { %v4345_v8 = vpack.c.bf16 %v2014_v1, %v2013_v53 }
 0x287   :  { %v1471_v63 = vpop.permute.xlu0 %1470 }
 0x288   :  { %1490 = vst.msk [vmem:[#allocation2 + $0xc0] sm:$0xff] %vm1161_vm5, %v1471_v63  ;;  %v1644_v9 = vpop.permute.xlu1 %1643  ;;  %v1745_v10 = vld [vmem:[#allocation2 + $0xb8] sm:$0xff]  ;;  %4346 = vmatprep.subr.bf16.mxu0 %v4345_v8 }
 0x289   :  { %1537 = vst.msk [vmem:[#allocation2 + $0xc0] sm:$0xff] %vm1210_vm7, %v1518_v46  ;;  %3842 = vmatprep.mubr.msk.f32.mxu1 %vm88_vm1, %v1745_v10  ;;  %4348 = vmatpush3.bf16.msra.mxu0 %v4345_v8 }
 0x28a   :  { %1569 = vst.msk [vmem:[#allocation2 + $0xc0] sm:$0xff] %vm1242_vm13, %v1550_v6 }
 0x28b   :  { %1668 = vst.msk [vmem:[#allocation2 + $0xc8] sm:$0xff] %vm1341_vm10, %v1644_v9  ;;  %v1597_v2 = vpop.permute.xlu0 %1596 }
 0x28c   :  { %2044 = vst.msk [vmem:[#allocation2 + $0xb8] sm:$0xff] %vm88_vm1, %v4451_v28  ;;  %v1744_v4 = vld [vmem:[#allocation2 + $0xb0] sm:$0xff]  ;;  %v1699_v3 = vpop.permute.xlu1 %1698 }
 0x28d   :  { %1616 = vst.msk [vmem:[#allocation2 + $0xc0] sm:$0xff] %vm1290_vm15, %v1597_v2  ;;  %1922 = vmatmul.mubr.f32.gmra.mrb[22].mxu1 %v1744_v4  ;;  %2043 = vst [vmem:[#allocation2 + $0xb0] sm:$0xff] %v4451_v28  ;;  %v2015_v2 = vld [vmem:[%s6644_s7 + $0x40] sm:$0xff]  ;;  %v2016_v4 = vld [vmem:[%s6644_s7 + $0x48] sm:$0xff] }
 0x28e   :  { %1667 = vst.msk [vmem:[#allocation2 + $0xc0] sm:$0xff] %vm1339_vm6, %v1644_v9 }
 0x28f   :  { %1718 = vst.msk [vmem:[#allocation2 + $0xc8] sm:$0xff] %vm1398_vm14, %v1699_v3  ;;  %v1473_v11 = vpop.permute.xlu0 %1472 }
 0x290   :  { %1491 = vst.msk [vmem:[#allocation2 + $0xd0] sm:$0xff] %vm1161_vm5, %v1473_v11  ;;  %v1520_v12 = vpop.permute.xlu1 %1519 }
 0x291   :  { %1538 = vst.msk [vmem:[#allocation2 + $0xd0] sm:$0xff] %vm1210_vm7, %v1520_v12  ;;  %v4349_v12 = vpack.c.bf16 %v2016_v4, %v2015_v2 }
 0x292   :  { %1570 = vst.msk [vmem:[#allocation2 + $0xd0] sm:$0xff] %vm1242_vm13, %v1552_v52 }
 0x293   :  { %v1556_v5 = vpop.permute.xlu0 %1555  ;;  %4350 = vmatprep.subr.bf16.mxu0 %v4349_v12 }
 0x294   :  { %4352 = vmatpush3.bf16.msra.mxu0 %v4349_v12 }
 0x295   :  { %v1746_v13 = vld [vmem:[#allocation2 + $0xc0] sm:$0xff]  ;;  %v1650_v16 = vpop.permute.xlu1 %1649 }
 0x296   :  { %v1747_v18 = vld [vmem:[#allocation2 + $0xc8] sm:$0xff]  ;;  %2045 = vst [vmem:[#allocation2 + $0xc0] sm:$0xff] %v4451_v28  ;;  %1674 = vst.msk [vmem:[#allocation2 + $0xf8] sm:$0x3f] %vm1357_vm4, %v1650_v16 }
 0x297   :  { %3843 = vmatprep.mubr.msk.f32.mxu1 %vm88_vm1, %v1747_v18  ;;  %2046 = vst.msk [vmem:[#allocation2 + $0xc8] sm:$0xff] %vm88_vm1, %v4451_v28  ;;  %v1554_v0 = vpop.permute.xlu0 %1553 }
 0x298   :  { %1927 = vmatmul.mubr.f32.gmra.mrb[24].mxu1 %v1746_v13  ;;  %v2018_v13 = vld [vmem:[%s6644_s7 + $0x58] sm:$0xff] }
 0x299   :  { %v1646_v14 = vpop.permute.xlu1 %1645 }
 0x29a   :  { %1670 = vst.msk [vmem:[#allocation2 + $0xd8] sm:$0xff] %vm1341_vm10, %v1646_v14 }
 0x29b   :  { %v1599_v20 = vpop.permute.xlu0 %1598 }
 0x29c   :  { %1617 = vst.msk [vmem:[#allocation2 + $0xd0] sm:$0xff] %vm1290_vm15, %v1599_v20 }
 0x29d   :  { %1669 = vst.msk [vmem:[#allocation2 + $0xd0] sm:$0xff] %vm1339_vm6, %v1646_v14  ;;  %v1701_v21 = vpop.permute.xlu1 %1700 }
 0x29e   :  { %1719 = vst.msk [vmem:[#allocation2 + $0xd8] sm:$0xff] %vm1398_vm14, %v1701_v21 }
 0x29f   :  { %v1475_v22 = vpop.permute.xlu0 %1474 }
 0x2a0   :  { %1492 = vst.msk [vmem:[#allocation2 + $0xe0] sm:$0xff] %vm1161_vm5, %v1475_v22 }
 0x2a1   :  { %v1522_v23 = vpop.permute.xlu1 %1521 }
 0x2a2   :  { %1539 = vst.msk [vmem:[#allocation2 + $0xe0] sm:$0xff] %vm1210_vm7, %v1522_v23 }
 0x2a3   :  { %1571 = vst.msk [vmem:[#allocation2 + $0xe0] sm:$0xff] %vm1242_vm13, %v1554_v0  ;;  %v1601_v25 = vpop.permute.xlu0 %1600 }
 0x2a4   :  { %1618 = vst.msk [vmem:[#allocation2 + $0xe0] sm:$0xff] %vm1290_vm15, %v1601_v25  ;;  %v1748_v26 = vld [vmem:[#allocation2 + $0xd0] sm:$0xff] }
 0x2a5   :  { %v1648_v19 = vpop.permute.xlu1 %1647  ;;  %v1749_v27 = vld [vmem:[#allocation2 + $0xd8] sm:$0xff]  ;;  %2047 = vst [vmem:[#allocation2 + $0xd0] sm:$0xff] %v4451_v28 }
 0x2a6   :  { %1671 = vst.msk [vmem:[#allocation2 + $0xe0] sm:$0xff] %vm1339_vm6, %v1648_v19  ;;  %3844 = vmatprep.mubr.msk.f32.mxu1 %vm88_vm1, %v1749_v27  ;;  %vm6711_vm6 = vmmov %vm6707_vm8 }
 0x2a7   :  { %1672 = vst.msk [vmem:[#allocation2 + $0xe8] sm:$0xff] %vm1341_vm10, %v1648_v19  ;;  %1932 = vmatmul.mubr.f32.gmra.mrb[26].mxu1 %v1748_v26  ;;  %v1477_v29 = vpop.permute.xlu0 %1476 }
 0x2a8   :  { %2048 = vst.msk [vmem:[#allocation2 + $0xd8] sm:$0xff] %vm88_vm1, %v4451_v28 }
 0x2a9   :  { %1493 = vst.msk [vmem:[#allocation2 + $0xf0] sm:$0xff] %vm1161_vm5, %v1477_v29  ;;  %v1703_v30 = vpop.permute.xlu1 %1702 }
 0x2aa   :  { %1720 = vst.msk [vmem:[#allocation2 + $0xe8] sm:$0xff] %vm1398_vm14, %v1703_v30  ;;  %vm6709_vm14 = vmmov %vm6707_vm8 }
 0x2ab   :  { %v1603_v33 = vpop.permute.xlu0 %1602 }
 0x2ad   :  { %v1524_v31 = vpop.permute.xlu1 %1523  ;;  %v1750_v32 = vld [vmem:[#allocation2 + $0xe0] sm:$0xff] }
 0x2ae   :  { %1540 = vst.msk [vmem:[#allocation2 + $0xf0] sm:$0xff] %vm1210_vm7, %v1524_v31  ;;  %2049 = vst [vmem:[#allocation2 + $0xe0] sm:$0xff] %v4451_v28 }
 0x2af   :  { %1572 = vst.msk [vmem:[#allocation2 + $0xf0] sm:$0xff] %vm1242_vm13, %v1556_v5  ;;  %v2017_v5 = vld [vmem:[%s6644_s7 + $0x50] sm:$0xff] }
 0x2b0   :  { %1619 = vst.msk [vmem:[#allocation2 + $0xf0] sm:$0x7f] %vm1298_vm9, %v1603_v33  ;;  %v4353_v18 = vpack.c.bf16 %v2018_v13, %v2017_v5 }
 0x2b1   :  { %1673 = vst.msk [vmem:[#allocation2 + $0xf0] sm:$0x3f] %vm1355_vm11, %v1650_v16  ;;  %v1705_v34 = vpop.permute.xlu1 %1704  ;;  %v1751_v35 = vld [vmem:[#allocation2 + $0xe8] sm:$0xff]  ;;  %vm6715_vm11 = vmmov %vm6711_vm6 }
 0x2b2   :  { %1721 = vst.msk [vmem:[#allocation2 + $0xf8] sm:$0x1f] %vm1406_vm12, %v1705_v34  ;;  %3845 = vmatprep.mubr.msk.f32.mxu1 %vm88_vm1, %v1751_v35  ;;  %4354 = vmatprep.subr.bf16.mxu0 %v4353_v18  ;;  %vm6713_vm12 = vmmov %vm6711_vm6 }
 0x2b3   :  { %2050 = vst.msk [vmem:[#allocation2 + $0xe8] sm:$0xff] %vm88_vm1, %v4451_v28  ;;  %1937 = vmatmul.mubr.f32.gmra.mrb[28].mxu1 %v1750_v32  ;;  %4356 = vmatpush3.bf16.msra.mxu0 %v4353_v18 }
 0x2b8   :  { %v1752_v36 = vld [vmem:[#allocation2 + $0xf0] sm:$0xff] }
 0x2b9   :  { %v1753_v15 = vld [vmem:[#allocation2 + $0xf8] sm:$0xff]  ;;  %2051 = vst [vmem:[#allocation2 + $0xf0] sm:$0xff] %v4451_v28 }
 0x2ba   :  { %3846 = vmatprep.mubr.msk.f32.mxu1 %vm88_vm1, %v1753_v15  ;;  %2052 = vst.msk [vmem:[#allocation2 + $0xf8] sm:$0xff] %vm88_vm1, %v4451_v28  ;;  %vm6706_vm1 = vcmask 1040384  }
 0x2bb   :  { %1942 = vmatmul.mubr.f32.gmra.mrb[30].mxu1 %v1752_v36  ;;  %vm6708_vm10 = vmmov %vm6706_vm1 }
 0x2bc   :  { %vm6710_vm15 = vmmov %vm6706_vm1 }
 0x2bd   :  { %vm6712_vm4 = vmmov %vm6706_vm1 }
 0x2be   :  { %vm6714_vm9 = vmmov %vm6706_vm1 }
 0x2d8   :  { %v1868_v38 = vpop.f32.mrb[0].mxu1 }
 0x2d9   :  { %v1953_v39 = vmul.f32 %v5853_v37, %v1868_v38  ;;  %v1870_v40 = vpop.f32.mrb[1].mxu1 }
 0x2db   :  { %v1975_v24 = vadd.f32 %v5858_v17, %v1953_v39 }
 0x2dd   :  { %v1991_v41 = vmax.f32 %v1975_v24, 0.0 }
 0x2df   :  { %v2061_v42 = vrot.slane %v1991_v41, 7  ;;  %2093 = vrot.lane.b32.xlu0 %v1991_v41, %s4456_s0  ;;  %v2125_v62 = vrot.slane %v1991_v41, 1  ;;  %v2173_v52 = vrot.slane %v1991_v41, 2 }
 0x2e1   :  { %2085 = vst.msk [vmem:[#allocation2] sm:$0xfe] %vm2084_vm0, %v2061_v42 }
 0x2ea   :  { %v1873_v55 = vpop.f32.mrb[2].mxu1 }
 0x2eb   :  { %v1954_v56 = vmul.f32 %v5853_v37, %v1873_v55  ;;  %v1875_v57 = vpop.f32.mrb[3].mxu1 }
 0x2ed   :  { %v1976_v60 = vadd.f32 %v5858_v17, %v1954_v56 }
 0x2ef   :  { %v1992_v51 = vmax.f32 %v1976_v60, 0.0 }
 0x2f1   :  { %2095 = vrot.lane.b32.xlu1 %v1992_v51, %s4456_s0  ;;  %v2126_v54 = vrot.slane %v1992_v51, 1  ;;  %v2174_v6 = vrot.slane %v1992_v51, 2  ;;  %v2062_v7 = vrot.slane %v1992_v51, 7 }
 0x2f3   :  { %v2127_v46 = vsel %vm295_vm2, %v2125_v62, %v2126_v54  ;;  %v2175_v63 = vsel %vm345_vm3, %v2173_v52, %v2174_v6  ;;  %v2063_v9 = vsel %vm6706_vm1, %v2061_v42, %v2062_v7  ;;  %v1878_v10 = vpop.f32.mrb[4].mxu1 }
 0x2f4   :  { %2140 = vrot.lane.b32.xlu0 %v2127_v46, %s4454_s28  ;;  %2086 = vst.msk [vmem:[#allocation2 + $0x10] sm:$0xff] %vm6707_vm8, %v2063_v9  ;;  %v1955_v3 = vmul.f32 %v5853_v37, %v1878_v10  ;;  %v1880_v11 = vpop.f32.mrb[5].mxu1  ;;  %vm6716_vm8 = vmmov %vm6711_vm6 }
 0x2f6   :  { %v1977_v16 = vadd.f32 %v5858_v17, %v1955_v3 }
 0x2f8   :  { %2188 = vrot.lane.b32.xlu0 %v2175_v63, %s4453_s26  ;;  %v1993_v0 = vmax.f32 %v1977_v16, 0.0 }
 0x2fa   :  { %v2128_v14 = vrot.slane %v1993_v0, 1  ;;  %v2176_v20 = vrot.slane %v1993_v0, 2  ;;  %v2064_v21 = vrot.slane %v1993_v0, 7 }
 0x2fc   :  { %2097 = vrot.lane.b32.xlu0 %v1993_v0, %s4456_s0  ;;  %v2129_v22 = vsel %vm295_vm2, %v2126_v54, %v2128_v14  ;;  %v2177_v23 = vsel %vm345_vm3, %v2174_v6, %v2176_v20  ;;  %v2065_v25 = vsel %vm6708_vm10, %v2062_v7, %v2064_v21  ;;  %vm6717_vm10 = vmmov %vm6706_vm1 }
 0x2fd   :  { %2142 = vrot.lane.b32.xlu1 %v2129_v22, %s4454_s28  ;;  %2087 = vst.msk [vmem:[#allocation2 + $0x20] sm:$0xff] %vm6709_vm14, %v2065_v25  ;;  %vm6718_vm14 = vmmov %vm6711_vm6 }
 0x301   :  { %2190 = vrot.lane.b32.xlu1 %v2177_v23, %s4453_s26  ;;  %v1883_v26 = vpop.f32.mrb[6].mxu1 }
 0x302   :  { %v1956_v19 = vmul.f32 %v5853_v37, %v1883_v26  ;;  %v1885_v27 = vpop.f32.mrb[7].mxu1 }
 0x304   :  { %v1978_v29 = vadd.f32 %v5858_v17, %v1956_v19 }
 0x306   :  { %v1994_v30 = vmax.f32 %v1978_v29, 0.0 }
 0x308   :  { %2099 = vrot.lane.b32.xlu1 %v1994_v30, %s4456_s0  ;;  %v2130_v31 = vrot.slane %v1994_v30, 1  ;;  %v2178_v32 = vrot.slane %v1994_v30, 2  ;;  %v2066_v33 = vrot.slane %v1994_v30, 7 }
 0x30a   :  { %v2131_v34 = vsel %vm295_vm2, %v2128_v14, %v2130_v31  ;;  %v2179_v35 = vsel %vm345_vm3, %v2176_v20, %v2178_v32  ;;  %v2067_v36 = vsel %vm6710_vm15, %v2064_v21, %v2066_v33  ;;  %vm6720_vm15 = vmmov %vm6711_vm6 }
 0x30b   :  { %v1888_v15 = vpop.f32.mrb[8].mxu1  ;;  %2144 = vrot.lane.b32.xlu0 %v2131_v34, %s4454_s28  ;;  %2088 = vst.msk [vmem:[#allocation2 + $0x30] sm:$0xff] %vm6711_vm6, %v2067_v36 }
 0x30c   :  { %v1957_v38 = vmul.f32 %v5853_v37, %v1888_v15  ;;  %v1890_v39 = vpop.f32.mrb[9].mxu1 }
 0x30e   :  { %v1979_v40 = vadd.f32 %v5858_v17, %v1957_v38 }
 0x30f   :  { %2192 = vrot.lane.b32.xlu0 %v2179_v35, %s4453_s26 }
 0x310   :  { %v1995_v24 = vmax.f32 %v1979_v40, 0.0 }
 0x312   :  { %v2132_v41 = vrot.slane %v1995_v24, 1  ;;  %v2180_v42 = vrot.slane %v1995_v24, 2  ;;  %v2068_v43 = vrot.slane %v1995_v24, 7 }
 0x313   :  { %2101 = vrot.lane.b32.xlu0 %v1995_v24, %s4456_s0 }
 0x314   :  { %v2133_v44 = vsel %vm295_vm2, %v2130_v31, %v2132_v41  ;;  %v2181_v45 = vsel %vm345_vm3, %v2178_v32, %v2180_v42  ;;  %v2069_v47 = vsel %vm6712_vm4, %v2066_v33, %v2068_v43  ;;  %vm6722_vm4 = vmmov %vm6716_vm8 }
 0x315   :  { %2146 = vrot.lane.b32.xlu1 %v2133_v44, %s4454_s28  ;;  %2089 = vst.msk [vmem:[#allocation2 + $0x40] sm:$0xff] %vm6713_vm12, %v2069_v47 }
 0x319   :  { %2194 = vrot.lane.b32.xlu1 %v2181_v45, %s4453_s26 }
 0x31e   :  { %v1893_v48 = vpop.f32.mrb[10].mxu1 }
 0x31f   :  { %v1958_v49 = vmul.f32 %v5853_v37, %v1893_v48  ;;  %v1895_v55 = vpop.f32.mrb[11].mxu1 }
 0x321   :  { %v1980_v56 = vadd.f32 %v5858_v17, %v1958_v49 }
 0x323   :  { %v1996_v57 = vmax.f32 %v1980_v56, 0.0 }
 0x325   :  { %2103 = vrot.lane.b32.xlu1 %v1996_v57, %s4456_s0  ;;  %v2134_v58 = vrot.slane %v1996_v57, 1  ;;  %v2182_v59 = vrot.slane %v1996_v57, 2  ;;  %v2070_v60 = vrot.slane %v1996_v57, 7 }
 0x327   :  { %v2135_v50 = vsel %vm295_vm2, %v2132_v41, %v2134_v58  ;;  %v2183_v51 = vsel %vm345_vm3, %v2180_v42, %v2182_v59  ;;  %v2071_v62 = vsel %vm6714_vm9, %v2068_v43, %v2070_v60  ;;  %vm6724_vm9 = vmmov %vm6722_vm4 }
 0x328   :  { %2148 = vrot.lane.b32.xlu0 %v2135_v50, %s4454_s28  ;;  %2090 = vst.msk [vmem:[#allocation2 + $0x50] sm:$0xff] %vm6715_vm11, %v2071_v62  ;;  %vm2402_vm11 = vcmask 785408  }
 0x329   :  { %v1898_v52 = vpop.f32.mrb[12].mxu1 }
 0x32a   :  { %v1959_v53 = vmul.f32 %v5853_v37, %v1898_v52  ;;  %v1900_v1 = vpop.f32.mrb[13].mxu1 }
 0x32c   :  { %2196 = vrot.lane.b32.xlu0 %v2183_v51, %s4453_s26  ;;  %v1981_v54 = vadd.f32 %v5858_v17, %v1959_v53 }
 0x32e   :  { %v1997_v6 = vmax.f32 %v1981_v54, 0.0 }
 0x32f   :  { %v1903_v7 = vpop.f32.mrb[14].mxu1 }
 0x330   :  { %v1960_v8 = vmul.f32 %v5853_v37, %v1903_v7  ;;  %v1905_v46 = vpop.f32.mrb[15].mxu1  ;;  %2105 = vrot.lane.b32.xlu0 %v1997_v6, %s4456_s0  ;;  %v2136_v63 = vrot.slane %v1997_v6, 1  ;;  %v2184_v9 = vrot.slane %v1997_v6, 2  ;;  %v2072_v10 = vrot.slane %v1997_v6, 7 }
 0x332   :  { %v1982_v2 = vadd.f32 %v5858_v17, %v1960_v8  ;;  %v2137_v4 = vsel %vm295_vm2, %v2134_v58, %v2136_v63  ;;  %v2185_v3 = vsel %vm345_vm3, %v2182_v59, %v2184_v9  ;;  %v2073_v11 = vsel %vm6706_vm1, %v2070_v60, %v2072_v10 }
 0x333   :  { %2150 = vrot.lane.b32.xlu1 %v2137_v4, %s4454_s28  ;;  %2091 = vst.msk [vmem:[#allocation2 + $0x60] sm:$0xff] %vm6716_vm8, %v2073_v11  ;;  %vm6726_vm8 = vmmov %vm6722_vm4 }
 0x334   :  { %v1998_v12 = vmax.f32 %v1982_v2, 0.0 }
 0x336   :  { %v2138_v5 = vrot.slane %v1998_v12, 1  ;;  %v2186_v13 = vrot.slane %v1998_v12, 2  ;;  %v2074_v16 = vrot.slane %v1998_v12, 7 }
 0x337   :  { %2198 = vrot.lane.b32.xlu1 %v2185_v3, %s4453_s26 }
 0x338   :  { %v2139_v18 = vsel %vm295_vm2, %v2136_v63, %v2138_v5  ;;  %v2187_v0 = vsel %vm345_vm3, %v2184_v9, %v2186_v13  ;;  %v2075_v14 = vsel %vm6717_vm10, %v2072_v10, %v2074_v16 }
 0x339   :  { %2152 = vrot.lane.b32.xlu0 %v2139_v18, %s4454_s28  ;;  %2092 = vst.msk [vmem:[#allocation2 + $0x70] sm:$0xff] %vm6718_vm14, %v2075_v14  ;;  %vm6728_vm14 = vmmov %vm6722_vm4 }
 0x33a   :  { %v1908_v20 = vpop.f32.mrb[16].mxu1 }
 0x33b   :  { %v1961_v21 = vmul.f32 %v5853_v37, %v1908_v20  ;;  %v1910_v22 = vpop.f32.mrb[17].mxu1  ;;  %2107 = vrot.lane.b32.xlu1 %v1998_v12, %s4456_s0 }
 0x33d   :  { %v1983_v23 = vadd.f32 %v5858_v17, %v1961_v21  ;;  %2200 = vrot.lane.b32.xlu0 %v2187_v0, %s4453_s26 }
 0x33f   :  { %v1999_v25 = vmax.f32 %v1983_v23, 0.0  ;;  %2154 = vrot.lane.b32.xlu1 %v2138_v5, %s4454_s28 }
 0x341   :  { %v2229_v26 = vrot.slane %v1999_v25, 7  ;;  %2260 = vrot.lane.b32.xlu0 %v1999_v25, %s4456_s0  ;;  %v2292_v32 = vrot.slane %v1999_v25, 1  ;;  %v2339_v34 = vrot.slane %v1999_v25, 2 }
 0x343   :  { %2252 = vst.msk [vmem:[#allocation2 + $0x80] sm:$0xfe] %vm2084_vm0, %v2229_v26  ;;  %2202 = vrot.lane.b32.xlu1 %v2186_v13, %s4453_s26  ;;  %vm6719_vm0 = vmmov %vm6706_vm1 }
 0x344   :  { %vm6721_vm6 = vmmov %vm6719_vm0 }
 0x345   :  { %vm6723_vm12 = vmmov %vm6719_vm0 }
 0x346   :  { %vm6725_vm1 = vmmov %vm6719_vm0 }
 0x347   :  { %vm6727_vm10 = vmmov %vm6719_vm0 }
 0x348   :  { %v1913_v19 = vpop.f32.mrb[18].mxu1 }
 0x349   :  { %v1962_v27 = vmul.f32 %v5853_v37, %v1913_v19  ;;  %v1915_v29 = vpop.f32.mrb[19].mxu1 }
 0x34b   :  { %v1984_v30 = vadd.f32 %v5858_v17, %v1962_v27 }
 0x34d   :  { %v2000_v31 = vmax.f32 %v1984_v30, 0.0 }
 0x34f   :  { %2262 = vrot.lane.b32.xlu1 %v2000_v31, %s4456_s0  ;;  %v2293_v33 = vrot.slane %v2000_v31, 1  ;;  %v2340_v35 = vrot.slane %v2000_v31, 2  ;;  %v2230_v36 = vrot.slane %v2000_v31, 7 }
 0x351   :  { %v2094_v15 = vpop.permute.xlu0 %2093  ;;  %v2294_v38 = vsel %vm295_vm2, %v2292_v32, %v2293_v33  ;;  %v2341_v39 = vsel %vm345_vm3, %v2339_v34, %v2340_v35  ;;  %v2231_v40 = vsel %vm6719_vm0, %v2229_v26, %v2230_v36 }
 0x352   :  { %2117 = vst.msk [vmem:[#allocation2] sm:$0xff] %vm1161_vm5, %v2094_v15  ;;  %2307 = vrot.lane.b32.xlu0 %v2294_v38, %s4454_s28 }
 0x353   :  { %v1918_v24 = vpop.f32.mrb[20].mxu1  ;;  %2253 = vst.msk [vmem:[#allocation2 + $0x90] sm:$0xff] %vm6720_vm15, %v2231_v40  ;;  %vm6729_vm15 = vmmov %vm6722_vm4 }
 0x354   :  { %v1963_v41 = vmul.f32 %v5853_v37, %v1918_v24  ;;  %v1920_v42 = vpop.f32.mrb[21].mxu1 }
 0x356   :  { %v1985_v43 = vadd.f32 %v5858_v17, %v1963_v41  ;;  %2354 = vrot.lane.b32.xlu0 %v2341_v39, %s4453_s26 }
 0x358   :  { %v2001_v44 = vmax.f32 %v1985_v43, 0.0 }
 0x35a   :  { %v2295_v45 = vrot.slane %v2001_v44, 1  ;;  %v2342_v47 = vrot.slane %v2001_v44, 2  ;;  %v2232_v48 = vrot.slane %v2001_v44, 7  ;;  %2264 = vrot.lane.b32.xlu0 %v2001_v44, %s4456_s0 }
 0x35c   :  { %v2296_v49 = vsel %vm295_vm2, %v2293_v33, %v2295_v45  ;;  %v2343_v55 = vsel %vm345_vm3, %v2340_v35, %v2342_v47  ;;  %v2233_v56 = vsel %vm6721_vm6, %v2230_v36, %v2232_v48  ;;  %vm6730_vm6 = vmmov %vm6719_vm0 }
 0x35d   :  { %2309 = vrot.lane.b32.xlu1 %v2296_v49, %s4454_s28  ;;  %2254 = vst.msk [vmem:[#allocation2 + $0xa0] sm:$0xff] %vm6722_vm4, %v2233_v56 }
 0x360   :  { %v1923_v57 = vpop.f32.mrb[22].mxu1 }
 0x361   :  { %2356 = vrot.lane.b32.xlu1 %v2343_v55, %s4453_s26  ;;  %v1964_v58 = vmul.f32 %v5853_v37, %v1923_v57  ;;  %v1925_v59 = vpop.f32.mrb[23].mxu1 }
 0x363   :  { %v2096_v60 = vpop.permute.xlu1 %2095  ;;  %v1986_v50 = vadd.f32 %v5858_v17, %v1964_v58 }
 0x364   :  { %2118 = vst.msk [vmem:[#allocation2 + $0x10] sm:$0xff] %vm1161_vm5, %v2096_v60 }
 0x365   :  { %v2002_v62 = vmax.f32 %v1986_v50, 0.0 }
 0x366   :  { %v2141_v51 = vpop.permute.xlu0 %2140 }
 0x367   :  { %2164 = vst.msk [vmem:[#allocation2] sm:$0xff] %vm1210_vm7, %v2141_v51  ;;  %2266 = vrot.lane.b32.xlu1 %v2002_v62, %s4456_s0  ;;  %v2297_v52 = vrot.slane %v2002_v62, 1  ;;  %v2344_v53 = vrot.slane %v2002_v62, 2  ;;  %v2234_v1 = vrot.slane %v2002_v62, 7 }
 0x369   :  { %v2298_v6 = vsel %vm295_vm2, %v2295_v45, %v2297_v52  ;;  %v2345_v7 = vsel %vm345_vm3, %v2342_v47, %v2344_v53  ;;  %v2235_v8 = vsel %vm6723_vm12, %v2232_v48, %v2234_v1  ;;  %vm2219_vm12 = vcmask 783936  }
 0x36a   :  { %v2189_v54 = vpop.permute.xlu0 %2188  ;;  %2311 = vrot.lane.b32.xlu0 %v2298_v6, %s4454_s28  ;;  %2255 = vst.msk [vmem:[#allocation2 + $0xb0] sm:$0xff] %vm6724_vm9, %v2235_v8  ;;  %v2656_v6 = vld [vmem:[%s6645_s10] sm:$0xff]  ;;  %vm2947_vm9 = vcmask 244736  }
 0x36b   :  { %2212 = vst.msk [vmem:[#allocation2] sm:$0xff] %vm1242_vm13, %v2189_v54  ;;  %v1928_v46 = vpop.f32.mrb[24].mxu1 }
 0x36c   :  { %v1965_v63 = vmul.f32 %v5853_v37, %v1928_v46  ;;  %v1930_v9 = vpop.f32.mrb[25].mxu1  ;;  %v2675_v46 = vld [vmem:[%s6646_s16] sm:$0xff] }
 0x36d   :  { %v2658_v9 = vld [vmem:[%s6645_s10 + $0x10] sm:$0xff] }
 0x36e   :  { %v2098_v10 = vpop.permute.xlu0 %2097  ;;  %v1987_v2 = vadd.f32 %v5858_v17, %v1965_v63  ;;  %2358 = vrot.lane.b32.xlu0 %v2345_v7, %s4453_s26  ;;  %v2657_v7 = vld [vmem:[%s6645_s10 + $0x8] sm:$0xff] }
 0x36f   :  { %2119 = vst.msk [vmem:[#allocation2 + $0x20] sm:$0xff] %vm1161_vm5, %v2098_v10  ;;  %v2143_v4 = vpop.permute.xlu1 %2142  ;;  %v4357_v8 = vpack.c.bf16 %v2657_v7, %v2656_v6  ;;  %v2676_v63 = vld [vmem:[%s6646_s16 + $0x8] sm:$0xff] }
 0x370   :  { %v2003_v3 = vmax.f32 %v1987_v2, 0.0  ;;  %2165 = vst.msk [vmem:[#allocation2 + $0x10] sm:$0xff] %vm1210_vm7, %v2143_v4  ;;  %v4387_v2 = vpack.c.bf16 %v2676_v63, %v2675_v46  ;;  %v2659_v4 = vld [vmem:[%s6645_s10 + $0x18] sm:$0xff] }
 0x371   :  { %4358 = vmatprep.subr.bf16.mxu0 %v4357_v8 }
 0x372   :  { %v2386_v11 = vld [vmem:[#allocation2] sm:$0xff]  ;;  %v2299_v12 = vrot.slane %v2003_v3, 1  ;;  %v2346_v5 = vrot.slane %v2003_v3, 2  ;;  %v2236_v13 = vrot.slane %v2003_v3, 7  ;;  %2268 = vrot.lane.b32.xlu0 %v2003_v3, %s4456_s0  ;;  %v2677_v3 = vld [vmem:[%s6646_s16 + $0x10] sm:$0xff]  ;;  %4388 = vmatprep.subr.bf16.mxu1 %v4387_v2 }
 0x373   :  { %4123 = vmatprep.mubr.msk.f32.mxu0 %vm2402_vm11, %v2386_v11  ;;  %v2191_v16 = vpop.permute.xlu1 %2190  ;;  %v2678_v11 = vld [vmem:[%s6646_s16 + $0x18] sm:$0xff]  ;;  %4390 = vmatpush3.bf16.msra.mxu1 %v4387_v2 }
 0x374   :  { %2213 = vst.msk [vmem:[#allocation2 + $0x10] sm:$0xff] %vm1242_vm13, %v2191_v16  ;;  %v2300_v18 = vsel %vm295_vm2, %v2297_v52, %v2299_v12  ;;  %v2347_v0 = vsel %vm345_vm3, %v2344_v53, %v2346_v5  ;;  %v2237_v14 = vsel %vm6725_vm1, %v2234_v1, %v2236_v13  ;;  %v2661_v16 = vld [vmem:[%s6645_s10 + $0x28] sm:$0xff]  ;;  %vm3477_vm1 = vcmask 48128  }
 0x375   :  { %2313 = vrot.lane.b32.xlu1 %v2300_v18, %s4454_s28  ;;  %2256 = vst.msk [vmem:[#allocation2 + $0xc0] sm:$0xff] %vm6726_vm8, %v2237_v14  ;;  %v2679_v18 = vld [vmem:[%s6646_s16 + $0x20] sm:$0xff] }
 0x379   :  { %2360 = vrot.lane.b32.xlu1 %v2347_v0, %s4453_s26  ;;  %v2680_v0 = vld [vmem:[%s6646_s16 + $0x28] sm:$0xff] }
 0x37a   :  { %v2100_v20 = vpop.permute.xlu1 %2099  ;;  %v1933_v21 = vpop.f32.mrb[26].mxu1 }
 0x37b   :  { %2120 = vst.msk [vmem:[#allocation2 + $0x30] sm:$0xff] %vm1161_vm5, %v2100_v20  ;;  %v2387_v22 = vld [vmem:[#allocation2 + $0x10] sm:$0xff]  ;;  %v1966_v23 = vmul.f32 %v5853_v37, %v1933_v21  ;;  %v1935_v25 = vpop.f32.mrb[27].mxu1  ;;  %v4395_v20 = vpack.c.bf16 %v2680_v0, %v2679_v18  ;;  %v6168_v18 = vld [vmem:[%s6647_s8] ss:$0 sm:$0xff] }
 0x37c   :  { %4124 = vmatmul.mubr.msk.f32.vlgmr.msra.gmra.mrb[16].mxu0 %vm2402_vm11, %v2387_v22  ;;  %v2662_v21 = vld [vmem:[%s6645_s10 + $0x30] sm:$0xff]  ;;  %v6173_v0 = vld [vmem:[%s6648_s9] ss:$0 sm:$0xff] }
 0x37d   :  { %v2145_v26 = vpop.permute.xlu0 %2144  ;;  %v1988_v19 = vadd.f32 %v5858_v17, %v1966_v23  ;;  %4360 = vmatpush3.bf16.msra.mxu0 %v4357_v8  ;;  %v2663_v23 = vld [vmem:[%s6645_s10 + $0x38] sm:$0xff]  ;;  %v2681_v25 = vld [vmem:[%s6646_s16 + $0x30] sm:$0xff] }
 0x37e   :  { %2166 = vst.msk [vmem:[#allocation2 + $0x20] sm:$0xff] %vm1210_vm7, %v2145_v26  ;;  %v2682_v26 = vld [vmem:[%s6646_s16 + $0x38] sm:$0xff] }
 0x37f   :  { %v2004_v27 = vmax.f32 %v1988_v19, 0.0 }
 0x381   :  { %v2193_v29 = vpop.permute.xlu0 %2192  ;;  %2270 = vrot.lane.b32.xlu1 %v2004_v27, %s4456_s0  ;;  %v2301_v30 = vrot.slane %v2004_v27, 1  ;;  %v2348_v31 = vrot.slane %v2004_v27, 2  ;;  %v2238_v32 = vrot.slane %v2004_v27, 7 }
 0x382   :  { %2214 = vst.msk [vmem:[#allocation2 + $0x20] sm:$0xff] %vm1242_vm13, %v2193_v29  ;;  %v4369_v29 = vpack.c.bf16 %v2663_v23, %v2662_v21 }
 0x383   :  { %v2302_v33 = vsel %vm295_vm2, %v2299_v12, %v2301_v30  ;;  %v2349_v34 = vsel %vm345_vm3, %v2346_v5, %v2348_v31  ;;  %v2239_v35 = vsel %vm6727_vm10, %v2236_v13, %v2238_v32  ;;  %v4361_v12 = vpack.c.bf16 %v2659_v4, %v2658_v9  ;;  %v2660_v13 = vld [vmem:[%s6645_s10 + $0x20] sm:$0xff] }
 0x384   :  { %2315 = vrot.lane.b32.xlu0 %v2302_v33, %s4454_s28  ;;  %2257 = vst.msk [vmem:[#allocation2 + $0xd0] sm:$0xff] %vm6728_vm14, %v2239_v35  ;;  %v4391_v5 = vpack.c.bf16 %v2678_v11, %v2677_v3  ;;  %v4365_v14 = vpack.c.bf16 %v2661_v16, %v2660_v13 }
 0x385   :  { %v2102_v36 = vpop.permute.xlu0 %2101  ;;  %4362 = vmatprep.subr.bf16.mxu0 %v4361_v12 }
 0x386   :  { %2121 = vst.msk [vmem:[#allocation2 + $0x40] sm:$0xff] %vm1161_vm5, %v2102_v36  ;;  %v1938_v38 = vpop.f32.mrb[28].mxu1  ;;  %4392 = vmatprep.subr.bf16.mxu1 %v4391_v5  ;;  %4364 = vmatpush3.bf16.msra.mxu0 %v4361_v12 }
 0x387   :  { %v2147_v15 = vpop.permute.xlu1 %2146  ;;  %v1967_v39 = vmul.f32 %v5853_v37, %v1938_v38  ;;  %v1940_v40 = vpop.f32.mrb[29].mxu1  ;;  %4394 = vmatpush3.bf16.msra.mxu1 %v4391_v5  ;;  %4366 = vmatprep.subr.bf16.mxu0 %v4365_v14 }
 0x388   :  { %2167 = vst.msk [vmem:[#allocation2 + $0x30] sm:$0xff] %vm1210_vm7, %v2147_v15  ;;  %2362 = vrot.lane.b32.xlu0 %v2349_v34, %s4453_s26  ;;  %4396 = vmatprep.subr.bf16.mxu1 %v4395_v20 }
 0x389   :  { %v2388_v24 = vld [vmem:[#allocation2 + $0x20] sm:$0xff]  ;;  %v1989_v41 = vadd.f32 %v5858_v17, %v1967_v39 }
 0x38a   :  { %4126 = vmatprep.mubr.msk.f32.mxu0 %vm2402_vm11, %v2388_v24  ;;  %4368 = vmatpush3.bf16.msra.mxu0 %v4365_v14 }
 0x38b   :  { %v2195_v42 = vpop.permute.xlu1 %2194  ;;  %v2005_v43 = vmax.f32 %v1989_v41, 0.0  ;;  %4398 = vmatpush3.bf16.msra.mxu1 %v4395_v20  ;;  %4370 = vmatprep.subr.bf16.mxu0 %v4369_v29 }
 0x38c   :  { %2215 = vst.msk [vmem:[#allocation2 + $0x30] sm:$0xff] %vm1242_vm13, %v2195_v42 }
 0x38d   :  { %2272 = vrot.lane.b32.xlu0 %v2005_v43, %s4456_s0  ;;  %v2303_v44 = vrot.slane %v2005_v43, 1  ;;  %v2350_v45 = vrot.slane %v2005_v43, 2  ;;  %v2240_v47 = vrot.slane %v2005_v43, 7 }
 0x38e   :  { %v1943_v48 = vpop.f32.mrb[30].mxu1  ;;  %4372 = vmatpush3.bf16.msra.mxu0 %v4369_v29 }
 0x38f   :  { %v1968_v49 = vmul.f32 %v5853_v37, %v1943_v48  ;;  %v1945_v55 = vpop.f32.mrb[31].mxu1  ;;  %v2304_v56 = vsel %vm295_vm2, %v2301_v30, %v2303_v44  ;;  %v2351_v57 = vsel %vm345_vm3, %v2348_v31, %v2350_v45  ;;  %v2241_v58 = vsel %vm6719_vm0, %v2238_v32, %v2240_v47  ;;  %v2665_v48 = vld [vmem:[%s6645_s10 + $0x48] sm:$0xff] }
 0x390   :  { %2317 = vrot.lane.b32.xlu1 %v2304_v56, %s4454_s28  ;;  %2258 = vst.msk [vmem:[#allocation2 + $0xe0] sm:$0xff] %vm6729_vm15, %v2241_v58  ;;  %v4399_v30 = vpack.c.bf16 %v2682_v26, %v2681_v25  ;;  %v2683_v55 = vld [vmem:[%s6646_s16 + $0x40] sm:$0xff]  ;;  %v2684_v56 = vld [vmem:[%s6646_s16 + $0x48] sm:$0xff] }
 0x391   :  { %v1990_v59 = vadd.f32 %v5858_v17, %v1968_v49  ;;  %v4403_v58 = vpack.c.bf16 %v2684_v56, %v2683_v55 }
 0x392   :  { %4400 = vmatprep.subr.bf16.mxu1 %v4399_v30 }
 0x393   :  { %v2389_v60 = vld [vmem:[#allocation2 + $0x30] sm:$0xff]  ;;  %v2006_v50 = vmax.f32 %v1990_v59, 0.0  ;;  %4402 = vmatpush3.bf16.msra.mxu1 %v4399_v30 }
 0x394   :  { %4127 = vmatmul.mubr.msk.f32.gmra.mrb[18].mxu0 %vm2402_vm11, %v2389_v60  ;;  %2364 = vrot.lane.b32.xlu1 %v2351_v57, %s4453_s26  ;;  %v2666_v59 = vld [vmem:[%s6645_s10 + $0x50] sm:$0xff] }
 0x395   :  { %v2305_v37 = vrot.slane %v2006_v50, 1  ;;  %v2352_v51 = vrot.slane %v2006_v50, 2  ;;  %v2242_v62 = vrot.slane %v2006_v50, 7  ;;  %4404 = vmatprep.subr.bf16.mxu1 %v4403_v58  ;;  %v2685_v60 = vld [vmem:[%s6646_s16 + $0x50] sm:$0xff] }
 0x397   :  { %v2104_v52 = vpop.permute.xlu1 %2103  ;;  %v2306_v53 = vsel %vm295_vm2, %v2303_v44, %v2305_v37  ;;  %v2353_v1 = vsel %vm345_vm3, %v2350_v45, %v2352_v51  ;;  %v2243_v54 = vsel %vm6730_vm6, %v2240_v47, %v2242_v62  ;;  %vm2171_vm2 = vcmask 588160   ;;  %v2664_v47 = vld [vmem:[%s6645_s10 + $0x40] sm:$0xff]  ;;  %4406 = vmatpush3.bf16.msra.mxu1 %v4403_v58  ;;  %v2670_v58 = vld [vmem:[%s6649_s13 + $0x8] sm:$0xff] }
 0x398   :  { %2122 = vst.msk [vmem:[#allocation2 + $0x50] sm:$0xff] %vm1161_vm5, %v2104_v52  ;;  %2274 = vrot.lane.b32.xlu1 %v2006_v50, %s4456_s0  ;;  %2319 = vrot.lane.b32.xlu0 %v2306_v53, %s4454_s28  ;;  %v4373_v49 = vpack.c.bf16 %v2665_v48, %v2664_v47 }
 0x399   :  { %2259 = vst.msk [vmem:[#allocation2 + $0xf0] sm:$0xff] %vm6722_vm4, %v2243_v54  ;;  %4245 = vmatprep.subr.mxu1 %v2685_v60 }
 0x39a   :  { %v2149_v17 = vpop.permute.xlu0 %2148  ;;  %4374 = vmatprep.subr.bf16.mxu0 %v4373_v49 }
 0x39b   :  { %2168 = vst.msk [vmem:[#allocation2 + $0x40] sm:$0xff] %vm1210_vm7, %v2149_v17  ;;  %4376 = vmatpush3.bf16.msra.mxu0 %v4373_v49  ;;  %4246 = vmatpush3.msra.mxu1 %v2685_v60 }
 0x39c   :  { %2321 = vrot.lane.b32.xlu1 %v2305_v37, %s4454_s28  ;;  %2366 = vrot.lane.b32.xlu0 %v2353_v1, %s4453_s26 }
 0x39d   :  { %4167 = vmatprep.subr.mxu0 %v2666_v59  ;;  %4414 = vmatprep.subr.bf16.mxu1 %v4452_v61 }
 0x39e   :  { %v2197_v10 = vpop.permute.xlu0 %2196 }
 0x39f   :  { %2216 = vst.msk [vmem:[#allocation2 + $0x40] sm:$0xff] %vm1242_vm13, %v2197_v10  ;;  %4168 = vmatpush3.msra.mxu0 %v2666_v59 }
 0x3a0   :  { %2368 = vrot.lane.b32.xlu1 %v2352_v51, %s4453_s26 }
 0x3a2   :  { %v2106_v22 = vpop.permute.xlu0 %2105 }
 0x3a3   :  { %2123 = vst.msk [vmem:[#allocation2 + $0x60] sm:$0xff] %vm1161_vm5, %v2106_v22 }
 0x3a5   :  { %v2151_v19 = vpop.permute.xlu1 %2150 }
 0x3a6   :  { %v2390_v27 = vld [vmem:[#allocation2 + $0x40] sm:$0xff]  ;;  %2169 = vst.msk [vmem:[#allocation2 + $0x50] sm:$0xff] %vm1210_vm7, %v2151_v19 }
 0x3a7   :  { %4129 = vmatprep.mubr.msk.f32.mxu0 %vm2402_vm11, %v2390_v27 }
 0x3a9   :  { %v2199_v31 = vpop.permute.xlu1 %2198 }
 0x3aa   :  { %2217 = vst.msk [vmem:[#allocation2 + $0x50] sm:$0xff] %vm1242_vm13, %v2199_v31 }
 0x3ab   :  { %v2153_v32 = vpop.permute.xlu0 %2152 }
 0x3ac   :  { %2170 = vst.msk [vmem:[#allocation2 + $0x60] sm:$0xff] %vm1210_vm7, %v2153_v32 }
 0x3ad   :  { %v2108_v33 = vpop.permute.xlu1 %2107 }
 0x3ae   :  { %2124 = vst.msk [vmem:[#allocation2 + $0x70] sm:$0xff] %vm1161_vm5, %v2108_v33 }
 0x3af   :  { %v2201_v34 = vpop.permute.xlu0 %2200 }
 0x3b0   :  { %2218 = vst.msk [vmem:[#allocation2 + $0x60] sm:$0xff] %vm1242_vm13, %v2201_v34 }
 0x3b1   :  { %v2155_v35 = vpop.permute.xlu1 %2154  ;;  %v2391_v36 = vld [vmem:[#allocation2 + $0x50] sm:$0xff] }
 0x3b2   :  { %2172 = vst.msk [vmem:[#allocation2 + $0x70] sm:$0x7f] %vm2171_vm2, %v2155_v35  ;;  %4130 = vmatmul.mubr.msk.f32.gmra.mrb[20].mxu0 %vm2402_vm11, %v2391_v36 }
 0x3b3   :  { %v2261_v15 = vpop.permute.xlu0 %2260 }
 0x3b4   :  { %2284 = vst.msk [vmem:[#allocation2 + $0x80] sm:$0xff] %vm1161_vm5, %v2261_v15 }
 0x3b5   :  { %v2203_v38 = vpop.permute.xlu1 %2202 }
 0x3b6   :  { %2220 = vst.msk [vmem:[#allocation2 + $0x70] sm:$0x3f] %vm2219_vm12, %v2203_v38 }
 0x3b7   :  { %v2392_v39 = vld [vmem:[#allocation2 + $0x60] sm:$0xff] }
 0x3b8   :  { %4132 = vmatprep.mubr.msk.f32.mxu0 %vm2402_vm11, %v2392_v39 }
 0x3bd   :  { %v2393_v40 = vld [vmem:[#allocation2 + $0x70] sm:$0xff] }
 0x3be   :  { %4133 = vmatmul.mubr.msk.f32.gmra.mrb[22].mxu0 %vm2402_vm11, %v2393_v40 }
 0x3c1   :  { %v2263_v24 = vpop.permute.xlu1 %2262 }
 0x3c2   :  { %2285 = vst.msk [vmem:[#allocation2 + $0x90] sm:$0xff] %vm1161_vm5, %v2263_v24 }
 0x3c4   :  { %v2308_v41 = vpop.permute.xlu0 %2307 }
 0x3c5   :  { %2331 = vst.msk [vmem:[#allocation2 + $0x80] sm:$0xff] %vm1210_vm7, %v2308_v41 }
 0x3c8   :  { %v2355_v42 = vpop.permute.xlu0 %2354 }
 0x3c9   :  { %2378 = vst.msk [vmem:[#allocation2 + $0x80] sm:$0xff] %vm1242_vm13, %v2355_v42 }
 0x3cc   :  { %v2265_v43 = vpop.permute.xlu0 %2264 }
 0x3cd   :  { %2286 = vst.msk [vmem:[#allocation2 + $0xa0] sm:$0xff] %vm1161_vm5, %v2265_v43 }
 0x3cf   :  { %v2310_v44 = vpop.permute.xlu1 %2309 }
 0x3d0   :  { %2332 = vst.msk [vmem:[#allocation2 + $0x90] sm:$0xff] %vm1210_vm7, %v2310_v44  ;;  %v2394_v45 = vld [vmem:[#allocation2 + $0x80] sm:$0xff] }
 0x3d1   :  { %4135 = vmatprep.mubr.msk.f32.mxu0 %vm2402_vm11, %v2394_v45 }
 0x3d3   :  { %v2357_v57 = vpop.permute.xlu1 %2356 }
 0x3d4   :  { %2379 = vst.msk [vmem:[#allocation2 + $0x90] sm:$0xff] %vm1242_vm13, %v2357_v57  ;;  %v2669_v57 = vld [vmem:[%s6649_s13] sm:$0xff] }
 0x3d5   :  { %v4377_v59 = vpack.c.bf16 %v2670_v58, %v2669_v57 }
 0x3d7   :  { %4378 = vmatprep.subr.bf16.mxu0 %v4377_v59 }
 0x3d9   :  { %v2267_v50 = vpop.permute.xlu1 %2266 }
 0x3da   :  { %2287 = vst.msk [vmem:[#allocation2 + $0xb0] sm:$0xff] %vm1161_vm5, %v2267_v50  ;;  %v2671_v50 = vld [vmem:[%s6649_s13 + $0x10] sm:$0xff] }
 0x3db   :  { %v2395_v37 = vld [vmem:[#allocation2 + $0x90] sm:$0xff] }
 0x3dc   :  { %4136 = vmatmul.mubr.msk.f32.gmra.mrb[24].mxu0 %vm2402_vm11, %v2395_v37  ;;  %v2312_v51 = vpop.permute.xlu0 %2311  ;;  %v2672_v37 = vld [vmem:[%s6649_s13 + $0x18] sm:$0x3f] }
 0x3dd   :  { %2333 = vst.msk [vmem:[#allocation2 + $0xa0] sm:$0xff] %vm1210_vm7, %v2312_v51 }
 0x3e0   :  { %v2359_v62 = vpop.permute.xlu0 %2358 }
 0x3e1   :  { %2380 = vst.msk [vmem:[#allocation2 + $0xa0] sm:$0xff] %vm1242_vm13, %v2359_v62 }
 0x3e4   :  { %v2269_v52 = vpop.permute.xlu0 %2268 }
 0x3e5   :  { %2288 = vst.msk [vmem:[#allocation2 + $0xc0] sm:$0xff] %vm1161_vm5, %v2269_v52  ;;  %v4381_v52 = vpack.c.bf16 %v2672_v37, %v2671_v50 }
 0x3e7   :  { %v2314_v53 = vpop.permute.xlu1 %2313 }
 0x3e8   :  { %2334 = vst.msk [vmem:[#allocation2 + $0xb0] sm:$0xff] %vm1210_vm7, %v2314_v53  ;;  %v2396_v1 = vld [vmem:[#allocation2 + $0xa0] sm:$0xff] }
 0x3e9   :  { %4138 = vmatprep.mubr.msk.f32.mxu0 %vm2402_vm11, %v2396_v1  ;;  %v6384_v1 = vld [vmem:[%s6654_s15] ss:$0 sm:$0xff] }
 0x3eb   :  { %v2361_v54 = vpop.permute.xlu1 %2360 }
 0x3ec   :  { %2381 = vst.msk [vmem:[#allocation2 + $0xb0] sm:$0xff] %vm1242_vm13, %v2361_v54 }
 0x3f3   :  { %v2397_v17 = vld [vmem:[#allocation2 + $0xb0] sm:$0xff]  ;;  %v2271_v6 = vpop.permute.xlu1 %2270 }
 0x3f4   :  { %4139 = vmatmul.mubr.msk.f32.gmra.mrb[26].mxu0 %vm2402_vm11, %v2397_v17  ;;  %2289 = vst.msk [vmem:[#allocation2 + $0xd0] sm:$0xff] %vm1161_vm5, %v2271_v6 }
 0x3f6   :  { %v2316_v7 = vpop.permute.xlu0 %2315 }
 0x3f7   :  { %2335 = vst.msk [vmem:[#allocation2 + $0xc0] sm:$0xff] %vm1210_vm7, %v2316_v7 }
 0x3fa   :  { %v2363_v8 = vpop.permute.xlu0 %2362 }
 0x3fb   :  { %2382 = vst.msk [vmem:[#allocation2 + $0xc0] sm:$0xff] %vm1242_vm13, %v2363_v8 }
 0x3ff   :  { %v2273_v46 = vpop.permute.xlu0 %2272 }
 0x400   :  { %2290 = vst.msk [vmem:[#allocation2 + $0xe0] sm:$0xff] %vm1161_vm5, %v2273_v46 }
 0x402   :  { %v2318_v63 = vpop.permute.xlu1 %2317  ;;  %v2398_v9 = vld [vmem:[#allocation2 + $0xc0] sm:$0xff] }
 0x403   :  { %2336 = vst.msk [vmem:[#allocation2 + $0xd0] sm:$0xff] %vm1210_vm7, %v2318_v63  ;;  %4141 = vmatprep.mubr.msk.f32.mxu0 %vm2402_vm11, %v2398_v9 }
 0x406   :  { %v2365_v10 = vpop.permute.xlu1 %2364 }
 0x407   :  { %2383 = vst.msk [vmem:[#allocation2 + $0xd0] sm:$0xff] %vm1242_vm13, %v2365_v10 }
 0x40a   :  { %v2275_v2 = vpop.permute.xlu1 %2274  ;;  %v2320_v4 = vpop.permute.xlu0 %2319 }
 0x40b   :  { %2291 = vst.msk [vmem:[#allocation2 + $0xf0] sm:$0xff] %vm1161_vm5, %v2275_v2  ;;  %vm4459_vm5 = vmmov 1  }
 0x40c   :  { %2337 = vst.msk [vmem:[#allocation2 + $0xe0] sm:$0xff] %vm1210_vm7, %v2320_v4  ;;  %vm6222_vm7 = vmpackc.low %vm345_vm3, %vm4459_vm5 }
 0x40e   :  { %v2322_v3 = vpop.permute.xlu1 %2321  ;;  %v2367_v11 = vpop.permute.xlu0 %2366  ;;  %v2399_v12 = vld [vmem:[#allocation2 + $0xd0] sm:$0xff] }
 0x40f   :  { %2338 = vst.msk [vmem:[#allocation2 + $0xf0] sm:$0x7f] %vm2171_vm2, %v2322_v3  ;;  %4142 = vmatmul.mubr.msk.f32.gmra.mrb[28].mxu0 %vm2402_vm11, %v2399_v12 }
 0x410   :  { %2384 = vst.msk [vmem:[#allocation2 + $0xe0] sm:$0xff] %vm1242_vm13, %v2367_v11  ;;  %vm2693_vm13 = vcmask 719872  }
 0x412   :  { %v2369_v5 = vpop.permute.xlu1 %2368 }
 0x413   :  { %2385 = vst.msk [vmem:[#allocation2 + $0xf0] sm:$0x3f] %vm2219_vm12, %v2369_v5 }
 0x417   :  { %v2400_v13 = vld [vmem:[#allocation2 + $0xe0] sm:$0xff] }
 0x418   :  { %4144 = vmatprep.mubr.msk.f32.mxu0 %vm2402_vm11, %v2400_v13 }
 0x41a   :  { %v2401_v16 = vld [vmem:[#allocation2 + $0xf0] sm:$0xff] }
 0x41b   :  { %4145 = vmatmul.mubr.msk.f32.gmra.mrb[30].mxu0 %vm2402_vm11, %v2401_v16  ;;  %vm4460_vm11 = vmmov 0  }
 0x44f   :  { %v4125_v14 = vpop.f32.mrb[16].mxu0 }
 0x450   :  { %v2603_v20 = vmul.f32 %v4125_v14, %v6168_v18  ;;  %v2517_v21 = vpop.f32.mrb[17].mxu0 }
 0x451   :  { %v2602_v22 = vmul.f32 %v6168_v18, %v2517_v21 }
 0x452   :  { %v2625_v23 = vadd.f32 %v6173_v0, %v2603_v20 }
 0x453   :  { %v2624_v25 = vadd.f32 %v6173_v0, %v2602_v22 }
 0x454   :  { %v2641_v19 = vmax.f32 %v2625_v23, 0.0 }
 0x455   :  { %v2640_v26 = vmax.f32 %v2624_v25, 0.0 }
 0x457   :  { %4169 = vmatprep.mubr.msk.f32.mxu0 %vm2693_vm13, %v2640_v26  ;;  %4247 = vmatprep.mubr.msk.f32.mxu1 %vm2693_vm13, %v2640_v26 }
 0x458   :  { %4170 = vmatmul.mubr.msk.f32.vlgmr.msra.gmra.mrb[32].mxu0 %vm2693_vm13, %v2641_v19  ;;  %4248 = vmatmul.mubr.msk.f32.vlgmr.msra.gmra.mrb[32].mxu1 %vm2693_vm13, %v2641_v19 }
 0x459   :  { %4380 = vmatpush3.bf16.msra.mxu0 %v4377_v59 }
 0x45a   :  { %4383 = vmatprep.subr.msk.bf16.mxu0 %vm6222_vm7, %v4381_v52 }
 0x45d   :  { %4386 = vmatpush3.bf16.msk.msra.mxu0 %vm6222_vm7, %v4381_v52 }
 0x45e   :  { %4407 = vmatprep.subr.bf16.mxu0 %v4452_v61 }
 0x467   :  { %v4128_v27 = vpop.f32.mrb[18].mxu0 }
 0x468   :  { %v2605_v29 = vmul.f32 %v4128_v27, %v6168_v18  ;;  %v2527_v30 = vpop.f32.mrb[19].mxu0 }
 0x469   :  { %v2604_v31 = vmul.f32 %v6168_v18, %v2527_v30 }
 0x46a   :  { %v2627_v32 = vadd.f32 %v6173_v0, %v2605_v29 }
 0x46b   :  { %v2626_v33 = vadd.f32 %v6173_v0, %v2604_v31  ;;  %v6264_v31 = vld [vmem:[%s6650_s11] ss:$0 sm:$0xff] }
 0x46c   :  { %v2643_v35 = vmax.f32 %v2627_v32, 0.0 }
 0x46d   :  { %v2642_v34 = vmax.f32 %v2626_v33, 0.0 }
 0x46f   :  { %4172 = vmatprep.mubr.msk.f32.mxu0 %vm2693_vm13, %v2642_v34  ;;  %4250 = vmatprep.mubr.msk.f32.mxu1 %vm2693_vm13, %v2642_v34 }
 0x470   :  { %4173 = vmatmul.mubr.msk.f32.gmra.mrb[34].mxu0 %vm2693_vm13, %v2643_v35  ;;  %4251 = vmatmul.mubr.msk.f32.gmra.mrb[34].mxu1 %vm2693_vm13, %v2643_v35 }
 0x485   :  { %v4131_v36 = vpop.f32.mrb[20].mxu0 }
 0x486   :  { %v2607_v15 = vmul.f32 %v4131_v36, %v6168_v18  ;;  %v2537_v38 = vpop.f32.mrb[21].mxu0 }
 0x487   :  { %v2606_v39 = vmul.f32 %v6168_v18, %v2537_v38 }
 0x488   :  { %v2629_v40 = vadd.f32 %v6173_v0, %v2607_v15 }
 0x489   :  { %v2628_v24 = vadd.f32 %v6173_v0, %v2606_v39 }
 0x48a   :  { %v2645_v42 = vmax.f32 %v2629_v40, 0.0 }
 0x48b   :  { %v2644_v41 = vmax.f32 %v2628_v24, 0.0 }
 0x48d   :  { %4175 = vmatprep.mubr.msk.f32.mxu0 %vm2693_vm13, %v2644_v41  ;;  %4253 = vmatprep.mubr.msk.f32.mxu1 %vm2693_vm13, %v2644_v41 }
 0x48e   :  { %4176 = vmatmul.mubr.msk.f32.gmra.mrb[36].mxu0 %vm2693_vm13, %v2645_v42  ;;  %4254 = vmatmul.mubr.msk.f32.gmra.mrb[36].mxu1 %vm2693_vm13, %v2645_v42 }
 0x491   :  { %v4134_v43 = vpop.f32.mrb[22].mxu0 }
 0x492   :  { %v2609_v44 = vmul.f32 %v4134_v43, %v6168_v18  ;;  %v2547_v45 = vpop.f32.mrb[23].mxu0 }
 0x493   :  { %v2608_v47 = vmul.f32 %v6168_v18, %v2547_v45 }
 0x494   :  { %v2631_v48 = vadd.f32 %v6173_v0, %v2609_v44 }
 0x495   :  { %v2630_v49 = vadd.f32 %v6173_v0, %v2608_v47 }
 0x496   :  { %v2647_v56 = vmax.f32 %v2631_v48, 0.0 }
 0x497   :  { %v2646_v55 = vmax.f32 %v2630_v49, 0.0 }
 0x499   :  { %4178 = vmatprep.mubr.msk.f32.mxu0 %vm2693_vm13, %v2646_v55  ;;  %4256 = vmatprep.mubr.msk.f32.mxu1 %vm2693_vm13, %v2646_v55 }
 0x49a   :  { %4179 = vmatmul.mubr.msk.f32.gmra.mrb[38].mxu0 %vm2693_vm13, %v2647_v56  ;;  %4257 = vmatmul.mubr.msk.f32.gmra.mrb[38].mxu1 %vm2693_vm13, %v2647_v56 }
 0x4af   :  { %v4137_v60 = vpop.f32.mrb[24].mxu0 }
 0x4b0   :  { %v2611_v51 = vmul.f32 %v4137_v60, %v6168_v18  ;;  %v2557_v62 = vpop.f32.mrb[25].mxu0 }
 0x4b1   :  { %v2610_v53 = vmul.f32 %v6168_v18, %v2557_v62 }
 0x4b2   :  { %v2633_v54 = vadd.f32 %v6173_v0, %v2611_v51 }
 0x4b3   :  { %v2632_v17 = vadd.f32 %v6173_v0, %v2610_v53 }
 0x4b4   :  { %v2649_v7 = vmax.f32 %v2633_v54, 0.0 }
 0x4b5   :  { %v2648_v6 = vmax.f32 %v2632_v17, 0.0 }
 0x4b7   :  { %4181 = vmatprep.mubr.msk.f32.mxu0 %vm2693_vm13, %v2648_v6  ;;  %4259 = vmatprep.mubr.msk.f32.mxu1 %vm2693_vm13, %v2648_v6 }
 0x4b8   :  { %4182 = vmatmul.mubr.msk.f32.gmra.mrb[40].mxu0 %vm2693_vm13, %v2649_v7  ;;  %4260 = vmatmul.mubr.msk.f32.gmra.mrb[40].mxu1 %vm2693_vm13, %v2649_v7 }
 0x4c7   :  { %v4140_v8 = vpop.f32.mrb[26].mxu0 }
 0x4c8   :  { %v2613_v46 = vmul.f32 %v4140_v8, %v6168_v18  ;;  %v2567_v63 = vpop.f32.mrb[27].mxu0 }
 0x4c9   :  { %v2612_v9 = vmul.f32 %v6168_v18, %v2567_v63 }
 0x4ca   :  { %v2635_v10 = vadd.f32 %v6173_v0, %v2613_v46 }
 0x4cb   :  { %v2634_v2 = vadd.f32 %v6173_v0, %v2612_v9 }
 0x4cc   :  { %v2651_v3 = vmax.f32 %v2635_v10, 0.0 }
 0x4cd   :  { %v2650_v4 = vmax.f32 %v2634_v2, 0.0 }
 0x4cf   :  { %4184 = vmatprep.mubr.msk.f32.mxu0 %vm2693_vm13, %v2650_v4  ;;  %4262 = vmatprep.mubr.msk.f32.mxu1 %vm2693_vm13, %v2650_v4 }
 0x4d0   :  { %4185 = vmatmul.mubr.msk.f32.gmra.mrb[42].mxu0 %vm2693_vm13, %v2651_v3  ;;  %4263 = vmatmul.mubr.msk.f32.gmra.mrb[42].mxu1 %vm2693_vm13, %v2651_v3 }
 0x4e2   :  { %v4143_v11 = vpop.f32.mrb[28].mxu0 }
 0x4e3   :  { %v2615_v12 = vmul.f32 %v4143_v11, %v6168_v18  ;;  %v2577_v5 = vpop.f32.mrb[29].mxu0 }
 0x4e4   :  { %v2614_v13 = vmul.f32 %v6168_v18, %v2577_v5 }
 0x4e5   :  { %v2637_v16 = vadd.f32 %v6173_v0, %v2615_v12 }
 0x4e6   :  { %v2636_v14 = vadd.f32 %v6173_v0, %v2614_v13 }
 0x4e7   :  { %v2653_v21 = vmax.f32 %v2637_v16, 0.0 }
 0x4e8   :  { %v2652_v20 = vmax.f32 %v2636_v14, 0.0 }
 0x4ea   :  { %4187 = vmatprep.mubr.msk.f32.mxu0 %vm2693_vm13, %v2652_v20  ;;  %4265 = vmatprep.mubr.msk.f32.mxu1 %vm2693_vm13, %v2652_v20 }
 0x4eb   :  { %4188 = vmatmul.mubr.msk.f32.gmra.mrb[44].mxu0 %vm2693_vm13, %v2653_v21  ;;  %4266 = vmatmul.mubr.msk.f32.gmra.mrb[44].mxu1 %vm2693_vm13, %v2653_v21 }
 0x4ee   :  { %v4146_v22 = vpop.f32.mrb[30].mxu0 }
 0x4ef   :  { %v2617_v23 = vmul.f32 %v4146_v22, %v6168_v18  ;;  %v2587_v25 = vpop.f32.mrb[31].mxu0 }
 0x4f0   :  { %v2616_v26 = vmul.f32 %v6168_v18, %v2587_v25  ;;  %v6269_v18 = vld [vmem:[%s6651_s12] ss:$0 sm:$0xff] }
 0x4f1   :  { %v2639_v19 = vadd.f32 %v6173_v0, %v2617_v23 }
 0x4f2   :  { %v2638_v27 = vadd.f32 %v6173_v0, %v2616_v26 }
 0x4f3   :  { %v2655_v30 = vmax.f32 %v2639_v19, 0.0 }
 0x4f4   :  { %v2654_v29 = vmax.f32 %v2638_v27, 0.0 }
 0x4f6   :  { %4190 = vmatprep.mubr.msk.f32.mxu0 %vm2693_vm13, %v2654_v29  ;;  %4268 = vmatprep.mubr.msk.f32.mxu1 %vm2693_vm13, %v2654_v29 }
 0x4f7   :  { %4191 = vmatmul.mubr.msk.f32.gmra.mrb[46].mxu0 %vm2693_vm13, %v2655_v30  ;;  %4269 = vmatmul.mubr.msk.f32.gmra.mrb[46].mxu1 %vm2693_vm13, %v2655_v30 }
 0x4f8   :  { %4295 = vmatprep.mubr.msk.f32.mxu1 %vm4460_vm11, %v4451_v28 }
 0x52b   :  { %v4171_v0 = vpop.f32.mrb[32].mxu0  ;;  %v6271_v32 = vpop.f32.mrb[32].mxu1 }
 0x52c   :  { %v2894_v33 = vmul.f32 %v4171_v0, %v6264_v31  ;;  %v2808_v34 = vpop.f32.mrb[33].mxu0  ;;  %v6274_v35 = vpop.f32.mrb[33].mxu1 }
 0x52d   :  { %v2893_v36 = vmul.f32 %v6264_v31, %v2808_v34 }
 0x52e   :  { %v2916_v15 = vadd.f32 %v6269_v18, %v2894_v33 }
 0x52f   :  { %v2915_v38 = vadd.f32 %v6269_v18, %v2893_v36 }
 0x530   :  { %v2932_v40 = vmax.f32 %v2916_v15, 0.0 }
 0x531   :  { %v2931_v39 = vmax.f32 %v2915_v38, 0.0 }
 0x533   :  { %4201 = vmatprep.mubr.msk.f32.mxu0 %vm2947_vm9, %v2931_v39 }
 0x534   :  { %4202 = vmatmul.mubr.msk.f32.vlgmr.msra.gmra.mrb[48].mxu0 %vm2947_vm9, %v2932_v40 }
 0x543   :  { %v4174_v24 = vpop.f32.mrb[34].mxu0  ;;  %v6281_v41 = vpop.f32.mrb[34].mxu1 }
 0x544   :  { %v2896_v42 = vmul.f32 %v4174_v24, %v6264_v31  ;;  %v2818_v43 = vpop.f32.mrb[35].mxu0  ;;  %v6284_v44 = vpop.f32.mrb[35].mxu1 }
 0x545   :  { %v2895_v45 = vmul.f32 %v6264_v31, %v2818_v43 }
 0x546   :  { %v2918_v47 = vadd.f32 %v6269_v18, %v2896_v42 }
 0x547   :  { %v2917_v48 = vadd.f32 %v6269_v18, %v2895_v45 }
 0x548   :  { %v2934_v55 = vmax.f32 %v2918_v47, 0.0 }
 0x549   :  { %v2933_v49 = vmax.f32 %v2917_v48, 0.0 }
 0x54b   :  { %4204 = vmatprep.mubr.msk.f32.mxu0 %vm2947_vm9, %v2933_v49 }
 0x54c   :  { %4205 = vmatmul.mubr.msk.f32.gmra.mrb[50].mxu0 %vm2947_vm9, %v2934_v55 }
 0x561   :  { %v4177_v56 = vpop.f32.mrb[36].mxu0  ;;  %v6291_v57 = vpop.f32.mrb[36].mxu1 }
 0x562   :  { %v2898_v58 = vmul.f32 %v4177_v56, %v6264_v31  ;;  %v2828_v59 = vpop.f32.mrb[37].mxu0  ;;  %v6294_v60 = vpop.f32.mrb[37].mxu1 }
 0x563   :  { %v2897_v50 = vmul.f32 %v6264_v31, %v2828_v59 }
 0x564   :  { %v2920_v37 = vadd.f32 %v6269_v18, %v2898_v58 }
 0x565   :  { %v2919_v51 = vadd.f32 %v6269_v18, %v2897_v50 }
 0x566   :  { %v2936_v52 = vmax.f32 %v2920_v37, 0.0 }
 0x567   :  { %v2935_v62 = vmax.f32 %v2919_v51, 0.0  ;;  %v2688_v51 = vld [vmem:[%s6652_s19] sm:$0xff] }
 0x569   :  { %4207 = vmatprep.mubr.msk.f32.mxu0 %vm2947_vm9, %v2935_v62  ;;  %v2689_v62 = vld [vmem:[%s6652_s19 + $0x8] sm:$0xff] }
 0x56a   :  { %4208 = vmatmul.mubr.msk.f32.gmra.mrb[52].mxu0 %vm2947_vm9, %v2936_v52  ;;  %v4408_v52 = vpack.c.bf16 %v2689_v62, %v2688_v51 }
 0x56c   :  { %4409 = vmatpush3.bf16.msra.mxu0 %v4408_v52  ;;  %4416 = vmatpush3.bf16.msra.mxu1 %v4408_v52 }
 0x56d   :  { %v4180_v53 = vpop.f32.mrb[38].mxu0  ;;  %v6301_v54 = vpop.f32.mrb[38].mxu1  ;;  %4410 = vmatprep.subr.bf16.mxu0 %v4452_v61  ;;  %4417 = vmatprep.subr.bf16.mxu1 %v4452_v61 }
 0x56e   :  { %v2900_v17 = vmul.f32 %v4180_v53, %v6264_v31  ;;  %v2838_v6 = vpop.f32.mrb[39].mxu0  ;;  %v6304_v7 = vpop.f32.mrb[39].mxu1 }
 0x56f   :  { %v2899_v8 = vmul.f32 %v6264_v31, %v2838_v6 }
 0x570   :  { %v2922_v46 = vadd.f32 %v6269_v18, %v2900_v17 }
 0x571   :  { %v2921_v63 = vadd.f32 %v6269_v18, %v2899_v8 }
 0x572   :  { %v2938_v10 = vmax.f32 %v2922_v46, 0.0  ;;  %v6377_v46 = vld [vmem:[%s6653_s14] ss:$0 sm:$0xff] }
 0x573   :  { %v2937_v9 = vmax.f32 %v2921_v63, 0.0 }
 0x575   :  { %4210 = vmatprep.mubr.msk.f32.mxu0 %vm2947_vm9, %v2937_v9 }
 0x576   :  { %4211 = vmatmul.mubr.msk.f32.gmra.mrb[54].mxu0 %vm2947_vm9, %v2938_v10 }
 0x58b   :  { %v4183_v2 = vpop.f32.mrb[40].mxu0  ;;  %v6311_v4 = vpop.f32.mrb[40].mxu1 }
 0x58c   :  { %v2902_v3 = vmul.f32 %v4183_v2, %v6264_v31  ;;  %v2848_v11 = vpop.f32.mrb[41].mxu0  ;;  %v6314_v12 = vpop.f32.mrb[41].mxu1 }
 0x58d   :  { %v2901_v5 = vmul.f32 %v6264_v31, %v2848_v11 }
 0x58e   :  { %v2924_v13 = vadd.f32 %v6269_v18, %v2902_v3 }
 0x58f   :  { %v2923_v16 = vadd.f32 %v6269_v18, %v2901_v5 }
 0x590   :  { %v2940_v20 = vmax.f32 %v2924_v13, 0.0 }
 0x591   :  { %v2939_v14 = vmax.f32 %v2923_v16, 0.0 }
 0x593   :  { %4213 = vmatprep.mubr.msk.f32.mxu0 %vm2947_vm9, %v2939_v14 }
 0x594   :  { %4214 = vmatmul.mubr.msk.f32.gmra.mrb[56].mxu0 %vm2947_vm9, %v2940_v20 }
 0x5a3   :  { %v4186_v21 = vpop.f32.mrb[42].mxu0  ;;  %v6321_v22 = vpop.f32.mrb[42].mxu1 }
 0x5a4   :  { %v2904_v23 = vmul.f32 %v4186_v21, %v6264_v31  ;;  %v2858_v25 = vpop.f32.mrb[43].mxu0  ;;  %v6324_v26 = vpop.f32.mrb[43].mxu1 }
 0x5a5   :  { %v2903_v19 = vmul.f32 %v6264_v31, %v2858_v25 }
 0x5a6   :  { %v2926_v27 = vadd.f32 %v6269_v18, %v2904_v23 }
 0x5a7   :  { %v2925_v29 = vadd.f32 %v6269_v18, %v2903_v19 }
 0x5a8   :  { %v2942_v0 = vmax.f32 %v2926_v27, 0.0 }
 0x5a9   :  { %v2941_v30 = vmax.f32 %v2925_v29, 0.0 }
 0x5ab   :  { %4216 = vmatprep.mubr.msk.f32.mxu0 %vm2947_vm9, %v2941_v30 }
 0x5ac   :  { %4217 = vmatmul.mubr.msk.f32.gmra.mrb[58].mxu0 %vm2947_vm9, %v2942_v0 }
 0x5be   :  { %v4189_v33 = vpop.f32.mrb[44].mxu0  ;;  %v6331_v34 = vpop.f32.mrb[44].mxu1 }
 0x5bf   :  { %v2906_v36 = vmul.f32 %v4189_v33, %v6264_v31  ;;  %v2868_v15 = vpop.f32.mrb[45].mxu0  ;;  %v6334_v38 = vpop.f32.mrb[45].mxu1 }
 0x5c0   :  { %v2905_v39 = vmul.f32 %v6264_v31, %v2868_v15 }
 0x5c1   :  { %v2928_v40 = vadd.f32 %v6269_v18, %v2906_v36 }
 0x5c2   :  { %v2927_v24 = vadd.f32 %v6269_v18, %v2905_v39 }
 0x5c3   :  { %v2944_v43 = vmax.f32 %v2928_v40, 0.0 }
 0x5c4   :  { %v2943_v42 = vmax.f32 %v2927_v24, 0.0 }
 0x5c6   :  { %4219 = vmatprep.mubr.msk.f32.mxu0 %vm2947_vm9, %v2943_v42 }
 0x5c7   :  { %4220 = vmatmul.mubr.msk.f32.gmra.mrb[60].mxu0 %vm2947_vm9, %v2944_v43 }
 0x5ca   :  { %v4192_v45 = vpop.f32.mrb[46].mxu0  ;;  %v6341_v47 = vpop.f32.mrb[46].mxu1 }
 0x5cb   :  { %v2908_v48 = vmul.f32 %v4192_v45, %v6264_v31  ;;  %v2878_v49 = vpop.f32.mrb[47].mxu0  ;;  %v6344_v55 = vpop.f32.mrb[47].mxu1 }
 0x5cc   :  { %v2907_v56 = vmul.f32 %v6264_v31, %v2878_v49  ;;  %v2690_v31 = vld [vmem:[%s6652_s19 + $0x10] sm:$0xff] }
 0x5cd   :  { %v2930_v58 = vadd.f32 %v6269_v18, %v2908_v48 }
 0x5ce   :  { %v2929_v59 = vadd.f32 %v6269_v18, %v2907_v56  ;;  %v2691_v18 = vld [vmem:[%s6652_s19 + $0x18] sm:$0x3f] }
 0x5cf   :  { %v2946_v37 = vmax.f32 %v2930_v58, 0.0  ;;  %v4411_v53 = vpack.c.bf16 %v2691_v18, %v2690_v31 }
 0x5d0   :  { %v2945_v50 = vmax.f32 %v2929_v59, 0.0 }
 0x5d1   :  { %4413 = vmatpush3.bf16.msk.msra.mxu0 %vm6222_vm7, %v4411_v53  ;;  %4420 = vmatpush3.bf16.msk.msra.mxu1 %vm6222_vm7, %v4411_v53 }
 0x5d2   :  { %4222 = vmatprep.mubr.msk.f32.mxu0 %vm2947_vm9, %v2945_v50  ;;  %4282 = vmatprep.subr.mxu0 %v4451_v28 }
 0x5d3   :  { %4223 = vmatmul.mubr.msk.f32.gmra.mrb[62].mxu0 %vm2947_vm9, %v2946_v37 }
 0x5d4   :  { %4279 = vmatprep.mubr.msk.f32.mxu0 %vm4460_vm11, %v4451_v28 }
 0x607   :  { %v4203_v17 = vpop.f32.mrb[48].mxu0 }
 0x608   :  { %v3065_v6 = vpop.f32.mrb[49].mxu0  ;;  %v3151_v63 = vmul.f32 %v4203_v17, %v6377_v46 }
 0x609   :  { %v3150_v9 = vmul.f32 %v6377_v46, %v3065_v6 }
 0x60a   :  { %v6388_v2 = vadd.f32 %v6384_v1, %v3151_v63 }
 0x60b   :  { %v6391_v3 = vadd.f32 %v6384_v1, %v3150_v9 }
 0x60c   :  { %v3378_v16 = vsel %vm2947_vm9, %v6388_v2, 0.0 }
 0x60d   :  { %v3377_v14 = vsel %vm2947_vm9, %v6391_v3, 0.0 }
 0x60e   :  { %v3379_v25 = vadd.f32 %v3378_v16, %v3377_v14 }
 0x61f   :  { %v4206_v8 = vpop.f32.mrb[50].mxu0 }
 0x620   :  { %v3075_v61 = vpop.f32.mrb[51].mxu0  ;;  %v3153_v20 = vmul.f32 %v4206_v8, %v6377_v46 }
 0x621   :  { %v3152_v10 = vmul.f32 %v6377_v46, %v3075_v61 }
 0x622   :  { %v6405_v19 = vadd.f32 %v6384_v1, %v3153_v20 }
 0x623   :  { %v6394_v11 = vadd.f32 %v6384_v1, %v3152_v10 }
 0x624   :  { %v3382_v0 = vsel %vm2947_vm9, %v6405_v19, 0.0 }
 0x625   :  { %v3380_v23 = vsel %vm2947_vm9, %v6394_v11, 0.0 }
 0x626   :  { %v3381_v29 = vadd.f32 %v3380_v23, %v3379_v25 }
 0x628   :  { %v3383_v36 = vadd.f32 %v3382_v0, %v3381_v29 }
 0x63d   :  { %v4209_v5 = vpop.f32.mrb[52].mxu0 }
 0x63e   :  { %v3085_v13 = vpop.f32.mrb[53].mxu0  ;;  %v3155_v30 = vmul.f32 %v4209_v5, %v6377_v46 }
 0x63f   :  { %v3154_v21 = vmul.f32 %v6377_v46, %v3085_v13 }
 0x640   :  { %v6416_v15 = vadd.f32 %v6384_v1, %v3155_v30 }
 0x641   :  { %v6408_v27 = vadd.f32 %v6384_v1, %v3154_v21 }
 0x642   :  { %v3386_v45 = vsel %vm2947_vm9, %v6416_v15, 0.0 }
 0x643   :  { %v3384_v33 = vsel %vm2947_vm9, %v6408_v27, 0.0 }
 0x644   :  { %v3385_v40 = vadd.f32 %v3384_v33, %v3383_v36 }
 0x646   :  { %v3387_v56 = vadd.f32 %v3386_v45, %v3385_v40 }
 0x649   :  { %v4212_v39 = vpop.f32.mrb[54].mxu0 }
 0x64a   :  { %v3157_v24 = vmul.f32 %v4212_v39, %v6377_v46  ;;  %v3095_v42 = vpop.f32.mrb[55].mxu0 }
 0x64b   :  { %v3156_v43 = vmul.f32 %v6377_v46, %v3095_v42 }
 0x64c   :  { %v6423_v48 = vadd.f32 %v6384_v1, %v3157_v24 }
 0x64d   :  { %v6426_v49 = vadd.f32 %v6384_v1, %v3156_v43 }
 0x64e   :  { %v3390_v50 = vsel %vm2947_vm9, %v6423_v48, 0.0 }
 0x64f   :  { %v3388_v58 = vsel %vm2947_vm9, %v6426_v49, 0.0 }
 0x650   :  { %v3389_v59 = vadd.f32 %v3388_v58, %v3387_v56 }
 0x652   :  { %v3391_v37 = vadd.f32 %v3390_v50, %v3389_v59 }
 0x654   :  { %v3392_v51 = vrot.slane %v3391_v37, 4 }
 0x656   :  { %v3393_v62 = vadd.f32 %v3392_v51, %v3391_v37 }
 0x658   :  { %v3394_v52 = vrot.slane %v3393_v62, 2 }
 0x65a   :  { %v3395_v31 = vadd.f32 %v3394_v52, %v3393_v62 }
 0x65c   :  { %v3396_v18 = vrot.slane %v3395_v31, 1 }
 0x65e   :  { %v3397_v53 = vadd.f32 %v3396_v18, %v3395_v31 }
 0x660   :  { %v3399_v17 = vmul.f32 0.015625, %v3397_v53 }
 0x662   :  { %4280 = vmatmul.mubr.msk.f32.vlgmr.msra.gmra.mrb[64].mxu0 %vm2947_vm9, %v3399_v17 }
 0x663   :  { %4284 = vmatprep.mubr.msk.f32.mxu0 %vm4460_vm11, %v4451_v28 }
 0x667   :  { %v4215_v6 = vpop.f32.mrb[56].mxu0 }
 0x668   :  { %v3105_v8 = vpop.f32.mrb[57].mxu0  ;;  %v3159_v9 = vmul.f32 %v4215_v6, %v6377_v46 }
 0x669   :  { %v3158_v10 = vmul.f32 %v6377_v46, %v3105_v8 }
 0x66a   :  { %v6439_v13 = vadd.f32 %v6384_v1, %v3159_v9 }
 0x66b   :  { %v6442_v16 = vadd.f32 %v6384_v1, %v3158_v10  ;;  %v2692_v10 = vld [vmem:[%s6655_s20] sm:$0x3f] }
 0x66c   :  { %v3597_v23 = vsel %vm2947_vm9, %v6439_v13, 0.0  ;;  %4283 = vmatpush3.msk.msra.mxu0 %vm345_vm3, %v2692_v10 }
 0x66d   :  { %v3596_v25 = vsel %vm2947_vm9, %v6442_v16, 0.0  ;;  %4298 = vmatprep.subr.mxu0 %v4451_v28 }
 0x66e   :  { %v3598_v33 = vadd.f32 %v3597_v23, %v3596_v25 }
 0x67f   :  { %v4218_v61 = vpop.f32.mrb[58].mxu0 }
 0x680   :  { %v3115_v63 = vpop.f32.mrb[59].mxu0  ;;  %v3161_v29 = vmul.f32 %v4218_v61, %v6377_v46 }
 0x681   :  { %v3160_v5 = vmul.f32 %v6377_v46, %v3115_v63 }
 0x682   :  { %v6456_v36 = vadd.f32 %v6384_v1, %v3161_v29 }
 0x683   :  { %v6445_v14 = vadd.f32 %v6384_v1, %v3160_v5 }
 0x684   :  { %v3601_v42 = vsel %vm2947_vm9, %v6456_v36, 0.0 }
 0x685   :  { %v3599_v0 = vsel %vm2947_vm9, %v6445_v14, 0.0 }
 0x686   :  { %v3600_v40 = vadd.f32 %v3599_v0, %v3598_v33 }
 0x688   :  { %v3602_v45 = vadd.f32 %v3601_v42, %v3600_v40 }
 0x69a   :  { %v4221_v20 = vpop.f32.mrb[60].mxu0 }
 0x69b   :  { %v3125_v21 = vpop.f32.mrb[61].mxu0  ;;  %v3163_v24 = vmul.f32 %v4221_v20, %v6377_v46 }
 0x69c   :  { %v3162_v30 = vmul.f32 %v6377_v46, %v3125_v21 }
 0x69d   :  { %v6467_v56 = vadd.f32 %v6384_v1, %v3163_v24 }
 0x69e   :  { %v6459_v39 = vadd.f32 %v6384_v1, %v3162_v30 }
 0x69f   :  { %v3605_v62 = vsel %vm2947_vm9, %v6467_v56, 0.0 }
 0x6a0   :  { %v3603_v43 = vsel %vm2947_vm9, %v6459_v39, 0.0 }
 0x6a1   :  { %v3604_v59 = vadd.f32 %v3603_v43, %v3602_v45  ;;  %v3560_v45 = vlaneseq }
 0x6a3   :  { %v3606_v18 = vadd.f32 %v3605_v62, %v3604_v59  ;;  %v6497_v59 = vshrl.u32 %v3560_v45, 7 }
 0x6a6   :  { %v4224_v58 = vpop.f32.mrb[62].mxu0 }
 0x6a7   :  { %v3165_v50 = vmul.f32 %v4224_v58, %v6377_v46  ;;  %v3135_v37 = vpop.f32.mrb[63].mxu0  ;;  %v6495_v58 = vld [vmem:[%s6656_s17] ss:$0 sm:$0xff] }
 0x6a8   :  { %v3164_v51 = vmul.f32 %v6377_v46, %v3135_v37  ;;  %v3339_v37 = vmul.f32 %v6495_v58, %v6274_v35  ;;  %v3341_v62 = vmul.f32 %v6495_v58, %v6284_v44  ;;  %v3345_v35 = vmul.f32 %v6495_v58, %v6304_v7 }
 0x6a9   :  { %v6474_v52 = vadd.f32 %v6384_v1, %v3165_v50  ;;  %v6504_v50 = vld [vmem:[%s6657_s18] ss:$0 sm:$0xff] }
 0x6aa   :  { %v6477_v31 = vadd.f32 %v6384_v1, %v3164_v51  ;;  %v3342_v51 = vmul.f32 %v6281_v41, %v6495_v58  ;;  %v3367_v7 = vadd.f32 %v6504_v50, %v3345_v35  ;;  %v3352_v35 = vmul.f32 %v6331_v34, %v6495_v58 }
 0x6ab   :  { %v3609_v6 = vsel %vm2947_vm9, %v6474_v52, 0.0 }
 0x6ac   :  { %v3607_v53 = vsel %vm2947_vm9, %v6477_v31, 0.0  ;;  %v3364_v44 = vadd.f32 %v6504_v50, %v3342_v51 }
 0x6ad   :  { %v3608_v17 = vadd.f32 %v3607_v53, %v3606_v18  ;;  %v3562_v18 = vsub.s32 0, %v6497_v59  ;;  %v3344_v53 = vmul.f32 %v6291_v57, %v6495_v58 }
 0x6af   :  { %v3610_v8 = vadd.f32 %v3609_v6, %v3608_v17  ;;  %v3346_v17 = vmul.f32 %v6301_v54, %v6495_v58 }
 0x6b1   :  { %v3611_v61 = vrot.slane %v3610_v8, 4  ;;  %v3368_v54 = vadd.f32 %v6504_v50, %v3346_v17  ;;  %v3349_v17 = vmul.f32 %v6495_v58, %v6324_v26 }
 0x6b3   :  { %v3612_v46 = vadd.f32 %v3611_v61, %v3610_v8  ;;  %v3361_v8 = vadd.f32 %v6504_v50, %v3339_v37  ;;  %v3363_v61 = vadd.f32 %v6504_v50, %v3341_v62  ;;  %v3348_v62 = vmul.f32 %v6311_v4, %v6495_v58 }
 0x6b4   :  { %v3353_v4 = vmul.f32 %v6495_v58, %v6344_v55  ;;  %v3371_v26 = vadd.f32 %v6504_v50, %v3349_v17 }
 0x6b5   :  { %v3613_v63 = vrot.slane %v3612_v46, 2 }
 0x6b6   :  { %v3375_v55 = vadd.f32 %v6504_v50, %v3353_v4 }
 0x6b7   :  { %v3614_v9 = vadd.f32 %v3613_v63, %v3612_v46 }
 0x6b9   :  { %v3615_v5 = vrot.slane %v3614_v9, 1 }
 0x6bb   :  { %v3616_v1 = vadd.f32 %v3615_v5, %v3614_v9 }
 0x6bd   :  { %v3617_v20 = vmul.f32 0.015625, %v3616_v1 }
 0x6bf   :  { %4296 = vmatmul.mubr.msk.f32.vlgmr.msra.gmra.mrb[48].mxu1 %vm2947_vm9, %v3617_v20 }
 0x735   :  { %v3472_v21 = vpop.f32.mrb[64].mxu0 }
 0x736   :  { %v3476_v23 = vmax.f32 %v3472_v21, 0.0  ;;  %v4281_v25 = vpop.f32.mrb[65].mxu0 }
 0x738   :  { %4285 = vmatmul.mubr.msk.f32.vlgmr.msra.gmra.mrb[66].mxu0 %vm3477_vm1, %v3476_v23 }
 0x739   :  { %4299 = vmatpush3.msk.msra.mxu0 %vm345_vm3, %v2692_v10  ;;  %4300 = vmatprep.mubr.msk.f32.mxu0 %vm4460_vm11, %v4451_v28  ;;  %v3340_v28 = vmul.f32 %v6271_v32, %v6495_v58  ;;  %v3343_v32 = vmul.f32 %v6495_v58, %v6294_v60  ;;  %v3366_v60 = vadd.f32 %v6504_v50, %v3344_v53 }
 0x73a   :  { %v3347_v53 = vmul.f32 %v6495_v58, %v6314_v12  ;;  %v3370_v12 = vadd.f32 %v6504_v50, %v3348_v62 }
 0x73b   :  { %v3362_v41 = vadd.f32 %v6504_v50, %v3340_v28  ;;  %v3365_v46 = vadd.f32 %v6504_v50, %v3343_v32  ;;  %v3350_v32 = vmul.f32 %v6321_v22, %v6495_v58 }
 0x73c   :  { %v3369_v22 = vadd.f32 %v6504_v50, %v3347_v53 }
 0x792   :  { %v3687_v29 = vpop.f32.mrb[48].mxu1 }
 0x793   :  { %v3691_v30 = vmax.f32 %v3687_v29, 0.0  ;;  %v4297_v0 = vpop.f32.mrb[49].mxu1 }
 0x795   :  { %4301 = vmatmul.mubr.msk.f32.vlgmr.msra.gmra.mrb[68].mxu0 %vm3477_vm1, %v3691_v30 }
 0x80b   :  { %v3550_v33 = vpop.f32.mrb[66].mxu0 }
 0x80c   :  { %v3926_v40 = vmul.f32 -1.442695, %v3550_v33  ;;  %v4286_v24 = vpop.f32.mrb[67].mxu0 }
 0x80e   :  { %4437 = vpow2.f32 %v3926_v40 }
 0x818   :  { %v4438_v42 = vpop.eup %4437 }
 0x819   :  { %v3557_v43 = vadd.f32 1.0, %v4438_v42 }
 0x81b   :  { %4439 = vrcp.f32 %v3557_v43 }
 0x825   :  { %v4440_v6 = vpop.eup %4439 }
 0x826   :  { %v3563_v57 = vrot.slane %v4440_v6, %v3562_v18  ;;  %v3351_v6 = vmul.f32 %v6495_v58, %v6334_v38  ;;  %v3374_v38 = vadd.f32 %v6504_v50, %v3352_v35 }
 0x828   :  { %v3564_v63 = vmul.f32 %v3563_v57, %v6391_v3  ;;  %v3565_v9 = vmul.f32 %v3563_v57, %v6388_v2  ;;  %v3566_v10 = vmul.f32 %v3563_v57, %v6394_v11  ;;  %v3567_v5 = vmul.f32 %v3563_v57, %v6405_v19 }
 0x829   :  { %v3568_v1 = vmul.f32 %v3563_v57, %v6408_v27  ;;  %v3569_v20 = vmul.f32 %v3563_v57, %v6416_v15  ;;  %v3570_v21 = vmul.f32 %v3563_v57, %v6426_v49  ;;  %v3571_v23 = vmul.f32 %v3563_v57, %v6423_v48 }
 0x82a   :  { %v3572_v25 = vadd.f32 %v3564_v63, %v3361_v8  ;;  %v3573_v29 = vadd.f32 %v3565_v9, %v3362_v41  ;;  %v3574_v30 = vadd.f32 %v3566_v10, %v3363_v61  ;;  %v3575_v0 = vadd.f32 %v3567_v5, %v3364_v44 }
 0x82b   :  { %v3576_v33 = vadd.f32 %v3568_v1, %v3365_v46  ;;  %v3577_v3 = vadd.f32 %v3569_v20, %v3366_v60  ;;  %v3578_v40 = vadd.f32 %v3570_v21, %v3367_v7  ;;  %v3579_v2 = vadd.f32 %v3571_v23, %v3368_v54 }
 0x82c   :  { %v3580_v24 = vmax.f32 %v3572_v25, 0.0  ;;  %v3581_v11 = vmax.f32 %v3573_v29, 0.0  ;;  %v3582_v42 = vmax.f32 %v3574_v30, 0.0  ;;  %v3583_v19 = vmax.f32 %v3575_v0, 0.0 }
 0x82d   :  { %v3584_v43 = vmax.f32 %v3576_v33, 0.0  ;;  %v3585_v27 = vmax.f32 %v3577_v3, 0.0  ;;  %v3586_v45 = vmax.f32 %v3578_v40, 0.0  ;;  %v3587_v15 = vmax.f32 %v3579_v2, 0.0 }
 0x82e   :  { %3588 = vst.msk [vmem:[%s6658_s21] sm:$0xff] %vm2947_vm9, %v3580_v24  ;;  %3589 = vst.msk [vmem:[%s6658_s21 + $0x8] sm:$0xff] %vm2947_vm9, %v3581_v11  ;;  %v3354_v41 = vmul.f32 %v6341_v47, %v6495_v58  ;;  %v3372_v44 = vadd.f32 %v6504_v50, %v3350_v32  ;;  %v3373_v61 = vadd.f32 %v6504_v50, %v3351_v6 }
 0x82f   :  { %3590 = vst.msk [vmem:[%s6658_s21 + $0x10] sm:$0xff] %vm2947_vm9, %v3582_v42  ;;  %3591 = vst.msk [vmem:[%s6658_s21 + $0x18] sm:$0xff] %vm2947_vm9, %v3583_v19 }
 0x830   :  { %3592 = vst.msk [vmem:[%s6658_s21 + $0x20] sm:$0xff] %vm2947_vm9, %v3584_v43  ;;  %3593 = vst.msk [vmem:[%s6658_s21 + $0x28] sm:$0xff] %vm2947_vm9, %v3585_v27  ;;  %v3376_v47 = vadd.f32 %v6504_v50, %v3354_v41 }
 0x831   :  { %3594 = vst.msk [vmem:[%s6658_s21 + $0x30] sm:$0xff] %vm2947_vm9, %v3586_v45  ;;  %3595 = vst.msk [vmem:[%s6658_s21 + $0x38] sm:$0xff] %vm2947_vm9, %v3587_v15 }
 0x868   :  { %v3761_v48 = vpop.f32.mrb[68].mxu0 }
 0x869   :  { %v3931_v49 = vmul.f32 -1.442695, %v3761_v48  ;;  %v4302_v28 = vpop.f32.mrb[69].mxu0 }
 0x86b   :  { %4441 = vpow2.f32 %v3931_v49 }
 0x875   :  { %v4442_v37 = vpop.eup %4441 }
 0x876   :  { %v3768_v51 = vadd.f32 1.0, %v4442_v37 }
 0x878   :  { %4443 = vrcp.f32 %v3768_v51 }
 0x882   :  { %v4444_v8 = vpop.eup %4443 }
 0x883   :  { %v3774_v34 = vrot.slane %v4444_v8, %v3562_v18 }
 0x885   :  { %v3775_v58 = vmul.f32 %v3774_v34, %v6442_v16  ;;  %v3776_v57 = vmul.f32 %v3774_v34, %v6439_v13  ;;  %v3777_v60 = vmul.f32 %v3774_v34, %v6445_v14  ;;  %v3778_v46 = vmul.f32 %v3774_v34, %v6456_v36 }
 0x886   :  { %v3779_v54 = vmul.f32 %v3774_v34, %v6459_v39  ;;  %v3780_v59 = vmul.f32 %v3774_v34, %v6467_v56  ;;  %v3781_v18 = vmul.f32 %v3774_v34, %v6477_v31  ;;  %v3782_v7 = vmul.f32 %v3774_v34, %v6474_v52 }
 0x887   :  { %v3783_v63 = vadd.f32 %v3775_v58, %v3369_v22  ;;  %v3784_v9 = vadd.f32 %v3776_v57, %v3370_v12  ;;  %v3785_v10 = vadd.f32 %v3777_v60, %v3371_v26  ;;  %v3786_v50 = vadd.f32 %v3778_v46, %v3372_v44 }
 0x888   :  { %v3787_v5 = vadd.f32 %v3779_v54, %v3373_v61  ;;  %v3788_v16 = vadd.f32 %v3780_v59, %v3374_v38  ;;  %v3789_v1 = vadd.f32 %v3781_v18, %v3375_v55  ;;  %v3790_v13 = vadd.f32 %v3782_v7, %v3376_v47 }
 0x889   :  { %v3791_v20 = vmax.f32 %v3783_v63, 0.0  ;;  %v3792_v14 = vmax.f32 %v3784_v9, 0.0  ;;  %v3793_v21 = vmax.f32 %v3785_v10, 0.0  ;;  %v3794_v36 = vmax.f32 %v3786_v50, 0.0 }
 0x88a   :  { %v3795_v23 = vmax.f32 %v3787_v5, 0.0  ;;  %v3796_v39 = vmax.f32 %v3788_v16, 0.0  ;;  %v3797_v25 = vmax.f32 %v3789_v1, 0.0  ;;  %v3798_v56 = vmax.f32 %v3790_v13, 0.0 }
 0x88b   :  { %3932 = vst.msk [vmem:[%s6658_s21 + $0x40] sm:$0xff] %vm2947_vm9, %v3791_v20  ;;  %3933 = vst.msk [vmem:[%s6658_s21 + $0x48] sm:$0xff] %vm2947_vm9, %v3792_v14 }
 0x88c   :  { %3934 = vst.msk [vmem:[%s6658_s21 + $0x50] sm:$0xff] %vm2947_vm9, %v3793_v21  ;;  %3935 = vst.msk [vmem:[%s6658_s21 + $0x58] sm:$0xff] %vm2947_vm9, %v3794_v36 }
 0x88d   :  { %3936 = vst.msk [vmem:[%s6658_s21 + $0x60] sm:$0xff] %vm2947_vm9, %v3795_v23  ;;  %3937 = vst.msk [vmem:[%s6658_s21 + $0x68] sm:$0xff] %vm2947_vm9, %v3796_v39 }
 0x88e   :  { %3938 = vst.msk [vmem:[%s6658_s21 + $0x70] sm:$0xff] %vm2947_vm9, %v3797_v25  ;;  %3939 = vst.msk [vmem:[%s6658_s21 + $0x78] sm:$0xff] %vm2947_vm9, %v3798_v56 }

</bundles_post_ra>
